<compile_context>
chip_gen: v6e
topology: v6e:2x2x1
jax: 0.10.0
libtpu: 0.0.40
codegen_flags: <defaults>
</compile_context>

<pallas_src>
import functools

import jax
import jax.numpy as jnp
import numpy as np
from jax import lax
from jax.experimental import pallas as pl
from jax.experimental.pallas import tpu as pltpu

_SLOPE = 0.01  # nn.LeakyReLU() default negative_slope


# ---------------------------------------------------------------------------
# Fused Resblock kernel: CBL(1x1) -> CBL(3x3) -> residual add
# ---------------------------------------------------------------------------

def _resblock_kernel(x_ref, w1_ref, s1_ref, b1_ref, w2_ref, s2_ref, b2_ref,
                     o_ref, hpad_ref, *, H, W, C, Ch, slope):
    """One batch element per grid step.  Channels-first, spatial flattened
    last so every load/store/accumulator is lane-dense.

    x_ref   : (1, C, H*W)    f32 input tile (residual path kept in f32)
    w1_ref  : (Ch, C)        bf16 1x1 conv weight (out, in)
    s1/b1   : (Ch, 1)        f32 folded BN scale / bias for CBL #1
    w2_ref  : (3, 3, C, Ch)  bf16 3x3 conv weight (ky, kx, out, in)
    s2/b2   : (C, 1)         f32 folded BN scale / bias for CBL #2
    o_ref   : (1, C, H*W)    f32 output tile
    hpad_ref: (Ch, H+2, W+2) f32 VMEM scratch (zero-padded hidden activation)
    """
    x = x_ref[0]                                      # (C, H*W) f32

    # ---- CBL 1x1: bf16 matmul (f32 acc) + folded BN + LeakyReLU ------------
    h = jnp.dot(w1_ref[...], x.astype(jnp.bfloat16),
                preferred_element_type=jnp.float32)   # (Ch, H*W) f32
    h = h * s1_ref[...] + b1_ref[...]
    h = jnp.where(h >= 0, h, slope * h)

    # ---- stage hidden activation into zero-padded VMEM scratch (halo) ------
    # Re-zero every step: scratch is per-core and the batch axis may be split
    # across TensorCores, so a program_id(0)==0 guard would be unsafe.
    hpad_ref[...] = jnp.zeros_like(hpad_ref)
    hpad_ref[:, 1:H + 1, 1:W + 1] = h.reshape(Ch, H, W)

    # ---- CBL 3x3: 9 shifted bf16 matmuls, exact f32 accumulation -----------
    w2 = w2_ref[...]                                  # (3, 3, C, Ch) bf16
    acc = jnp.zeros((C, H * W), jnp.float32)
    for dy in range(3):
        for dx in range(3):
            win = hpad_ref[:, dy:dy + H, dx:dx + W].reshape(Ch, H * W)
            acc = acc + jnp.dot(w2[dy, dx], win.astype(jnp.bfloat16),
                                preferred_element_type=jnp.float32)
    y = acc * s2_ref[...] + b2_ref[...]
    y = jnp.where(y >= 0, y, slope * y)

    # ---- residual add in f32, lane-dense store ------------------------------
    o_ref[0] = (x + y).astype(o_ref.dtype)


def resblock_forward(x_nchw, params):
    """Public wrapper: NCHW f32 in / NCHW f32 out (matches the PyTorch module)."""
    N, C, H, W = x_nchw.shape
    HW = H * W
    x = x_nchw.reshape(N, C, HW).astype(jnp.float32)        # free reshape, no transpose
    Ch = params['w1'].shape[1]

    w1t = jnp.transpose(params['w1'], (1, 0)).astype(jnp.bfloat16)         # (Ch, C)
    w2t = jnp.transpose(params['w2'], (0, 1, 3, 2)).astype(jnp.bfloat16)   # (3,3,C,Ch)
    s1 = params['s1'].reshape(Ch, 1).astype(jnp.float32)
    b1 = params['b1'].reshape(Ch, 1).astype(jnp.float32)
    s2 = params['s2'].reshape(C, 1).astype(jnp.float32)
    b2 = params['b2'].reshape(C, 1).astype(jnp.float32)

    kernel = functools.partial(_resblock_kernel, H=H, W=W, C=C, Ch=Ch,
                               slope=_SLOPE)
    out = pl.pallas_call(
        kernel,
        out_shape=jax.ShapeDtypeStruct((N, C, HW), jnp.float32),
        grid_spec=pltpu.PrefetchScalarGridSpec(
            num_scalar_prefetch=0,
            grid=(N,),
            in_specs=[
                pl.BlockSpec((1, C, HW), lambda n: (n, 0, 0)),
                pl.BlockSpec((Ch, C), lambda n: (0, 0)),
                pl.BlockSpec((Ch, 1), lambda n: (0, 0)),
                pl.BlockSpec((Ch, 1), lambda n: (0, 0)),
                pl.BlockSpec((3, 3, C, Ch), lambda n: (0, 0, 0, 0)),
                pl.BlockSpec((C, 1), lambda n: (0, 0)),
                pl.BlockSpec((C, 1), lambda n: (0, 0)),
            ],
            out_specs=pl.BlockSpec((1, C, HW), lambda n: (n, 0, 0)),
            scratch_shapes=[pltpu.VMEM((Ch, H + 2, W + 2), jnp.float32)],
        ),
        compiler_params=pltpu.CompilerParams(
            dimension_semantics=("parallel",)),
    )(x, w1t, s1, b1, w2t, s2, b2)

    return out.reshape(N, C, H, W)


# ---------------------------------------------------------------------------
# Deterministic parameter construction (eval-mode BN folded to scale/bias)
# ---------------------------------------------------------------------------

def make_params(key, channels, hidden_channels=None):
    ch = channels if hidden_channels is None else hidden_channels
    keys = iter(jax.random.split(key, 16))

    def conv_w(cin, cout, k):
        return 0.1 * jax.random.normal(next(keys), (k, k, cin, cout), jnp.float32)

    def bn_fold(c):
        gamma = 1.0 + 0.1 * jax.random.normal(next(keys), (c,), jnp.float32)
        beta = 0.1 * jax.random.normal(next(keys), (c,), jnp.float32)
        mean = 0.05 * jax.random.normal(next(keys), (c,), jnp.float32)
        var = 0.5 + 0.1 * jnp.abs(jax.random.normal(next(keys), (c,), jnp.float32))
        scale = gamma / jnp.sqrt(var + 1e-5)
        bias = beta - mean * scale
        return scale, bias

    p = {}
    p['w1'] = conv_w(channels, ch, 1)[0, 0]        # (C, Ch)   CBL(channels, hidden, 1)
    p['s1'], p['b1'] = bn_fold(ch)
    p['w2'] = conv_w(ch, channels, 3)              # (3,3,Ch,C) CBL(hidden, channels, 3)
    p['s2'], p['b2'] = bn_fold(channels)
    return p


# ---------------------------------------------------------------------------
# Pure-JAX reference (f32, independent of the Pallas kernel)
# ---------------------------------------------------------------------------

def resblock_reference(x_nchw, params):
    x = jnp.transpose(x_nchw, (0, 2, 3, 1)).astype(jnp.float32)

    def leaky(v):
        return jnp.where(v >= 0, v, _SLOPE * v)

    h = jnp.einsum('nhwc,cd->nhwd', x, params['w1'],
                   precision=lax.Precision.HIGHEST)
    h = leaky(h * params['s1'] + params['b1'])
    y = lax.conv_general_dilated(h, params['w2'], (1, 1), 'SAME',
                                 dimension_numbers=('NHWC', 'HWIO', 'NHWC'),
                                 precision=lax.Precision.HIGHEST)
    y = leaky(y * params['s2'] + params['b2'])
    out = x + y
    return jnp.transpose(out, (0, 3, 1, 2))


# ---------------------------------------------------------------------------

if __name__ == "__main__":
    key = jax.random.PRNGKey(0)
    kx, kp = jax.random.split(key)

    channels, hidden_channels = 4, 8
    N, H, W = 2, 16, 16

    x = jax.random.normal(kx, (N, channels, H, W), jnp.float32)
    params = make_params(kp, channels, hidden_channels)

    out = resblock_forward(x, params)
    out = jax.block_until_ready(out)
    assert out.shape == (N, channels, H, W)

    ref = resblock_reference(x, params)
    # Tolerance accounts for bf16 matmul operands (f32 accumulation) in the kernel.
    np.testing.assert_allclose(np.asarray(out), np.asarray(ref),
                               rtol=2e-2, atol=2e-2)
    print("KERNEL_OK")
</pallas_src>

<mosaic_0001>
module attributes {stable_mosaic.version = 11 : i64} {
  func.func @_resblock_kernel(%arg0: i32, %arg1: memref<1x4x256xf32, #tpu.memory_space<vmem>>, %arg2: memref<8x4xbf16, #tpu.memory_space<vmem>>, %arg3: memref<8x1xf32, #tpu.memory_space<vmem>>, %arg4: memref<8x1xf32, #tpu.memory_space<vmem>>, %arg5: memref<3x3x4x8xbf16, #tpu.memory_space<vmem>>, %arg6: memref<4x1xf32, #tpu.memory_space<vmem>>, %arg7: memref<4x1xf32, #tpu.memory_space<vmem>>, %arg8: memref<1x4x256xf32, #tpu.memory_space<vmem>>, %arg9: memref<8x18x18xf32, #tpu.memory_space<vmem>>) attributes {dimension_semantics = [#tpu.dimension_semantics<parallel>], iteration_bounds = array<i64: 2>, scalar_prefetch = 0 : i64, scratch_operands = 1 : i64, tpu.core_type = #tpu.core_type<tc>, window_params = [{transform_indices = @transform_0, window_bounds = array<i64: 1, 4, 256>}, {pipeline_mode = #tpu.pipeline_mode<synchronous>, transform_indices = @transform_1, window_bounds = array<i64: 8, 4>}, {pipeline_mode = #tpu.pipeline_mode<synchronous>, transform_indices = @transform_2, window_bounds = array<i64: 8, 1>}, {pipeline_mode = #tpu.pipeline_mode<synchronous>, transform_indices = @transform_3, window_bounds = array<i64: 8, 1>}, {pipeline_mode = #tpu.pipeline_mode<synchronous>, transform_indices = @transform_4, window_bounds = array<i64: 3, 3, 4, 8>}, {pipeline_mode = #tpu.pipeline_mode<synchronous>, transform_indices = @transform_5, window_bounds = array<i64: 4, 1>}, {pipeline_mode = #tpu.pipeline_mode<synchronous>, transform_indices = @transform_6, window_bounds = array<i64: 4, 1>}, {transform_indices = @transform_7, window_bounds = array<i64: 1, 4, 256>}]} {
    %c0 = arith.constant 0 : index
    %c0_0 = arith.constant 0 : index
    %c0_1 = arith.constant 0 : index
    %0 = vector.load %arg1[%c0, %c0_0, %c0_1] : memref<1x4x256xf32, #tpu.memory_space<vmem>>, vector<1x4x256xf32>
    %1 = vector.shape_cast %0 : vector<1x4x256xf32> to vector<4x256xf32>
    %c0_2 = arith.constant 0 : index
    %c0_3 = arith.constant 0 : index
    %2 = vector.load %arg2[%c0_2, %c0_3] : memref<8x4xbf16, #tpu.memory_space<vmem>>, vector<8x4xbf16>
    %3 = arith.truncf %1 : vector<4x256xf32> to vector<4x256xbf16>
    %cst = arith.constant dense<0.000000e+00> : vector<8x256xf32>
    %4 = tpu.matmul %2, %3, %cst {dimension_numbers = #tpu.dot_dimension_numbers<[1], [0], [0], [1], [0, 0, 1, 1], [], []>} : vector<8x4xbf16>, vector<4x256xbf16>, vector<8x256xf32> -> vector<8x256xf32>
    %c0_4 = arith.constant 0 : index
    %c0_5 = arith.constant 0 : index
    %5 = vector.load %arg3[%c0_4, %c0_5] : memref<8x1xf32, #tpu.memory_space<vmem>>, vector<8x1xf32>
    %6 = vector.broadcast %5 : vector<8x1xf32> to vector<8x256xf32>
    %7 = arith.mulf %4, %6 : vector<8x256xf32>
    %c0_6 = arith.constant 0 : index
    %c0_7 = arith.constant 0 : index
    %8 = vector.load %arg4[%c0_6, %c0_7] : memref<8x1xf32, #tpu.memory_space<vmem>>, vector<8x1xf32>
    %9 = vector.broadcast %8 : vector<8x1xf32> to vector<8x256xf32>
    %10 = arith.addf %7, %9 : vector<8x256xf32>
    %cst_8 = arith.constant 0.000000e+00 : f32
    %11 = vector.broadcast %cst_8 : f32 to vector<8x256xf32>
    %12 = arith.cmpf oge, %10, %11 : vector<8x256xf32>
    %cst_9 = arith.constant 0.00999999977 : f32
    %13 = vector.broadcast %cst_9 : f32 to vector<8x256xf32>
    %14 = arith.mulf %13, %10 : vector<8x256xf32>
    %15 = arith.select %12, %10, %14 : vector<8x256xi1>, vector<8x256xf32>
    %cst_10 = arith.constant 0.000000e+00 : f32
    %16 = vector.broadcast %cst_10 : f32 to vector<8x18x18xf32>
    %c0_11 = arith.constant 0 : index
    %c0_12 = arith.constant 0 : index
    %c0_13 = arith.constant 0 : index
    %17 = vector.load %arg9[%c0_11, %c0_12, %c0_13] : memref<8x18x18xf32, #tpu.memory_space<vmem>>, vector<8x18x18xf32>
    tpu.vector_store %arg9[%c0_11, %c0_12, %c0_13], %16 {strides = array<i32>} : memref<8x18x18xf32, #tpu.memory_space<vmem>>, vector<8x18x18xf32>,
    %18 = vector.shape_cast %15 : vector<8x256xf32> to vector<8x16x16xf32>
    %c0_14 = arith.constant 0 : index
    %c1 = arith.constant 1 : index
    %c1_15 = arith.constant 1 : index
    %19 = vector.load %arg9[%c0_14, %c1, %c1_15] : memref<8x18x18xf32, #tpu.memory_space<vmem>>, vector<8x16x16xf32>
    tpu.vector_store %arg9[%c0_14, %c1, %c1_15], %18 {strides = array<i32>} : memref<8x18x18xf32, #tpu.memory_space<vmem>>, vector<8x16x16xf32>,
    %c0_16 = arith.constant 0 : index
    %c0_17 = arith.constant 0 : index
    %c0_18 = arith.constant 0 : index
    %c0_19 = arith.constant 0 : index
    %20 = vector.load %arg5[%c0_16, %c0_17, %c0_18, %c0_19] : memref<3x3x4x8xbf16, #tpu.memory_space<vmem>>, vector<3x3x4x8xbf16>
    %cst_20 = arith.constant 0.000000e+00 : f32
    %21 = vector.broadcast %cst_20 : f32 to vector<4x256xf32>
    %c0_21 = arith.constant 0 : index
    %c0_22 = arith.constant 0 : index
    %c0_23 = arith.constant 0 : index
    %22 = vector.load %arg9[%c0_21, %c0_22, %c0_23] : memref<8x18x18xf32, #tpu.memory_space<vmem>>, vector<8x16x16xf32>
    %23 = vector.shape_cast %22 : vector<8x16x16xf32> to vector<8x256xf32>
    %24 = vector.extract_strided_slice %20 {offsets = [0, 0, 0, 0], sizes = [1, 1, 4, 8], strides = [1, 1, 1, 1]} : vector<3x3x4x8xbf16> to vector<1x1x4x8xbf16>
    %25 = vector.shape_cast %24 : vector<1x1x4x8xbf16> to vector<4x8xbf16>
    %26 = arith.truncf %23 : vector<8x256xf32> to vector<8x256xbf16>
    %cst_24 = arith.constant dense<0.000000e+00> : vector<4x256xf32>
    %27 = tpu.matmul %25, %26, %cst_24 {dimension_numbers = #tpu.dot_dimension_numbers<[1], [0], [0], [1], [0, 0, 1, 1], [], []>} : vector<4x8xbf16>, vector<8x256xbf16>, vector<4x256xf32> -> vector<4x256xf32>
    %28 = arith.addf %21, %27 : vector<4x256xf32>
    %c0_25 = arith.constant 0 : index
    %c0_26 = arith.constant 0 : index
    %c1_27 = arith.constant 1 : index
    %29 = vector.load %arg9[%c0_25, %c0_26, %c1_27] : memref<8x18x18xf32, #tpu.memory_space<vmem>>, vector<8x16x16xf32>
    %30 = vector.shape_cast %29 : vector<8x16x16xf32> to vector<8x256xf32>
    %31 = vector.extract_strided_slice %20 {offsets = [0, 1, 0, 0], sizes = [1, 1, 4, 8], strides = [1, 1, 1, 1]} : vector<3x3x4x8xbf16> to vector<1x1x4x8xbf16>
    %32 = vector.shape_cast %31 : vector<1x1x4x8xbf16> to vector<4x8xbf16>
    %33 = arith.truncf %30 : vector<8x256xf32> to vector<8x256xbf16>
    %cst_28 = arith.constant dense<0.000000e+00> : vector<4x256xf32>
    %34 = tpu.matmul %32, %33, %cst_28 {dimension_numbers = #tpu.dot_dimension_numbers<[1], [0], [0], [1], [0, 0, 1, 1], [], []>} : vector<4x8xbf16>, vector<8x256xbf16>, vector<4x256xf32> -> vector<4x256xf32>
    %35 = arith.addf %28, %34 : vector<4x256xf32>
    %c0_29 = arith.constant 0 : index
    %c0_30 = arith.constant 0 : index
    %c2 = arith.constant 2 : index
    %36 = vector.load %arg9[%c0_29, %c0_30, %c2] : memref<8x18x18xf32, #tpu.memory_space<vmem>>, vector<8x16x16xf32>
    %37 = vector.shape_cast %36 : vector<8x16x16xf32> to vector<8x256xf32>
    %38 = vector.extract_strided_slice %20 {offsets = [0, 2, 0, 0], sizes = [1, 1, 4, 8], strides = [1, 1, 1, 1]} : vector<3x3x4x8xbf16> to vector<1x1x4x8xbf16>
    %39 = vector.shape_cast %38 : vector<1x1x4x8xbf16> to vector<4x8xbf16>
    %40 = arith.truncf %37 : vector<8x256xf32> to vector<8x256xbf16>
    %cst_31 = arith.constant dense<0.000000e+00> : vector<4x256xf32>
    %41 = tpu.matmul %39, %40, %cst_31 {dimension_numbers = #tpu.dot_dimension_numbers<[1], [0], [0], [1], [0, 0, 1, 1], [], []>} : vector<4x8xbf16>, vector<8x256xbf16>, vector<4x256xf32> -> vector<4x256xf32>
    %42 = arith.addf %35, %41 : vector<4x256xf32>
    %c0_32 = arith.constant 0 : index
    %c1_33 = arith.constant 1 : index
    %c0_34 = arith.constant 0 : index
    %43 = vector.load %arg9[%c0_32, %c1_33, %c0_34] : memref<8x18x18xf32, #tpu.memory_space<vmem>>, vector<8x16x16xf32>
    %44 = vector.shape_cast %43 : vector<8x16x16xf32> to vector<8x256xf32>
    %45 = vector.extract_strided_slice %20 {offsets = [1, 0, 0, 0], sizes = [1, 1, 4, 8], strides = [1, 1, 1, 1]} : vector<3x3x4x8xbf16> to vector<1x1x4x8xbf16>
    %46 = vector.shape_cast %45 : vector<1x1x4x8xbf16> to vector<4x8xbf16>
    %47 = arith.truncf %44 : vector<8x256xf32> to vector<8x256xbf16>
    %cst_35 = arith.constant dense<0.000000e+00> : vector<4x256xf32>
    %48 = tpu.matmul %46, %47, %cst_35 {dimension_numbers = #tpu.dot_dimension_numbers<[1], [0], [0], [1], [0, 0, 1, 1], [], []>} : vector<4x8xbf16>, vector<8x256xbf16>, vector<4x256xf32> -> vector<4x256xf32>
    %49 = arith.addf %42, %48 : vector<4x256xf32>
    %c0_36 = arith.constant 0 : index
    %c1_37 = arith.constant 1 : index
    %c1_38 = arith.constant 1 : index
    %50 = vector.load %arg9[%c0_36, %c1_37, %c1_38] : memref<8x18x18xf32, #tpu.memory_space<vmem>>, vector<8x16x16xf32>
    %51 = vector.shape_cast %50 : vector<8x16x16xf32> to vector<8x256xf32>
    %52 = vector.extract_strided_slice %20 {offsets = [1, 1, 0, 0], sizes = [1, 1, 4, 8], strides = [1, 1, 1, 1]} : vector<3x3x4x8xbf16> to vector<1x1x4x8xbf16>
    %53 = vector.shape_cast %52 : vector<1x1x4x8xbf16> to vector<4x8xbf16>
    %54 = arith.truncf %51 : vector<8x256xf32> to vector<8x256xbf16>
    %cst_39 = arith.constant dense<0.000000e+00> : vector<4x256xf32>
    %55 = tpu.matmul %53, %54, %cst_39 {dimension_numbers = #tpu.dot_dimension_numbers<[1], [0], [0], [1], [0, 0, 1, 1], [], []>} : vector<4x8xbf16>, vector<8x256xbf16>, vector<4x256xf32> -> vector<4x256xf32>
    %56 = arith.addf %49, %55 : vector<4x256xf32>
    %c0_40 = arith.constant 0 : index
    %c1_41 = arith.constant 1 : index
    %c2_42 = arith.constant 2 : index
    %57 = vector.load %arg9[%c0_40, %c1_41, %c2_42] : memref<8x18x18xf32, #tpu.memory_space<vmem>>, vector<8x16x16xf32>
    %58 = vector.shape_cast %57 : vector<8x16x16xf32> to vector<8x256xf32>
    %59 = vector.extract_strided_slice %20 {offsets = [1, 2, 0, 0], sizes = [1, 1, 4, 8], strides = [1, 1, 1, 1]} : vector<3x3x4x8xbf16> to vector<1x1x4x8xbf16>
    %60 = vector.shape_cast %59 : vector<1x1x4x8xbf16> to vector<4x8xbf16>
    %61 = arith.truncf %58 : vector<8x256xf32> to vector<8x256xbf16>
    %cst_43 = arith.constant dense<0.000000e+00> : vector<4x256xf32>
    %62 = tpu.matmul %60, %61, %cst_43 {dimension_numbers = #tpu.dot_dimension_numbers<[1], [0], [0], [1], [0, 0, 1, 1], [], []>} : vector<4x8xbf16>, vector<8x256xbf16>, vector<4x256xf32> -> vector<4x256xf32>
    %63 = arith.addf %56, %62 : vector<4x256xf32>
    %c0_44 = arith.constant 0 : index
    %c2_45 = arith.constant 2 : index
    %c0_46 = arith.constant 0 : index
    %64 = vector.load %arg9[%c0_44, %c2_45, %c0_46] : memref<8x18x18xf32, #tpu.memory_space<vmem>>, vector<8x16x16xf32>
    %65 = vector.shape_cast %64 : vector<8x16x16xf32> to vector<8x256xf32>
    %66 = vector.extract_strided_slice %20 {offsets = [2, 0, 0, 0], sizes = [1, 1, 4, 8], strides = [1, 1, 1, 1]} : vector<3x3x4x8xbf16> to vector<1x1x4x8xbf16>
    %67 = vector.shape_cast %66 : vector<1x1x4x8xbf16> to vector<4x8xbf16>
    %68 = arith.truncf %65 : vector<8x256xf32> to vector<8x256xbf16>
    %cst_47 = arith.constant dense<0.000000e+00> : vector<4x256xf32>
    %69 = tpu.matmul %67, %68, %cst_47 {dimension_numbers = #tpu.dot_dimension_numbers<[1], [0], [0], [1], [0, 0, 1, 1], [], []>} : vector<4x8xbf16>, vector<8x256xbf16>, vector<4x256xf32> -> vector<4x256xf32>
    %70 = arith.addf %63, %69 : vector<4x256xf32>
    %c0_48 = arith.constant 0 : index
    %c2_49 = arith.constant 2 : index
    %c1_50 = arith.constant 1 : index
    %71 = vector.load %arg9[%c0_48, %c2_49, %c1_50] : memref<8x18x18xf32, #tpu.memory_space<vmem>>, vector<8x16x16xf32>
    %72 = vector.shape_cast %71 : vector<8x16x16xf32> to vector<8x256xf32>
    %73 = vector.extract_strided_slice %20 {offsets = [2, 1, 0, 0], sizes = [1, 1, 4, 8], strides = [1, 1, 1, 1]} : vector<3x3x4x8xbf16> to vector<1x1x4x8xbf16>
    %74 = vector.shape_cast %73 : vector<1x1x4x8xbf16> to vector<4x8xbf16>
    %75 = arith.truncf %72 : vector<8x256xf32> to vector<8x256xbf16>
    %cst_51 = arith.constant dense<0.000000e+00> : vector<4x256xf32>
    %76 = tpu.matmul %74, %75, %cst_51 {dimension_numbers = #tpu.dot_dimension_numbers<[1], [0], [0], [1], [0, 0, 1, 1], [], []>} : vector<4x8xbf16>, vector<8x256xbf16>, vector<4x256xf32> -> vector<4x256xf32>
    %77 = arith.addf %70, %76 : vector<4x256xf32>
    %c0_52 = arith.constant 0 : index
    %c2_53 = arith.constant 2 : index
    %c2_54 = arith.constant 2 : index
    %78 = vector.load %arg9[%c0_52, %c2_53, %c2_54] : memref<8x18x18xf32, #tpu.memory_space<vmem>>, vector<8x16x16xf32>
    %79 = vector.shape_cast %78 : vector<8x16x16xf32> to vector<8x256xf32>
    %80 = vector.extract_strided_slice %20 {offsets = [2, 2, 0, 0], sizes = [1, 1, 4, 8], strides = [1, 1, 1, 1]} : vector<3x3x4x8xbf16> to vector<1x1x4x8xbf16>
    %81 = vector.shape_cast %80 : vector<1x1x4x8xbf16> to vector<4x8xbf16>
    %82 = arith.truncf %79 : vector<8x256xf32> to vector<8x256xbf16>
    %cst_55 = arith.constant dense<0.000000e+00> : vector<4x256xf32>
    %83 = tpu.matmul %81, %82, %cst_55 {dimension_numbers = #tpu.dot_dimension_numbers<[1], [0], [0], [1], [0, 0, 1, 1], [], []>} : vector<4x8xbf16>, vector<8x256xbf16>, vector<4x256xf32> -> vector<4x256xf32>
    %84 = arith.addf %77, %83 : vector<4x256xf32>
    %c0_56 = arith.constant 0 : index
    %c0_57 = arith.constant 0 : index
    %85 = vector.load %arg6[%c0_56, %c0_57] : memref<4x1xf32, #tpu.memory_space<vmem>>, vector<4x1xf32>
    %86 = vector.broadcast %85 : vector<4x1xf32> to vector<4x256xf32>
    %87 = arith.mulf %84, %86 : vector<4x256xf32>
    %c0_58 = arith.constant 0 : index
    %c0_59 = arith.constant 0 : index
    %88 = vector.load %arg7[%c0_58, %c0_59] : memref<4x1xf32, #tpu.memory_space<vmem>>, vector<4x1xf32>
    %89 = vector.broadcast %88 : vector<4x1xf32> to vector<4x256xf32>
    %90 = arith.addf %87, %89 : vector<4x256xf32>
    %cst_60 = arith.constant 0.000000e+00 : f32
    %91 = vector.broadcast %cst_60 : f32 to vector<4x256xf32>
    %92 = arith.cmpf oge, %90, %91 : vector<4x256xf32>
    %cst_61 = arith.constant 0.00999999977 : f32
    %93 = vector.broadcast %cst_61 : f32 to vector<4x256xf32>
    %94 = arith.mulf %93, %90 : vector<4x256xf32>
    %95 = arith.select %92, %90, %94 : vector<4x256xi1>, vector<4x256xf32>
    %96 = arith.addf %1, %95 : vector<4x256xf32>
    %c0_62 = arith.constant 0 : index
    %c0_63 = arith.constant 0 : index
    %c0_64 = arith.constant 0 : index
    %97 = vector.load %arg8[%c0_62, %c0_63, %c0_64] : memref<1x4x256xf32, #tpu.memory_space<vmem>>, vector<1x4x256xf32>
    %98 = vector.shape_cast %97 : vector<1x4x256xf32> to vector<4x256xf32>
    %99 = vector.shape_cast %96 : vector<4x256xf32> to vector<1x4x256xf32>
    tpu.vector_store %arg8[%c0_62, %c0_63, %c0_64], %99 {strides = array<i32>} : memref<1x4x256xf32, #tpu.memory_space<vmem>>, vector<1x4x256xf32>,
    return
  }
  func.func @transform_0(%arg0: i32) -> (i32, i32, i32) {
    %c0_i32 = arith.constant 0 : i32
    %c0_i32_0 = arith.constant 0 : i32
    %c0_i32_1 = arith.constant 0 : i32
    return %arg0, %c0_i32, %c0_i32_0 : i32, i32, i32
  }
  func.func @transform_1(%arg0: i32) -> (i32, i32) {
    %c0_i32 = arith.constant 0 : i32
    %c0_i32_0 = arith.constant 0 : i32
    %c0_i32_1 = arith.constant 0 : i32
    return %c0_i32, %c0_i32_0 : i32, i32
  }
  func.func @transform_2(%arg0: i32) -> (i32, i32) {
    %c0_i32 = arith.constant 0 : i32
    %c0_i32_0 = arith.constant 0 : i32
    %c0_i32_1 = arith.constant 0 : i32
    return %c0_i32, %c0_i32_0 : i32, i32
  }
  func.func @transform_3(%arg0: i32) -> (i32, i32) {
    %c0_i32 = arith.constant 0 : i32
    %c0_i32_0 = arith.constant 0 : i32
    %c0_i32_1 = arith.constant 0 : i32
    return %c0_i32, %c0_i32_0 : i32, i32
  }
  func.func @transform_4(%arg0: i32) -> (i32, i32, i32, i32) {
    %c0_i32 = arith.constant 0 : i32
    %c0_i32_0 = arith.constant 0 : i32
    %c0_i32_1 = arith.constant 0 : i32
    %c0_i32_2 = arith.constant 0 : i32
    %c0_i32_3 = arith.constant 0 : i32
    return %c0_i32, %c0_i32_0, %c0_i32_1, %c0_i32_2 : i32, i32, i32, i32
  }
  func.func @transform_5(%arg0: i32) -> (i32, i32) {
    %c0_i32 = arith.constant 0 : i32
    %c0_i32_0 = arith.constant 0 : i32
    %c0_i32_1 = arith.constant 0 : i32
    return %c0_i32, %c0_i32_0 : i32, i32
  }
  func.func @transform_6(%arg0: i32) -> (i32, i32) {
    %c0_i32 = arith.constant 0 : i32
    %c0_i32_0 = arith.constant 0 : i32
    %c0_i32_1 = arith.constant 0 : i32
    return %c0_i32, %c0_i32_0 : i32, i32
  }
  func.func @transform_7(%arg0: i32) -> (i32, i32, i32) {
    %c0_i32 = arith.constant 0 : i32
    %c0_i32_0 = arith.constant 0 : i32
    %c0_i32_1 = arith.constant 0 : i32
    return %arg0, %c0_i32, %c0_i32_0 : i32, i32, i32
  }
}

</mosaic_0001>

<bundles_post_ra>
// kernel: tpu_custom_call.1
= control target key start
LH: loop header
LB: loop body
LE: loop exit
PB: predicated region body
PF: predicated region fallthrough
CT: control target
= control target key end

     0   :  { %12 = vsyncpa [#allocation4], 0  ;;  %s8117_s0 = inlined_call_operand.vmem [shape: f32[2,4,256], index: 0, kind: input, shape index: {}]   ;;  %s8118_s1 = inlined_call_operand.vmem [shape: bf16[8,4], index: 1, kind: input, shape index: {}]   ;;  %s8119_s2 = inlined_call_operand.vmem [shape: f32[8,1], index: 2, kind: input, shape index: {}]   ;;  %s8120_s3 = inlined_call_operand.vmem [shape: f32[8,1], index: 3, kind: input, shape index: {}]   ;;  %s8121_s4 = inlined_call_operand.vmem [shape: bf16[3,3,4,8], index: 4, kind: input, shape index: {}]   ;;  %s8122_s5 = inlined_call_operand.vmem [shape: f32[4,1], index: 5, kind: input, shape index: {}]   ;;  %s8123_s6 = inlined_call_operand.vmem [shape: f32[4,1], index: 6, kind: input, shape index: {}]   ;;  %s8124_s7 = inlined_call_operand.hbm [shape: f32[2,4,256], index: 7, kind: output, shape index: {}]  }
   0x1   :  { %14 = vsyncpa [#allocation4 + $0x1], 0  ;;  %s5533_s24 = smov 0   ;;  %s5535_s25 = smov 0  }
   0x2   :  { %s5537_s26 = smov 0   ;;  %s5539_s27 = smov 0  }
   0x3 LB: > { %s5554_s28 = sadd.s32 4294967295, %s5476_s27   ;;  %s4974_s29 = sadd.s32 4294967294, %s5476_s27   ;;  %s5476_s27 = sphi %s5539_s27, %s8614_s27   ;;  %s5472_s26 = sphi %s5537_s26, %s8613_s26   ;;  %s5468_s25 = sphi %s5535_s25, %s8612_s25   ;;  %s5464_s24 = sphi %s5533_s24, %s8611_s24  }
   0x4   : > { %s5558_s30 = sadd.s32 1, %s5476_s27   ;;  %s179_s8 = sadd.s32 1, %s5472_s26 }
   0x5   : > { %s176_s9 = ssub.s32 %s5476_s27, %s5558_s30  ;;  %p189_p0 = scmp.ne.s32.totalorder %s5472_s26, %s5468_s25 }
   0x6   : > { %p177_p1 = scmp.eq.s32.totalorder %s176_s9, 0  ;;  %p190_p2 = scmp.eq.s32.totalorder %s5554_s28, 1 }
   0x7   : > { %p195_p3 = scmp.ne.s32.totalorder %s5468_s25, %s5464_s24  ;;  %p196_p4 = scmp.eq.s32.totalorder %s4974_s29, 1 }
   0x8   : > { %s5569_s10 = scalar_select %p177_p1, %s5472_s26, %s179_s8  }
   0x9   : > { %p5571_p5 = por %p190_p2, %p189_p0  ;;  %p5575_p6 = por %p196_p4, %p195_p3 }
   0xa   : > { %p4977_p7 = scmp.ge.s32.totalorder %s5476_s27, 1  ;;  %p240_p8 = scmp.lt.s32.totalorder %s5476_s27, 3 }
   0xc   : > { %p241_p9 = pnand %p4977_p7, %p240_p8 }
   0xe   : > { %244 = sbr.rel (%p241_p9) target bundleno = 1182 (0x49e), region = 48 }
  0x13   : > { %p272_p10 = scmp.lt.s32.totalorder %s5554_s28, 1  ;;  %v8125_v0 = vmov 0   ;;  %v337_v1 = vld [vmem:[%s8119_s2] sm:$0xff]  ;;  %vm289_vm0 = vcmask 1041408   ;;  %vm285_vm1 = vcmask 31744   ;;  %s5479_s29 = smov 80   ;;  %v434_v28 = vlaneseq }
  0x14   : > { %328 = vmatprep.mubr.bf16.mxu0 %v8125_v0  ;;  %5061 = vset.pattern.permute.xlu0 %v8125_v0  ;;  %v345_v2 = vld [vmem:[%s8120_s3] sm:$0xff]  ;;  %s5480_s8 = smov 112   ;;  %s5481_s9 = smov 48   ;;  %vm359_vm4 = vcmask 146432   ;;  %v5486_v23 = vmov 0.0   ;;  %vm362_vm5 = vcmask 140288  }
  0x15   : > { %s273_s15 = scalar_select %p272_p10, %s5554_s28, 1  ;;  %340 = vperm.xlu0 %5061, %v337_v1   ;;  %1609 = vmatprep.mubr.bf16.mxu1 %v8125_v0  ;;  %v279_v8 = vld [vmem:[%s8118_s1] sm:$0xf]  ;;  %360 = vst.msk [vmem:[#allocation2] sm:$0xff] %vm359_vm4, %v5486_v23  ;;  %361 = vst.msk [vmem:[#allocation2 + $0x8] sm:$0xff] %vm359_vm4, %v5486_v23  ;;  %v435_v32 = vshrl.u32 %v434_v28, 7 }
  0x16   : > { %5377 = vset.pattern.permute.xlu1 %v8125_v0  ;;  %s5482_s13 = smov 96   ;;  %s5483_s14 = smov 16   ;;  %364 = vst.msk [vmem:[#allocation2 + $0x18] sm:$0xff] %vm359_vm4, %v5486_v23  ;;  %365 = vst.msk [vmem:[#allocation2 + $0x20] sm:$0xff] %vm359_vm4, %v5486_v23  ;;  %v5487_v26 = vmov 1983009808  }
  0x17   : > { %s5006_s18 = sshll.u32 %s273_s15, 3  ;;  %s5484_s15 = smov 64   ;;  %367 = vst.msk [vmem:[#allocation2 + $0x30] sm:$0xff] %vm359_vm4, %v5486_v23  ;;  %368 = vst.msk [vmem:[#allocation2 + $0x38] sm:$0xff] %vm359_vm4, %v5486_v23  ;;  %v432_v27 = vunpack.c.l.s4 %v5487_v26  ;;  %v5488_v36 = vmov 1934713408  }
  0x18   : > { %s5596_s21 = scalar_lea.vmem %s8117_s0, %s5006_s18  ;;  %s5485_s16 = smov 32   ;;  %370 = vst.msk [vmem:[#allocation2 + $0x48] sm:$0xff] %vm359_vm4, %v5486_v23  ;;  %371 = vst.msk [vmem:[#allocation2 + $0x50] sm:$0xff] %vm359_vm4, %v5486_v23  ;;  %v496_v37 = vunpack.c.l.s4 %v5488_v36  ;;  %vm765_vm6 = vcmask 138248   ;;  %vm1135_vm7 = vcmask 130048   ;;  %vm1137_vm8 = vcmask 261120  }
  0x19   : > { %v278_v3 = vld [vmem:[%s5596_s21] sm:$0xff]  ;;  %348 = vperm.xlu0 %5061, %v345_v2   ;;  %373 = vst.msk [vmem:[#allocation2 + $0x60] sm:$0xff] %vm359_vm4, %v5486_v23  ;;  %374 = vst.msk [vmem:[#allocation2 + $0x68] sm:$0xff] %vm359_vm4, %v5486_v23  ;;  %v433_v31 = vunpack.c.0.s8 %v432_v27  ;;  %s5489_s17 = smov 1   ;;  %s5490_s18 = smov 126   ;;  %vm1139_vm9 = vcmask 392192  }
  0x1a   : > { %v281_v4 = vcombine.high %v278_v3, %v278_v3  ;;  %v283_v5 = vpack.c.bf16 %v278_v3, %v278_v3  ;;  %376 = vst.msk [vmem:[#allocation2 + $0x78] sm:$0xff] %vm359_vm4, %v5486_v23  ;;  %377 = vst.msk [vmem:[#allocation2 + $0x80] sm:$0xff] %vm359_vm4, %v5486_v23  ;;  %v497_v44 = vunpack.c.0.s8 %v496_v37  ;;  %s5491_s19 = smov 127   ;;  %vm1141_vm10 = vcmask 523264  }
  0x1b   : > { %379 = vst.msk [vmem:[#allocation2 + $0x90] sm:$0xff] %vm359_vm4, %v5486_v23  ;;  %380 = vst.msk [vmem:[#allocation2 + $0x98] sm:$0xff] %vm359_vm4, %v5486_v23  ;;  %v5672_v38 = vsub.s32 %v433_v31, %v435_v32  ;;  %vm1143_vm11 = vcmask 654336   ;;  %vm1145_vm12 = vcmask 785408   ;;  %vm1147_vm13 = vcmask 916480  }
  0x1c   : > { %v284_v6 = vpack.c.bf16 %v281_v4, %v281_v4  ;;  %v291_v7 = vsel %vm289_vm0, %v283_v5, 0  ;;  %382 = vst.msk [vmem:[#allocation2 + $0xa8] sm:$0xff] %vm359_vm4, %v5486_v23  ;;  %383 = vst.msk [vmem:[#allocation2 + $0xb0] sm:$0xff] %vm359_vm4, %v5486_v23  ;;  %v5684_v51 = vsub.s32 %v497_v44, %v435_v32  ;;  %vm1570_vm14 = vcmask 1043456  }
  0x1d   : > { %363 = vst.msk [vmem:[#allocation2 + $0x10] sm:$0x3] %vm362_vm5, %v5486_v23  ;;  %366 = vst.msk [vmem:[#allocation2 + $0x28] sm:$0x3] %vm362_vm5, %v5486_v23  ;;  %vm1566_vm15 = vcmask 64512  }
  0x1e   : > { %4981 = vmatprep.subr.msk.bf16.mxu0 %vm289_vm0, %v284_v6  ;;  %369 = vst.msk [vmem:[#allocation2 + $0x40] sm:$0x3] %vm362_vm5, %v5486_v23  ;;  %372 = vst.msk [vmem:[#allocation2 + $0x58] sm:$0x3] %vm362_vm5, %v5486_v23 }
  0x1f   : > { %311 = vmatpush1.bf16.msra.mxu0 %v291_v7  ;;  %375 = vst.msk [vmem:[#allocation2 + $0x70] sm:$0x3] %vm362_vm5, %v5486_v23  ;;  %378 = vst.msk [vmem:[#allocation2 + $0x88] sm:$0x3] %vm362_vm5, %v5486_v23 }
  0x20   : > { %381 = vst.msk [vmem:[#allocation2 + $0xa0] sm:$0x3] %vm362_vm5, %v5486_v23  ;;  %384 = vst.msk [vmem:[#allocation2 + $0xb8] sm:$0x3] %vm362_vm5, %v5486_v23 }
  0x22   : > { %4982 = vmatmul.mubr.msk.bf16.vlgmr.msra.gmra.mxu0 %vm285_vm1, %v279_v8 }
  0x23   : > { %1659 = vmatprep.mubr.bf16.mxu0 %v8125_v0 }
  0x90   : > { %v341_v9 = vpop.permute.xlu0 %340 }
  0x94   : > { %v349_v12 = vpop.permute.xlu0 %348 }
  0xe2   : > { %v330_v10 = vpop.f32.mrf.mxu0 }
  0xe3   : > { %v343_v11 = vmul.f32 %v341_v9, %v330_v10 }
  0xe4   : > { %v332_v13 = vpop.f32.mrf.mxu0 }
  0xe5   : > { %v351_v14 = vadd.f32 %v349_v12, %v343_v11  ;;  %v344_v19 = vmul.f32 %v341_v9, %v332_v13 }
  0xe6   : > { %v334_v15 = vpop.f32.mrf.mxu0 }
  0xe7   : > { %vm353_vm2 = vcmp.ge.f32.partialorder %v351_v14, 0.0  ;;  %v355_v16 = vmul.f32 0.01, %v351_v14  ;;  %v352_v20 = vadd.f32 %v349_v12, %v344_v19 }
  0xe8   : > { %v335_v17 = vpop.f32.mrf.mxu0 }
  0xe9   : > { %v5603_v18 = vsel %vm353_vm2, %v351_v14, %v355_v16  ;;  %v356_v21 = vmul.f32 0.01, %v352_v20  ;;  %vm354_vm3 = vcmp.ge.f32.partialorder %v352_v20, 0.0 }
  0xea   : > { %392 = vrot.lane.b32.xlu0 %v5603_v18, %s5479_s29  ;;  %386 = vrot.lane.b32.xlu1 %v5603_v18, %s5480_s8 }
  0xeb   : > { %v5617_v22 = vsel %vm354_vm3, %v352_v20, %v356_v21 }
  0xee   : > { %398 = vrot.lane.b32.xlu0 %v5603_v18, %s5481_s9  ;;  %389 = vrot.lane.b32.xlu1 %v5603_v18, %s5482_s13 }
  0xf2   : > { %404 = vrot.lane.b32.xlu0 %v5603_v18, %s5483_s14  ;;  %395 = vrot.lane.b32.xlu1 %v5603_v18, %s5484_s15 }
  0xf6   : > { %401 = vrot.lane.b32.xlu1 %v5603_v18, %s5485_s16  ;;  %411 = vrot.lane.b32.xlu0 %v5617_v22, %s5482_s13 }
  0xfa   : > { %417 = vrot.lane.b32.xlu0 %v5617_v22, %s5484_s15  ;;  %408 = vrot.lane.b32.xlu1 %v5617_v22, %s5480_s8 }
  0xfe   : > { %423 = vrot.lane.b32.xlu0 %v5617_v22, %s5485_s16  ;;  %414 = vrot.lane.b32.xlu1 %v5617_v22, %s5479_s29 }
 0x102   : > { %420 = vrot.lane.b32.xlu1 %v5617_v22, %s5481_s9 }
 0x106   : > { %426 = vrot.lane.b32.xlu1 %v5617_v22, %s5483_s14 }
 0x15c   : > { %v5667_v24 = vpop.permute.xlu0 %392  ;;  %v5669_v25 = vpop.permute.xlu1 %386 }
 0x15d   : > { %v445_v39 = vcombine.low %v5669_v25, %v5667_v24  ;;  %v446_v4 = vcombine.high %v5669_v25, %v5667_v24 }
 0x15f   : > { %v453_v46 = vrot.slane %v445_v39, %v5672_v38  ;;  %v460_v16 = vrot.slane %v446_v4, %v5672_v38 }
 0x160   : > { %v399_v29 = vpop.permute.xlu0 %398  ;;  %v390_v30 = vpop.permute.xlu1 %389 }
 0x161   : > { %v429_v33 = vcombine.low %v5603_v18, %v390_v30  ;;  %v430_v61 = vcombine.high %v5603_v18, %v390_v30 }
 0x163   : > { %v437_v41 = vrot.slane %v429_v33, %v5672_v38  ;;  %v444_v10 = vrot.slane %v430_v61, %v5672_v38 }
 0x164   : > { %v405_v34 = vpop.permute.xlu0 %404  ;;  %v396_v35 = vpop.permute.xlu1 %395 }
 0x165   : > { %v477_v40 = vcombine.low %v399_v29, %v405_v34  ;;  %v493_v49 = vcombine.low %v437_v41, %v453_v46  ;;  %v494_v62 = vcombine.high %v437_v41, %v453_v46  ;;  %v478_v63 = vcombine.high %v399_v29, %v405_v34 }
 0x166   : > { %v509_v24 = vcombine.low %v444_v10, %v460_v16  ;;  %v510_v39 = vcombine.high %v444_v10, %v460_v16 }
 0x167   : > { %v485_v47 = vrot.slane %v477_v40, %v5672_v38  ;;  %v501_v56 = vrot.slane %v493_v49, %v5684_v51  ;;  %v492_v11 = vrot.slane %v478_v63, %v5672_v38  ;;  %v508_v13 = vrot.slane %v494_v62, %v5684_v51 }
 0x168   : > { %v402_v42 = vpop.permute.xlu1 %401  ;;  %v5677_v43 = vpop.permute.xlu0 %411  ;;  %v517_v29 = vrot.slane %v509_v24, %v5684_v51 }
 0x169   : > { %v461_v45 = vcombine.low %v396_v35, %v402_v42  ;;  %v462_v57 = vcombine.high %v396_v35, %v402_v42  ;;  %v565_v3 = vcombine.low %v5617_v22, %v5677_v43  ;;  %v566_v40 = vcombine.high %v5617_v22, %v5677_v43 }
 0x16a   : > { %v524_v22 = vrot.slane %v510_v39, %v5684_v51 }
 0x16b   : > { %v469_v48 = vrot.slane %v461_v45, %v5672_v38  ;;  %v476_v5 = vrot.slane %v462_v57, %v5672_v38  ;;  %v573_v14 = vrot.slane %v565_v3, %v5672_v38  ;;  %v580_v43 = vrot.slane %v566_v40, %v5672_v38 }
 0x16c   : > { %v5682_v50 = vpop.permute.xlu1 %408  ;;  %v5686_v53 = vpop.permute.xlu0 %417 }
 0x16d   : > { %v525_v52 = vcombine.low %v469_v48, %v485_v47  ;;  %v526_v58 = vcombine.high %v469_v48, %v485_v47  ;;  %v541_v17 = vcombine.low %v476_v5, %v492_v11  ;;  %v542_v33 = vcombine.high %v476_v5, %v492_v11 }
 0x16f   : > { %v533_v54 = vrot.slane %v525_v52, %v5684_v51  ;;  %v540_v7 = vrot.slane %v526_v58, %v5684_v51  ;;  %v549_v27 = vrot.slane %v541_v17, %v5684_v51  ;;  %v556_v46 = vrot.slane %v542_v33, %v5684_v51 }
 0x170   : > { %v5689_v55 = vpop.permute.xlu1 %414  ;;  %v424_v1 = vpop.permute.xlu0 %423 }
 0x171   : > { %v557_v59 = vcombine.low %v501_v56, %v533_v54  ;;  %v581_v60 = vcombine.low %v5682_v50, %v5689_v55  ;;  %v558_v6 = vcombine.high %v501_v56, %v533_v54  ;;  %v597_v8 = vcombine.low %v5686_v53, %v424_v1 }
 0x172   : > { %v559_v18 = vcombine.low %v508_v13, %v540_v7  ;;  %v560_v26 = vcombine.high %v508_v13, %v540_v7  ;;  %v561_v34 = vcombine.low %v517_v29, %v549_v27  ;;  %v598_v35 = vcombine.high %v5686_v53, %v424_v1 }
 0x173   : > { %717 = vrot.lane.b32.xlu0 %v557_v59, %s5489_s17  ;;  %v589_v9 = vrot.slane %v581_v60, %v5672_v38  ;;  %v605_v19 = vrot.slane %v597_v8, %v5672_v38  ;;  %v582_v36 = vcombine.high %v5682_v50, %v5689_v55  ;;  %v562_v45 = vcombine.high %v517_v29, %v549_v27 }
 0x174   : > { %v421_v2 = vpop.permute.xlu1 %420  ;;  %v612_v47 = vrot.slane %v598_v35, %v5672_v38  ;;  %v563_v53 = vcombine.low %v524_v22, %v556_v46  ;;  %v564_v57 = vcombine.high %v524_v22, %v556_v46 }
 0x175   : > { %v629_v20 = vcombine.low %v573_v14, %v589_v9  ;;  %v630_v37 = vcombine.high %v573_v14, %v589_v9  ;;  %v596_v48 = vrot.slane %v582_v36, %v5672_v38 }
 0x177   : > { %721 = vrot.lane.b32.xlu0 %v558_v6, %s5489_s17  ;;  %v637_v28 = vrot.slane %v629_v20, %v5684_v51  ;;  %v644_v49 = vrot.slane %v630_v37, %v5684_v51  ;;  %v645_v54 = vcombine.low %v580_v43, %v596_v48  ;;  %v646_v61 = vcombine.high %v580_v43, %v596_v48 }
 0x178   : > { %v427_v12 = vpop.permute.xlu1 %426 }
 0x179   : > { %v613_v15 = vcombine.low %v421_v2, %v427_v12  ;;  %v614_v30 = vcombine.high %v421_v2, %v427_v12  ;;  %v653_v58 = vrot.slane %v645_v54, %v5684_v51  ;;  %v660_v1 = vrot.slane %v646_v61, %v5684_v51 }
 0x17b   : > { %v621_v21 = vrot.slane %v613_v15, %v5672_v38  ;;  %725 = vrot.lane.b32.xlu0 %v559_v18, %s5489_s17  ;;  %v628_v41 = vrot.slane %v614_v30, %v5672_v38 }
 0x17d   : > { %v661_v25 = vcombine.low %v605_v19, %v621_v21  ;;  %v662_v31 = vcombine.high %v605_v19, %v621_v21  ;;  %v677_v50 = vcombine.low %v612_v47, %v628_v41  ;;  %v678_v59 = vcombine.high %v612_v47, %v628_v41 }
 0x17f   : > { %v669_v23 = vrot.slane %v661_v25, %v5684_v51  ;;  %729 = vrot.lane.b32.xlu0 %v560_v26, %s5489_s17  ;;  %v676_v44 = vrot.slane %v662_v31, %v5684_v51  ;;  %v685_v56 = vrot.slane %v677_v50, %v5684_v51  ;;  %v692_v63 = vrot.slane %v678_v59, %v5684_v51 }
 0x181   : > { %v693_v32 = vcombine.low %v637_v28, %v669_v23  ;;  %v694_v42 = vcombine.high %v637_v28, %v669_v23  ;;  %v695_v52 = vcombine.low %v644_v49, %v676_v44  ;;  %v696_v55 = vcombine.high %v644_v49, %v676_v44 }
 0x182   : > { %v697_v60 = vcombine.low %v653_v58, %v685_v56  ;;  %v698_v62 = vcombine.high %v653_v58, %v685_v56  ;;  %v699_v2 = vcombine.low %v660_v1, %v692_v63  ;;  %v700_v3 = vcombine.high %v660_v1, %v692_v63 }
 0x183   : > { %719 = vrot.lane.b32.xlu1 %v693_v32, %s5489_s17  ;;  %733 = vrot.lane.b32.xlu0 %v561_v34, %s5489_s17 }
 0x187   : > { %723 = vrot.lane.b32.xlu1 %v694_v42, %s5489_s17  ;;  %737 = vrot.lane.b32.xlu0 %v562_v45, %s5489_s17 }
 0x18b   : > { %727 = vrot.lane.b32.xlu1 %v695_v52, %s5489_s17  ;;  %741 = vrot.lane.b32.xlu0 %v563_v53, %s5489_s17 }
 0x18f   : > { %731 = vrot.lane.b32.xlu1 %v696_v55, %s5489_s17  ;;  %745 = vrot.lane.b32.xlu0 %v564_v57, %s5489_s17 }
 0x193   : > { %735 = vrot.lane.b32.xlu1 %v697_v60, %s5489_s17 }
 0x197   : > { %739 = vrot.lane.b32.xlu1 %v698_v62, %s5489_s17 }
 0x19b   : > { %743 = vrot.lane.b32.xlu1 %v699_v2, %s5489_s17 }
 0x19f   : > { %747 = vrot.lane.b32.xlu1 %v700_v3, %s5489_s17 }
 0x1e5   : > { %v718_v4 = vpop.permute.xlu0 %717 }
 0x1e6   : > { %766 = vst.msk [vmem:[#allocation2 + $0x1] sm:$0xff] %vm765_vm6, %v718_v4 }
 0x1e9   : > { %v722_v5 = vpop.permute.xlu0 %721 }
 0x1ea   : > { %768 = vst.msk [vmem:[#allocation2 + $0x19] sm:$0xff] %vm765_vm6, %v722_v5 }
 0x1ed   : > { %v726_v6 = vpop.permute.xlu0 %725  ;;  %v1668_v7 = vld [vmem:[#allocation2] sm:$0xff] }
 0x1ee   : > { %770 = vst.msk [vmem:[#allocation2 + $0x31] sm:$0xff] %vm765_vm6, %v726_v6  ;;  %1700 = vrot.lane.b32.xlu0 %v1668_v7, %s5490_s18  ;;  %1174 = vrot.lane.b32.xlu1 %v1668_v7, %s5491_s19  ;;  %v5764_v13 = vld [vmem:[#allocation2 + $0x1] sm:$0xff] }
 0x1f1   : > { %v730_v8 = vpop.permute.xlu0 %729  ;;  %v1670_v9 = vld [vmem:[#allocation2 + $0x18] sm:$0xff] }
 0x1f2   : > { %772 = vst.msk [vmem:[#allocation2 + $0x49] sm:$0xff] %vm765_vm6, %v730_v8  ;;  %1704 = vrot.lane.b32.xlu0 %v1670_v9, %s5490_s18  ;;  %1178 = vrot.lane.b32.xlu1 %v1670_v9, %s5491_s19  ;;  %v5776_v24 = vld [vmem:[#allocation2 + $0x19] sm:$0xff] }
 0x1f5   : > { %v720_v10 = vpop.permute.xlu1 %719  ;;  %v734_v11 = vpop.permute.xlu0 %733  ;;  %v1672_v12 = vld [vmem:[#allocation2 + $0x30] sm:$0xff] }
 0x1f6   : > { %767 = vst.msk [vmem:[#allocation2 + $0x9] sm:$0xff] %vm765_vm6, %v720_v10  ;;  %v5766_v14 = vld [vmem:[#allocation2 + $0x31] sm:$0xff]  ;;  %774 = vst.msk [vmem:[#allocation2 + $0x61] sm:$0xff] %vm765_vm6, %v734_v11  ;;  %1708 = vrot.lane.b32.xlu0 %v1672_v12, %s5490_s18  ;;  %v807_v15 = vcombine.low %v1668_v7, %v1672_v12  ;;  %v808_v16 = vcombine.high %v1668_v7, %v1672_v12  ;;  %1182 = vrot.lane.b32.xlu1 %v1672_v12, %s5491_s19 }
 0x1f7   : > { %v2160_v17 = vcombine.low %v5764_v13, %v5766_v14  ;;  %v2161_v18 = vcombine.high %v5764_v13, %v5766_v14 }
 0x1f8   : > { %v5786_v23 = vrot.slane %v807_v15, %v5672_v38  ;;  %v5791_v30 = vrot.slane %v808_v16, %v5672_v38 }
 0x1f9   : > { %v724_v19 = vpop.permute.xlu1 %723  ;;  %v738_v20 = vpop.permute.xlu0 %737  ;;  %v1674_v21 = vld [vmem:[#allocation2 + $0x48] sm:$0xff]  ;;  %v5804_v37 = vrot.slane %v2160_v17, %v5672_v38  ;;  %v5807_v39 = vrot.slane %v2161_v18, %v5672_v38 }
 0x1fa   : > { %769 = vst.msk [vmem:[#allocation2 + $0x21] sm:$0xff] %vm765_vm6, %v724_v19  ;;  %v5778_v25 = vld [vmem:[#allocation2 + $0x49] sm:$0xff]  ;;  %776 = vst.msk [vmem:[#allocation2 + $0x79] sm:$0xff] %vm765_vm6, %v738_v20  ;;  %1712 = vrot.lane.b32.xlu0 %v1674_v21, %s5490_s18  ;;  %v823_v26 = vcombine.low %v1670_v9, %v1674_v21  ;;  %v824_v27 = vcombine.high %v1670_v9, %v1674_v21  ;;  %1186 = vrot.lane.b32.xlu1 %v1674_v21, %s5491_s19 }
 0x1fb   : > { %v2176_v28 = vcombine.low %v5776_v24, %v5778_v25  ;;  %v2177_v29 = vcombine.high %v5776_v24, %v5778_v25 }
 0x1fc   : > { %v5794_v31 = vrot.slane %v823_v26, %v5672_v38  ;;  %v5797_v32 = vrot.slane %v824_v27, %v5672_v38 }
 0x1fd   : > { %v728_v33 = vpop.permute.xlu1 %727  ;;  %v5800_v34 = vrot.slane %v2176_v28, %v5672_v38  ;;  %v742_v35 = vpop.permute.xlu0 %741  ;;  %v1676_v36 = vld [vmem:[#allocation2 + $0x60] sm:$0xff]  ;;  %v5810_v40 = vrot.slane %v2177_v29, %v5672_v38  ;;  %v5861_v15 = vld [vmem:[#allocation2 + $0x8] sm:$0xff] }
 0x1fe   : > { %771 = vst.msk [vmem:[#allocation2 + $0x39] sm:$0xff] %vm765_vm6, %v728_v33  ;;  %v871_v41 = vcombine.low %v5786_v23, %v5794_v31  ;;  %v872_v42 = vcombine.high %v5786_v23, %v5794_v31  ;;  %v887_v44 = vcombine.low %v5791_v30, %v5797_v32  ;;  %v888_v45 = vcombine.high %v5791_v30, %v5797_v32  ;;  %v5836_v54 = vld [vmem:[#allocation2 + $0x61] sm:$0xff] }
 0x1ff   : > { %778 = vst.msk [vmem:[#allocation2 + $0x91] sm:$0xff] %vm765_vm6, %v742_v35  ;;  %1716 = vrot.lane.b32.xlu0 %v1676_v36, %s5490_s18  ;;  %1190 = vrot.lane.b32.xlu1 %v1676_v36, %s5491_s19  ;;  %v2224_v46 = vcombine.low %v5804_v37, %v5800_v34  ;;  %v2225_v47 = vcombine.high %v5804_v37, %v5800_v34 }
 0x200   : > { %v2240_v48 = vcombine.low %v5807_v39, %v5810_v40  ;;  %v2241_v49 = vcombine.high %v5807_v39, %v5810_v40  ;;  %v5864_v16 = vrot.slane %v871_v41, %v5684_v51  ;;  %v5867_v17 = vrot.slane %v872_v42, %v5684_v51 }
 0x201   : > { %v732_v22 = vpop.permute.xlu1 %731  ;;  %v746_v43 = vpop.permute.xlu0 %745  ;;  %v1678_v50 = vld [vmem:[#allocation2 + $0x78] sm:$0xff]  ;;  %v5870_v18 = vrot.slane %v887_v44, %v5684_v51  ;;  %v5888_v23 = vrot.slane %v888_v45, %v5684_v51  ;;  %v5892_v29 = vrot.slane %v2224_v46, %v5684_v51  ;;  %v5896_v32 = vld [vmem:[#allocation2 + $0x20] sm:$0xff] }
 0x202   : > { %773 = vst.msk [vmem:[#allocation2 + $0x51] sm:$0xff] %vm765_vm6, %v732_v22  ;;  %780 = vst.msk [vmem:[#allocation2 + $0xa9] sm:$0xff] %vm765_vm6, %v746_v43  ;;  %v5845_v61 = vld [vmem:[#allocation2 + $0x79] sm:$0xff]  ;;  %v5921_v22 = vrot.slane %v2225_v47, %v5684_v51 }
 0x203   : > { %1720 = vrot.lane.b32.xlu0 %v1678_v50, %s5490_s18  ;;  %1194 = vrot.lane.b32.xlu1 %v1678_v50, %s5491_s19  ;;  %8285 = vst [vmem:[#allocation6_spill] sm:$0xff] %v5864_v16  ;;  %8286 = vst [vmem:[#allocation7_spill] sm:$0xff] %v5867_v17 }
 0x204   : > { %8287 = vst [vmem:[#allocation8_spill] sm:$0xff] %v5870_v18  ;;  %8292 = vst [vmem:[#allocation13_spill] sm:$0xff] %v5888_v23 }
 0x205   : > { %v736_v52 = vpop.permute.xlu1 %735  ;;  %8293 = vst [vmem:[#allocation14_spill] sm:$0xff] %v5892_v29  ;;  %8295 = vst [vmem:[#allocation16_spill] sm:$0xff] %v5921_v22 }
 0x206   : > { %775 = vst.msk [vmem:[#allocation2 + $0x69] sm:$0xff] %vm765_vm6, %v736_v52  ;;  %v1680_v53 = vld [vmem:[#allocation2 + $0x90] sm:$0xff]  ;;  %v5930_v52 = vld [vmem:[#allocation2 + $0x38] sm:$0xff] }
 0x207   : > { %v5838_v55 = vld [vmem:[#allocation2 + $0x91] sm:$0xff]  ;;  %1724 = vrot.lane.b32.xlu0 %v1680_v53, %s5490_s18  ;;  %v839_v56 = vcombine.low %v1676_v36, %v1680_v53  ;;  %v840_v57 = vcombine.high %v1676_v36, %v1680_v53  ;;  %1198 = vrot.lane.b32.xlu1 %v1680_v53, %s5491_s19 }
 0x208   : > { %v2192_v58 = vcombine.low %v5836_v54, %v5838_v55  ;;  %v2193_v34 = vcombine.high %v5836_v54, %v5838_v55 }
 0x209   : > { %v740_v59 = vpop.permute.xlu1 %739  ;;  %v1682_v60 = vld [vmem:[#allocation2 + $0xa8] sm:$0xff]  ;;  %v847_v3 = vrot.slane %v839_v56, %v5672_v38  ;;  %v854_v4 = vrot.slane %v840_v57, %v5672_v38  ;;  %v5944_v47 = vld [vmem:[#allocation2 + $0x50] sm:$0xff] }
 0x20a   : > { %777 = vst.msk [vmem:[#allocation2 + $0x81] sm:$0xff] %vm765_vm6, %v740_v59  ;;  %v5847_v62 = vld [vmem:[#allocation2 + $0xa9] sm:$0xff]  ;;  %v855_v63 = vcombine.low %v1678_v50, %v1682_v60  ;;  %v856_v1 = vcombine.high %v1678_v50, %v1682_v60  ;;  %v2200_v19 = vrot.slane %v2192_v58, %v5672_v38  ;;  %v959_v39 = vcombine.low %v5896_v32, %v5944_v47 }
 0x20b   : > { %1728 = vrot.lane.b32.xlu0 %v1682_v60, %s5490_s18  ;;  %v2208_v2 = vcombine.low %v5845_v61, %v5847_v62  ;;  %1202 = vrot.lane.b32.xlu1 %v1682_v60, %s5491_s19  ;;  %v2209_v37 = vcombine.high %v5845_v61, %v5847_v62  ;;  %v2207_v60 = vrot.slane %v2193_v34, %v5672_v38 }
 0x20c   : > { %v863_v5 = vrot.slane %v855_v63, %v5672_v38  ;;  %v870_v6 = vrot.slane %v856_v1, %v5672_v38  ;;  %v943_v34 = vcombine.low %v5861_v15, %v5930_v52 }
 0x20d   : > { %v744_v7 = vpop.permute.xlu1 %743  ;;  %v2216_v8 = vrot.slane %v2208_v2, %v5672_v38  ;;  %v5950_v57 = vld [vmem:[#allocation2 + $0x68] sm:$0xff]  ;;  %v2223_v59 = vrot.slane %v2209_v37, %v5672_v38 }
 0x20e   : > { %779 = vst.msk [vmem:[#allocation2 + $0x99] sm:$0xff] %vm765_vm6, %v744_v7  ;;  %v903_v9 = vcombine.low %v847_v3, %v863_v5  ;;  %v904_v10 = vcombine.high %v847_v3, %v863_v5  ;;  %v919_v11 = vcombine.low %v854_v4, %v870_v6  ;;  %v920_v12 = vcombine.high %v854_v4, %v870_v6  ;;  %v5970_v3 = vld [vmem:[#allocation2 + $0x39] sm:$0xff]  ;;  %v5981_v6 = vld [vmem:[#allocation2 + $0x9] sm:$0xff]  ;;  %v5983_v7 = vld [vmem:[#allocation2 + $0x51] sm:$0xff] }
 0x20f   : > { %2588 = vrot.lane.b32.xlu0 %v5764_v13, %s5491_s19  ;;  %1702 = vrot.lane.b32.xlu1 %v5861_v15, %s5490_s18  ;;  %v2256_v30 = vcombine.low %v2200_v19, %v2216_v8  ;;  %v2257_v31 = vcombine.high %v2200_v19, %v2216_v8  ;;  %v2272_v1 = vcombine.low %v2207_v60, %v2223_v59  ;;  %v6037_v36 = vld [vmem:[#allocation2 + $0x69] sm:$0xff] }
 0x210   : > { %v5876_v20 = vrot.slane %v903_v9, %v5684_v51  ;;  %v5879_v21 = vrot.slane %v904_v10, %v5684_v51  ;;  %v5882_v26 = vrot.slane %v919_v11, %v5684_v51  ;;  %v5885_v27 = vrot.slane %v920_v12, %v5684_v51  ;;  %v5991_v10 = vld [vmem:[#allocation2 + $0x21] sm:$0xff]  ;;  %v5997_v12 = vld [vmem:[#allocation2 + $0x4a] sm:$0xff] }
 0x211   : > { %v748_v28 = vpop.permute.xlu1 %747  ;;  %v5915_v46 = vrot.slane %v2256_v30, %v5684_v51  ;;  %v5924_v43 = vrot.slane %v2257_v31, %v5684_v51  ;;  %v5956_v58 = vld [vmem:[#allocation2 + $0x80] sm:$0xff]  ;;  %v5976_v4 = vrot.slane %v2240_v48, %v5684_v51  ;;  %v5979_v5 = vrot.slane %v2272_v1, %v5684_v51 }
 0x212   : > { %8288 = vst [vmem:[#allocation9_spill] sm:$0xff] %v5876_v20  ;;  %8289 = vst [vmem:[#allocation10_spill] sm:$0xff] %v5879_v21  ;;  %v5993_v11 = vld [vmem:[#allocation2 + $0x81] sm:$0xff]  ;;  %v6023_v30 = vrot.slane %v2241_v49, %v5684_v51  ;;  %v2296_v45 = vcombine.low %v5981_v6, %v5970_v3  ;;  %v2273_v41 = vcombine.high %v2207_v60, %v2223_v59  ;;  %v6043_v49 = vld [vmem:[#allocation2 + $0x32] sm:$0xff] }
 0x213   : > { %8290 = vst [vmem:[#allocation11_spill] sm:$0xff] %v5882_v26  ;;  %8291 = vst [vmem:[#allocation12_spill] sm:$0xff] %v5885_v27  ;;  %2592 = vrot.lane.b32.xlu0 %v5776_v24, %s5491_s19  ;;  %1706 = vrot.lane.b32.xlu1 %v5896_v32, %s5490_s18  ;;  %v5995_v48 = vld [vmem:[#allocation2 + $0x3a] sm:$0xff]  ;;  %v6027_v53 = vld [vmem:[#allocation2 + $0x82] sm:$0xff]  ;;  %v2312_v33 = vcombine.low %v5991_v10, %v5983_v7 }
 0x214   : > { %781 = vst.msk [vmem:[#allocation2 + $0xb1] sm:$0xff] %vm765_vm6, %v748_v28  ;;  %8294 = vst [vmem:[#allocation15_spill] sm:$0xff] %v5915_v46  ;;  %v6013_v1 = vld [vmem:[#allocation2 + $0x1a] sm:$0xff]  ;;  %v6025_v28 = vld [vmem:[#allocation2 + $0x52] sm:$0xff]  ;;  %v6066_v23 = vrot.slane %v2273_v41, %v5684_v51 }
 0x215   : > { %8296 = vst [vmem:[#allocation17_spill] sm:$0xff] %v5924_v43  ;;  %v5964_v63 = vld [vmem:[#allocation2 + $0x98] sm:$0xff]  ;;  %8297 = vst [vmem:[#allocation18_spill] sm:$0xff] %v5976_v4  ;;  %v6045_v35 = vld [vmem:[#allocation2 + $0x62] sm:$0xff]  ;;  %v3540_v22 = vcombine.low %v6013_v1, %v5997_v12 }
 0x216   : > { %8298 = vst [vmem:[#allocation19_spill] sm:$0xff] %v5979_v5  ;;  %v6007_v31 = vld [vmem:[#allocation2 + $0x99] sm:$0xff]  ;;  %8302 = vst [vmem:[#allocation23_spill] sm:$0xff] %v6023_v30  ;;  %v975_v40 = vcombine.low %v5950_v57, %v5964_v63  ;;  %v6053_v59 = vld [vmem:[#allocation2 + $0xa] sm:$0xff] }
 0x217   : > { %2596 = vrot.lane.b32.xlu0 %v5766_v14, %s5491_s19  ;;  %1710 = vrot.lane.b32.xlu1 %v5930_v52, %s5490_s18  ;;  %v6015_v0 = vld [vmem:[#allocation2 + $0x7a] sm:$0xff]  ;;  %v6017_v56 = vld [vmem:[#allocation2 + $0x92] sm:$0xff]  ;;  %8303 = vst [vmem:[#allocation24_spill] sm:$0xff] %v6027_v53  ;;  %8305 = vst [vmem:[#allocation26_spill] sm:$0xff] %v6053_v59  ;;  %v2328_v43 = vcombine.low %v6037_v36, %v6007_v31  ;;  %v3660_v18 = vcombine.low %v6053_v59, %v5995_v48 }
 0x218   : > { %8301 = vst [vmem:[#allocation22_spill] sm:$0xff] %v6017_v56  ;;  %v6029_v50 = vld [vmem:[#allocation2 + $0x9a] sm:$0xff]  ;;  %v6055_v60 = vld [vmem:[#allocation2 + $0x22] sm:$0xff]  ;;  %v6057_v4 = vld [vmem:[#allocation2 + $0x6a] sm:$0xff]  ;;  %v3556_v27 = vcombine.low %v6045_v35, %v6017_v56  ;;  %v6092_v56 = vrot.slane %v943_v34, %v5672_v38  ;;  %v6112_v34 = vrot.slane %v3540_v22, %v5672_v38 }
 0x219   : > { %8304 = vst [vmem:[#allocation25_spill] sm:$0xff] %v6029_v50  ;;  %8306 = vst [vmem:[#allocation27_spill] sm:$0xff] %v6066_v23  ;;  %v6073_v26 = vld [vmem:[#allocation2 + $0x2] sm:$0xff]  ;;  %v3676_v21 = vcombine.low %v6055_v60, %v6025_v28  ;;  %v3692_v17 = vcombine.low %v6057_v4, %v6029_v50  ;;  %v6098_v50 = vrot.slane %v975_v40, %v5672_v38 }
 0x21a   : > { %8310 = vst [vmem:[#allocation31_spill] sm:$0xff] %v6112_v34 }
 0x21b   : > { %2600 = vrot.lane.b32.xlu0 %v5778_v25, %s5491_s19  ;;  %1714 = vrot.lane.b32.xlu1 %v5944_v47, %s5490_s18  ;;  %v5968_v2 = vld [vmem:[#allocation2 + $0xb0] sm:$0xff]  ;;  %8308 = vst [vmem:[#allocation29_spill] sm:$0xff] %v6098_v50 }
 0x21c   : > { %v5985_v8 = vld [vmem:[#allocation2 + $0xb1] sm:$0xff]  ;;  %v991_v37 = vcombine.low %v5956_v58, %v5968_v2 }
 0x21d   : > { %v5987_v9 = vld [vmem:[#allocation2 + $0xaa] sm:$0xff]  ;;  %v5999_v19 = vld [vmem:[#allocation2 + $0xb2] sm:$0xff]  ;;  %v2344_v44 = vcombine.low %v5993_v11, %v5985_v8 }
 0x21e   : > { %8299 = vst [vmem:[#allocation20_spill] sm:$0xff] %v5987_v9  ;;  %8300 = vst [vmem:[#allocation21_spill] sm:$0xff] %v5999_v19  ;;  %v3572_v42 = vcombine.low %v6015_v0, %v5987_v9  ;;  %v3708_v5 = vcombine.low %v6027_v53, %v5999_v19  ;;  %v3524_v19 = vcombine.low %v6073_v26, %v6043_v49 }
 0x21f   : > { %2604 = vrot.lane.b32.xlu0 %v5836_v54, %s5491_s19  ;;  %1718 = vrot.lane.b32.xlu1 %v5950_v57, %s5490_s18  ;;  %v6082_v41 = vrot.slane %v2344_v44, %v5672_v38  ;;  %v6095_v53 = vrot.slane %v959_v39, %v5672_v38  ;;  %v6109_v9 = vrot.slane %v2328_v43, %v5672_v38 }
 0x220   : > { %v6101_v44 = vrot.slane %v3708_v5, %v5672_v38  ;;  %v6115_v39 = vrot.slane %v3556_v27, %v5672_v38  ;;  %v6128_v43 = vrot.slane %v3692_v17, %v5672_v38  ;;  %v6133_v27 = vrot.slane %v3524_v19, %v5672_v38 }
 0x221   : > { %v2392_v22 = vcombine.low %v6109_v9, %v6082_v41 }
 0x222   : > { %8309 = vst [vmem:[#allocation30_spill] sm:$0xff] %v6101_v44  ;;  %8311 = vst [vmem:[#allocation32_spill] sm:$0xff] %v6115_v39  ;;  %v3756_v17 = vcombine.low %v6128_v43, %v6101_v44 }
 0x223   : > { %2608 = vrot.lane.b32.xlu0 %v5845_v61, %s5491_s19  ;;  %1722 = vrot.lane.b32.xlu1 %v5956_v58, %s5490_s18  ;;  %8313 = vst [vmem:[#allocation34_spill] sm:$0xff] %v6128_v43  ;;  %8314 = vst [vmem:[#allocation35_spill] sm:$0xff] %v6133_v27  ;;  %v6160_v23 = vrot.slane %v2392_v22, %v5684_v51 }
 0x224   : > { %v6169_v43 = vrot.slane %v3756_v17, %v5684_v51 }
 0x225   : > { %8317 = vst [vmem:[#allocation38_spill] sm:$0xff] %v6160_v23 }
 0x226   : > { %8320 = vst [vmem:[#allocation41_spill] sm:$0xff] %v6169_v43 }
 0x227   : > { %2612 = vrot.lane.b32.xlu0 %v5838_v55, %s5491_s19  ;;  %1726 = vrot.lane.b32.xlu1 %v5964_v63, %s5490_s18 }
 0x22b   : > { %2616 = vrot.lane.b32.xlu0 %v5847_v62, %s5491_s19  ;;  %1730 = vrot.lane.b32.xlu1 %v5968_v2, %s5490_s18 }
 0x22f   : > { %3064 = vrot.lane.b32.xlu0 %v5764_v13, %s5490_s18  ;;  %2590 = vrot.lane.b32.xlu1 %v5981_v6, %s5491_s19  ;;  %v6071_v13 = vrot.slane %v991_v37, %v5672_v38  ;;  %v6087_v37 = vrot.slane %v3572_v42, %v5672_v38  ;;  %v6106_v42 = vrot.slane %v2312_v33, %v5672_v38 }
 0x230   : > { %v6125_v33 = vrot.slane %v3676_v21, %v5672_v38  ;;  %v6142_v21 = vrot.slane %v3660_v18, %v5672_v38 }
 0x231   : > { %8307 = vst [vmem:[#allocation28_spill] sm:$0xff] %v6087_v37  ;;  %v1039_v5 = vcombine.low %v6098_v50, %v6071_v13  ;;  %v3620_v40 = vcombine.low %v6115_v39, %v6087_v37  ;;  %v3588_v39 = vcombine.low %v6133_v27, %v6112_v34 }
 0x232   : > { %8312 = vst [vmem:[#allocation33_spill] sm:$0xff] %v6125_v33  ;;  %8315 = vst [vmem:[#allocation36_spill] sm:$0xff] %v6142_v21  ;;  %v3724_v18 = vcombine.low %v6142_v21, %v6125_v33 }
 0x233   : > { %3068 = vrot.lane.b32.xlu0 %v5776_v24, %s5490_s18  ;;  %2594 = vrot.lane.b32.xlu1 %v5991_v10, %s5491_s19  ;;  %v6122_v24 = vrot.slane %v2296_v45, %v5672_v38  ;;  %v1007_v45 = vcombine.low %v6092_v56, %v6095_v53  ;;  %v6155_v50 = vrot.slane %v1039_v5, %v5684_v51 }
 0x234   : > { %v6177_v44 = vrot.slane %v3588_v39, %v5684_v51 }
 0x235   : > { %v2360_v19 = vcombine.low %v6122_v24, %v6106_v42  ;;  %8316 = vst [vmem:[#allocation37_spill] sm:$0xff] %v6155_v50  ;;  %v6166_v30 = vrot.slane %v1007_v45, %v5684_v51 }
 0x236   : > { %8322 = vst [vmem:[#allocation43_spill] sm:$0xff] %v6177_v44 }
 0x237   : > { %3072 = vrot.lane.b32.xlu0 %v5766_v14, %s5490_s18  ;;  %2598 = vrot.lane.b32.xlu1 %v5970_v3, %s5491_s19  ;;  %v6163_v14 = vrot.slane %v3620_v40, %v5684_v51  ;;  %8319 = vst [vmem:[#allocation40_spill] sm:$0xff] %v6166_v30  ;;  %v6174_v5 = vrot.slane %v2360_v19, %v5684_v51 }
 0x238   : > { %v6184_v40 = vrot.slane %v3724_v18, %v5684_v51 }
 0x239   : > { %8318 = vst [vmem:[#allocation39_spill] sm:$0xff] %v6163_v14  ;;  %8321 = vst [vmem:[#allocation42_spill] sm:$0xff] %v6174_v5 }
 0x23a   : > { %8323 = vst [vmem:[#allocation44_spill] sm:$0xff] %v6184_v40 }
 0x23b   : > { %3076 = vrot.lane.b32.xlu0 %v5778_v25, %s5490_s18  ;;  %2602 = vrot.lane.b32.xlu1 %v5983_v7, %s5491_s19 }
 0x23f   : > { %3080 = vrot.lane.b32.xlu0 %v5836_v54, %s5490_s18  ;;  %2606 = vrot.lane.b32.xlu1 %v6037_v36, %s5491_s19 }
 0x243   : > { %3084 = vrot.lane.b32.xlu0 %v5845_v61, %s5490_s18  ;;  %2610 = vrot.lane.b32.xlu1 %v5993_v11, %s5491_s19 }
 0x247   : > { %3088 = vrot.lane.b32.xlu0 %v5838_v55, %s5490_s18  ;;  %2614 = vrot.lane.b32.xlu1 %v6007_v31, %s5491_s19 }
 0x24b   : > { %3092 = vrot.lane.b32.xlu0 %v5847_v62, %s5490_s18  ;;  %2618 = vrot.lane.b32.xlu1 %v5985_v8, %s5491_s19 }
 0x24f   : > { %1176 = vrot.lane.b32.xlu0 %v5861_v15, %s5491_s19  ;;  %3066 = vrot.lane.b32.xlu1 %v5981_v6, %s5490_s18 }
 0x253   : > { %1180 = vrot.lane.b32.xlu0 %v5896_v32, %s5491_s19  ;;  %3070 = vrot.lane.b32.xlu1 %v5991_v10, %s5490_s18 }
 0x257   : > { %1184 = vrot.lane.b32.xlu0 %v5930_v52, %s5491_s19  ;;  %3074 = vrot.lane.b32.xlu1 %v5970_v3, %s5490_s18 }
 0x25b   : > { %1188 = vrot.lane.b32.xlu0 %v5944_v47, %s5491_s19  ;;  %3078 = vrot.lane.b32.xlu1 %v5983_v7, %s5490_s18 }
 0x25f   : > { %1192 = vrot.lane.b32.xlu0 %v5950_v57, %s5491_s19  ;;  %3082 = vrot.lane.b32.xlu1 %v6037_v36, %s5490_s18 }
 0x260   : > { %v6232_v54 = vpop.permute.xlu0 %1700  ;;  %v6234_v55 = vpop.permute.xlu1 %1174 }
 0x261   : > { %8324 = vst [vmem:[#allocation45_spill] sm:$0xff] %v6232_v54  ;;  %8325 = vst [vmem:[#allocation46_spill] sm:$0xff] %v6234_v55 }
 0x263   : > { %1196 = vrot.lane.b32.xlu0 %v5956_v58, %s5491_s19  ;;  %3086 = vrot.lane.b32.xlu1 %v5993_v11, %s5490_s18 }
 0x264   : > { %v6240_v61 = vpop.permute.xlu0 %1704  ;;  %v6242_v62 = vpop.permute.xlu1 %1178 }
 0x265   : > { %8326 = vst [vmem:[#allocation47_spill] sm:$0xff] %v6240_v61  ;;  %8327 = vst [vmem:[#allocation48_spill] sm:$0xff] %v6242_v62 }
 0x267   : > { %1200 = vrot.lane.b32.xlu0 %v5964_v63, %s5491_s19  ;;  %3090 = vrot.lane.b32.xlu1 %v6007_v31, %s5490_s18 }
 0x268   : > { %v6248_v18 = vpop.permute.xlu0 %1708  ;;  %v6250_v17 = vpop.permute.xlu1 %1182 }
 0x269   : > { %8328 = vst [vmem:[#allocation49_spill] sm:$0xff] %v6248_v18  ;;  %8329 = vst [vmem:[#allocation50_spill] sm:$0xff] %v6250_v17  ;;  %v1748_v34 = vcombine.low %v6232_v54, %v6248_v18  ;;  %v1222_v40 = vcombine.low %v6234_v55, %v6250_v17  ;;  %v976_v55 = vcombine.high %v5950_v57, %v5964_v63  ;;  %v8361_v57 = vld [vmem:[#allocation29_spill] sm:$0xff] }
 0x26a   : > { %v1040_v63 = vcombine.high %v8361_v57, %v6071_v13 }
 0x26b   : > { %1204 = vrot.lane.b32.xlu0 %v5968_v2, %s5491_s19  ;;  %3094 = vrot.lane.b32.xlu1 %v5985_v8, %s5490_s18 }
 0x26c   : > { %v6256_v25 = vpop.permute.xlu0 %1712  ;;  %v6258_v39 = vpop.permute.xlu1 %1186 }
 0x26d   : > { %8330 = vst [vmem:[#allocation51_spill] sm:$0xff] %v6256_v25  ;;  %8331 = vst [vmem:[#allocation52_spill] sm:$0xff] %v6258_v39  ;;  %v1764_v46 = vcombine.low %v6240_v61, %v6256_v25  ;;  %v1238_v29 = vcombine.low %v6242_v62, %v6258_v39 }
 0x26f   : > { %3952 = vrot.lane.b32.xlu0 %v6073_v26, %s5491_s19  ;;  %3954 = vrot.lane.b32.xlu1 %v6053_v59, %s5491_s19 }
 0x271   : > { %v6264_v19 = vpop.permute.xlu0 %1716  ;;  %v6266_v45 = vpop.permute.xlu1 %1190 }
 0x272   : > { %8332 = vst [vmem:[#allocation53_spill] sm:$0xff] %v6264_v19  ;;  %8333 = vst [vmem:[#allocation54_spill] sm:$0xff] %v6266_v45 }
 0x273   : > { %3956 = vrot.lane.b32.xlu0 %v6013_v1, %s5491_s19  ;;  %3958 = vrot.lane.b32.xlu1 %v6055_v60, %s5491_s19 }
 0x275   : > { %v6272_v22 = vpop.permute.xlu0 %1720  ;;  %v6274_v21 = vpop.permute.xlu1 %1194 }
 0x276   : > { %8334 = vst [vmem:[#allocation55_spill] sm:$0xff] %v6272_v22  ;;  %8335 = vst [vmem:[#allocation56_spill] sm:$0xff] %v6274_v21 }
 0x277   : > { %3960 = vrot.lane.b32.xlu0 %v6043_v49, %s5491_s19  ;;  %3962 = vrot.lane.b32.xlu1 %v5995_v48, %s5491_s19 }
 0x279   : > { %v6280_v33 = vpop.permute.xlu0 %1724  ;;  %v6282_v37 = vpop.permute.xlu1 %1198 }
 0x27a   : > { %8336 = vst [vmem:[#allocation57_spill] sm:$0xff] %v6280_v33  ;;  %8337 = vst [vmem:[#allocation58_spill] sm:$0xff] %v6282_v37  ;;  %v1780_v27 = vcombine.low %v6264_v19, %v6280_v33  ;;  %v1254_v61 = vcombine.low %v6266_v45, %v6282_v37  ;;  %v6307_v19 = vrot.slane %v1764_v46, %v5672_v38 }
 0x27b   : > { %3964 = vrot.lane.b32.xlu0 %v5997_v12, %s5491_s19  ;;  %3966 = vrot.lane.b32.xlu1 %v6025_v28, %s5491_s19  ;;  %v6310_v33 = vrot.slane %v1238_v29, %v5672_v38  ;;  %v6325_v46 = vrot.slane %v1748_v34, %v5672_v38  ;;  %v6328_v29 = vrot.slane %v1222_v40, %v5672_v38 }
 0x27c   : > { %8340 = vst [vmem:[#allocation61_spill] sm:$0xff] %v6307_v19  ;;  %v6317_v45 = vrot.slane %v1780_v27, %v5672_v38 }
 0x27d   : > { %v6300_v25 = vpop.permute.xlu0 %1728  ;;  %v6304_v39 = vpop.permute.xlu1 %1202  ;;  %8341 = vst [vmem:[#allocation62_spill] sm:$0xff] %v6310_v33  ;;  %8344 = vst [vmem:[#allocation65_spill] sm:$0xff] %v6325_v46  ;;  %v1812_v34 = vcombine.low %v6325_v46, %v6307_v19  ;;  %v1286_v40 = vcombine.low %v6328_v29, %v6310_v33  ;;  %v8356_v33 = vld [vmem:[#allocation25_spill] sm:$0xff] }
 0x27e   : > { %8338 = vst [vmem:[#allocation59_spill] sm:$0xff] %v6300_v25  ;;  %v1796_v62 = vcombine.low %v6272_v22, %v6300_v25  ;;  %8339 = vst [vmem:[#allocation60_spill] sm:$0xff] %v6304_v39  ;;  %v1270_v54 = vcombine.low %v6274_v21, %v6304_v39  ;;  %v6331_v21 = vrot.slane %v1254_v61, %v5672_v38  ;;  %v8360_v19 = vld [vmem:[#allocation21_spill] sm:$0xff] }
 0x27f   : > { %3968 = vrot.lane.b32.xlu0 %v6045_v35, %s5491_s19  ;;  %8342 = vst [vmem:[#allocation63_spill] sm:$0xff] %v6317_v45  ;;  %3970 = vrot.lane.b32.xlu1 %v6057_v4, %s5491_s19  ;;  %8345 = vst [vmem:[#allocation66_spill] sm:$0xff] %v6328_v29  ;;  %v6363_v29 = vrot.slane %v1812_v34, %v5684_v51 }
 0x280   : > { %v6320_v37 = vrot.slane %v1796_v62, %v5672_v38  ;;  %8346 = vst [vmem:[#allocation67_spill] sm:$0xff] %v6331_v21  ;;  %v6334_v39 = vrot.slane %v1270_v54, %v5672_v38  ;;  %v8350_v54 = vld [vmem:[#allocation24_spill] sm:$0xff] }
 0x281   : > { %v6336_v27 = vpop.permute.xlu0 %2588  ;;  %v6340_v22 = vpop.permute.xlu1 %1702  ;;  %8353 = vst [vmem:[#allocation72_spill] sm:$0xff] %v6363_v29 }
 0x282   : > { %8343 = vst [vmem:[#allocation64_spill] sm:$0xff] %v6320_v37  ;;  %8347 = vst [vmem:[#allocation68_spill] sm:$0xff] %v6334_v39  ;;  %v1844_v62 = vcombine.low %v6317_v45, %v6320_v37  ;;  %v1318_v61 = vcombine.low %v6331_v21, %v6334_v39  ;;  %v6366_v21 = vrot.slane %v1286_v40, %v5684_v51  ;;  %v8355_v39 = vld [vmem:[#allocation22_spill] sm:$0xff] }
 0x283   : > { %8348 = vst [vmem:[#allocation69_spill] sm:$0xff] %v6336_v27  ;;  %8349 = vst [vmem:[#allocation70_spill] sm:$0xff] %v6340_v22  ;;  %3972 = vrot.lane.b32.xlu0 %v6015_v0, %s5491_s19  ;;  %3974 = vrot.lane.b32.xlu1 %v8350_v54, %s5491_s19  ;;  %v960_v40 = vcombine.high %v5896_v32, %v5944_v47  ;;  %v990_v47 = vrot.slane %v976_v55, %v5672_v38 }
 0x284   : > { %v6353_v25 = vrot.slane %v1844_v62, %v5684_v51  ;;  %v6356_v45 = vrot.slane %v1318_v61, %v5684_v51  ;;  %8354 = vst [vmem:[#allocation73_spill] sm:$0xff] %v6366_v21  ;;  %v992_v62 = vcombine.high %v5956_v58, %v5968_v2  ;;  %v8359_v58 = vld [vmem:[#allocation20_spill] sm:$0xff]  ;;  %v944_v2 = vcombine.high %v5861_v15, %v5930_v52 }
 0x285   : > { %v6358_v37 = vpop.permute.xlu0 %2592  ;;  %v6360_v46 = vpop.permute.xlu1 %1706  ;;  %v974_v32 = vrot.slane %v960_v40, %v5672_v38  ;;  %v1008_v52 = vcombine.high %v6092_v56, %v6095_v53  ;;  %v2393_v56 = vcombine.high %v6109_v9, %v6082_v41  ;;  %v1072_v9 = vcombine.high %v6166_v30, %v6155_v50 }
 0x286   : > { %8351 = vst [vmem:[#allocation24_spill] sm:$0xff] %v6353_v25  ;;  %8352 = vst [vmem:[#allocation71_spill] sm:$0xff] %v6356_v45  ;;  %v1006_v18 = vrot.slane %v992_v62, %v5672_v38  ;;  %v958_v15 = vrot.slane %v944_v2, %v5672_v38  ;;  %v1054_v45 = vrot.slane %v1040_v63, %v5684_v51 }
 0x287   : > { %3976 = vrot.lane.b32.xlu0 %v8355_v39, %s5491_s19  ;;  %3978 = vrot.lane.b32.xlu1 %v8356_v33, %s5491_s19  ;;  %v1022_v2 = vrot.slane %v1008_v52, %v5684_v51 }
 0x288   : > { %v1055_v62 = vcombine.low %v990_v47, %v1006_v18  ;;  %v1023_v55 = vcombine.low %v958_v15, %v974_v32  ;;  %v1056_v13 = vcombine.high %v990_v47, %v1006_v18  ;;  %v1024_v29 = vcombine.high %v958_v15, %v974_v32 }
 0x289   : > { %v6374_v61 = vpop.permute.xlu0 %2596  ;;  %v6384_v17 = vpop.permute.xlu1 %1710  ;;  %v2361_v18 = vcombine.high %v6122_v24, %v6106_v42  ;;  %v2313_v47 = vcombine.high %v5991_v10, %v5983_v7  ;;  %v1073_v52 = vcombine.low %v1022_v2, %v1054_v45  ;;  %v1074_v41 = vcombine.high %v1022_v2, %v1054_v45 }
 0x28a   : > { %8357 = vst [vmem:[#allocation22_spill] sm:$0xff] %v6374_v61  ;;  %8358 = vst [vmem:[#allocation25_spill] sm:$0xff] %v6384_v17  ;;  %v1063_v53 = vrot.slane %v1055_v62, %v5684_v51  ;;  %v1031_v63 = vrot.slane %v1023_v55, %v5684_v51  ;;  %v1070_v32 = vrot.slane %v1056_v13, %v5684_v51 }
 0x28b   : > { %3980 = vrot.lane.b32.xlu0 %v8359_v58, %s5491_s19  ;;  %3982 = vrot.lane.b32.xlu1 %v8360_v19, %s5491_s19  ;;  %v2297_v42 = vcombine.high %v5981_v6, %v5970_v3  ;;  %v1038_v24 = vrot.slane %v1024_v29, %v5684_v51  ;;  %v2407_v10 = vrot.slane %v2393_v56, %v5684_v51  ;;  %v8365_v6 = vld [vmem:[#allocation7_spill] sm:$0xff]  ;;  %v8366_v29 = vld [vmem:[#allocation10_spill] sm:$0xff] }
 0x28c   : > { %v1075_v7 = vcombine.low %v1031_v63, %v1063_v53  ;;  %v1076_v55 = vcombine.high %v1031_v63, %v1063_v53  ;;  %v2375_v13 = vrot.slane %v2361_v18, %v5684_v51  ;;  %v2345_v45 = vcombine.high %v5993_v11, %v5985_v8 }
 0x28d   : > { %v6393_v34 = vpop.permute.xlu0 %2600  ;;  %v6399_v21 = vpop.permute.xlu1 %1714  ;;  %v8367_v2 = vcombine.low %v8365_v6, %v8366_v29  ;;  %v1077_v30 = vcombine.low %v1038_v24, %v1070_v32  ;;  %v1078_v56 = vcombine.high %v1038_v24, %v1070_v32  ;;  %v2425_v53 = vcombine.high %v6174_v5, %v6160_v23  ;;  %v8371_v24 = vld [vmem:[#allocation11_spill] sm:$0xff] }
 0x28e   : > { %v8368_v18 = vcombine.high %v5864_v16, %v5876_v20  ;;  %v8369_v8 = vcombine.high %v8365_v6, %v8366_v29  ;;  %v6471_v63 = vrot.slane %v2297_v42, %v5672_v38  ;;  %v2329_v32 = vcombine.high %v6037_v36, %v6007_v31  ;;  %v8374_v42 = vld [vmem:[#allocation44_spill] sm:$0xff]  ;;  %v8376_v5 = vld [vmem:[#allocation35_spill] sm:$0xff]  ;;  %v8383_v16 = vld [vmem:[#allocation14_spill] sm:$0xff] }
 0x28f   : > { %4428 = vrot.lane.b32.xlu0 %v6073_v26, %s5490_s18  ;;  %4430 = vrot.lane.b32.xlu1 %v6053_v59, %s5490_s18  ;;  %v6445_v59 = vrot.slane %v2313_v47, %v5672_v38  ;;  %v6454_v50 = vpack.i.bf16 %v1073_v52, %v8367_v2  ;;  %v8370_v52 = vld [vmem:[#allocation8_spill] sm:$0xff]  ;;  %v3789_v29 = vcombine.high %v8374_v42, %v6169_v43 }
 0x290   : > { %v6463_v47 = vpack.i.bf16 %v1072_v9, %v8368_v18  ;;  %v6468_v11 = vpack.i.bf16 %v1074_v41, %v8369_v8  ;;  %v8372_v2 = vcombine.low %v8370_v52, %v8371_v24  ;;  %v2426_v9 = vcombine.low %v2375_v13, %v2407_v10  ;;  %v8375_v8 = vld [vmem:[#allocation31_spill] sm:$0xff] }
 0x291   : > { %v6408_v40 = vpop.permute.xlu0 %2604  ;;  %v6411_v57 = vpop.permute.xlu1 %1718  ;;  %v2427_v18 = vcombine.high %v2375_v13, %v2407_v10  ;;  %v3653_v41 = vcombine.high %v6177_v44, %v6163_v14  ;;  %v6489_v36 = vrot.slane %v2345_v45, %v5672_v38  ;;  %v2376_v31 = vcombine.low %v6471_v63, %v6445_v59  ;;  %v8378_v14 = vld [vmem:[#allocation13_spill] sm:$0xff]  ;;  %v8379_v44 = vld [vmem:[#allocation12_spill] sm:$0xff] }
 0x292   : > { %8362 = vst [vmem:[#allocation20_spill] sm:$0xff] %v6411_v57  ;;  %v6480_v23 = vpack.i.bf16 %v1075_v7, %v8372_v2  ;;  %v3589_v7 = vcombine.high %v8376_v5, %v8375_v8  ;;  %v8377_v10 = vcombine.high %v8370_v52, %v8371_v24  ;;  %v8380_v20 = vcombine.low %v8378_v14, %v8379_v44  ;;  %v8386_v52 = vld [vmem:[#allocation28_spill] sm:$0xff] }
 0x293   : > { %4432 = vrot.lane.b32.xlu0 %v6013_v1, %s5490_s18  ;;  %4434 = vrot.lane.b32.xlu1 %v6055_v60, %s5490_s18  ;;  %v8382_v45 = vcombine.high %v8378_v14, %v8379_v44  ;;  %v8387_v24 = vld [vmem:[#allocation32_spill] sm:$0xff]  ;;  %v8390_v44 = vld [vmem:[#allocation30_spill] sm:$0xff] }
 0x294   : > { %8373 = vst [vmem:[#allocation7_spill] sm:$0xff] %v6480_v23  ;;  %v6500_v13 = vpack.i.bf16 %v1076_v55, %v8377_v10  ;;  %v6505_v43 = vpack.i.bf16 %v1077_v30, %v8380_v20  ;;  %v8384_v23 = vld [vmem:[#allocation15_spill] sm:$0xff]  ;;  %v6520_v55 = vrot.slane %v2329_v32, %v5672_v38  ;;  %v3621_v20 = vcombine.high %v8387_v24, %v8386_v52  ;;  %v8388_v30 = vld [vmem:[#allocation33_spill] sm:$0xff]  ;;  %v8389_v10 = vld [vmem:[#allocation36_spill] sm:$0xff] }
 0x295   : > { %v6421_v25 = vpop.permute.xlu0 %2608  ;;  %v6429_v15 = vpop.permute.xlu1 %1722  ;;  %v6510_v42 = vpack.i.bf16 %v1078_v56, %v8382_v45  ;;  %v8385_v5 = vcombine.high %v8383_v16, %v8384_v23  ;;  %v8391_v14 = vld [vmem:[#allocation34_spill] sm:$0xff]  ;;  %v8392_v32 = vld [vmem:[#allocation16_spill] sm:$0xff] }
 0x296   : > { %8363 = vst [vmem:[#allocation21_spill] sm:$0xff] %v6429_v15  ;;  %8381 = vst [vmem:[#allocation10_spill] sm:$0xff] %v6505_v43  ;;  %v3725_v43 = vcombine.high %v8389_v10, %v8388_v30  ;;  %v3757_v56 = vcombine.high %v8391_v14, %v8390_v44  ;;  %v6546_v10 = vpack.i.bf16 %v3789_v29, %v3653_v41 }
 0x297   : > { %4436 = vrot.lane.b32.xlu0 %v6043_v49, %s5490_s18  ;;  %4438 = vrot.lane.b32.xlu1 %v5995_v48, %s5490_s18  ;;  %v6515_v8 = vpack.i.bf16 %v2425_v53, %v8385_v5  ;;  %v8393_v5 = vld [vmem:[#allocation17_spill] sm:$0xff]  ;;  %v6549_v44 = vrot.slane %v2376_v31, %v5684_v51  ;;  %v2408_v14 = vcombine.low %v6520_v55, %v6489_v36 }
 0x298   : > { %v8394_v23 = vcombine.low %v8392_v32, %v8393_v5  ;;  %v8395_v52 = vcombine.high %v8392_v32, %v8393_v5  ;;  %v6569_v31 = vrot.slane %v3621_v20, %v5684_v51  ;;  %v6575_v32 = vrot.slane %v3757_v56, %v5684_v51 }
 0x299   : > { %v6441_v62 = vpop.permute.xlu0 %2612  ;;  %v6449_v3 = vpop.permute.xlu1 %1726  ;;  %v2377_v5 = vcombine.high %v6471_v63, %v6445_v59  ;;  %v2409_v59 = vcombine.high %v6520_v55, %v6489_v36  ;;  %v3525_v63 = vcombine.high %v6073_v26, %v6043_v49  ;;  %v3573_v56 = vcombine.high %v6015_v0, %v8359_v58 }
 0x29a   : > { %8364 = vst [vmem:[#allocation29_spill] sm:$0xff] %v6449_v3  ;;  %v6537_v16 = vpack.i.bf16 %v2426_v9, %v8394_v23  ;;  %v6542_v24 = vpack.i.bf16 %v2427_v18, %v8395_v52  ;;  %v2652_v23 = vcombine.low %v6358_v37, %v6393_v34  ;;  %v1900_v9 = vcombine.low %v6360_v46, %v6399_v21 }
 0x29b   : > { %4440 = vrot.lane.b32.xlu0 %v5997_v12, %s5490_s18  ;;  %4442 = vrot.lane.b32.xlu1 %v6025_v28, %s5490_s18  ;;  %v2668_v18 = vcombine.low %v6408_v40, %v6441_v62  ;;  %v1916_v41 = vcombine.low %v6411_v57, %v6449_v3  ;;  %v2636_v52 = vcombine.low %v6336_v27, %v6374_v61 }
 0x29c   : > { %v1884_v57 = vcombine.low %v6340_v22, %v6384_v17  ;;  %v6605_v22 = vrot.slane %v1900_v9, %v5672_v38  ;;  %v3557_v26 = vcombine.high %v6045_v35, %v8355_v39  ;;  %v3677_v49 = vcombine.high %v6055_v60, %v6025_v28  ;;  %v8404_v60 = vld [vmem:[#allocation26_spill] sm:$0xff] }
 0x29d   : > { %v6484_v6 = vpop.permute.xlu0 %2616  ;;  %v6495_v2 = vpop.permute.xlu1 %1730  ;;  %v6608_v17 = vrot.slane %v2668_v18, %v5672_v38  ;;  %v6611_v36 = vrot.slane %v1916_v41, %v5672_v38  ;;  %v6640_v28 = vrot.slane %v2408_v14, %v5684_v51 }
 0x29e   : > { %v2684_v45 = vcombine.low %v6421_v25, %v6484_v6  ;;  %v1932_v53 = vcombine.low %v6429_v15, %v6495_v2  ;;  %v6554_v15 = vrot.slane %v3589_v7, %v5684_v51  ;;  %v6572_v7 = vrot.slane %v3725_v43, %v5684_v51  ;;  %8399 = vst [vmem:[#allocation35_spill] sm:$0xff] %v6605_v22 }
 0x29f   : > { %4444 = vrot.lane.b32.xlu0 %v6045_v35, %s5490_s18  ;;  %4446 = vrot.lane.b32.xlu1 %v6057_v4, %s5490_s18  ;;  %8400 = vst [vmem:[#allocation13_spill] sm:$0xff] %v6608_v17  ;;  %8401 = vst [vmem:[#allocation12_spill] sm:$0xff] %v6611_v36  ;;  %v6629_v9 = vrot.slane %v1884_v57, %v5672_v38 }
 0x2a0   : > { %v6584_v3 = vrot.slane %v2684_v45, %v5672_v38  ;;  %v6587_v20 = vrot.slane %v1932_v53, %v5672_v38  ;;  %v3709_v45 = vcombine.high %v8350_v54, %v8360_v19  ;;  %v6602_v53 = vrot.slane %v2652_v23, %v5672_v38 }
 0x2a1   : > { %v6544_v30 = vpop.permute.xlu0 %3064  ;;  %v6564_v29 = vpop.permute.xlu1 %2590  ;;  %v6626_v23 = vrot.slane %v2636_v52, %v5672_v38  ;;  %8403 = vst [vmem:[#allocation32_spill] sm:$0xff] %v6629_v9  ;;  %v1948_v41 = vcombine.low %v6629_v9, %v6605_v22  ;;  %v3790_v14 = vcombine.low %v6572_v7, %v6575_v32  ;;  %v3571_v9 = vrot.slane %v3557_v26, %v5672_v38 }
 0x2a2   : > { %8396 = vst [vmem:[#allocation8_spill] sm:$0xff] %v6584_v3  ;;  %8397 = vst [vmem:[#allocation11_spill] sm:$0xff] %v6587_v20  ;;  %v2732_v18 = vcombine.low %v6608_v17, %v6584_v3  ;;  %v3723_v52 = vrot.slane %v3709_v45, %v5672_v38  ;;  %v8414_v3 = vld [vmem:[#allocation49_spill] sm:$0xff] }
 0x2a3   : > { %4448 = vrot.lane.b32.xlu0 %v6015_v0, %s5490_s18  ;;  %4450 = vrot.lane.b32.xlu1 %v8350_v54, %s5490_s18  ;;  %8398 = vst [vmem:[#allocation31_spill] sm:$0xff] %v6602_v53  ;;  %v3541_v0 = vcombine.high %v6013_v1, %v5997_v12  ;;  %v3693_v54 = vcombine.high %v6057_v4, %v8356_v33  ;;  %8402 = vst [vmem:[#allocation28_spill] sm:$0xff] %v6626_v23 }
 0x2a4   : > { %v1980_v12 = vcombine.low %v6611_v36, %v6587_v20  ;;  %v3654_v4 = vcombine.low %v6554_v15, %v6569_v31  ;;  %v3587_v1 = vrot.slane %v3573_v56, %v5672_v38  ;;  %v2700_v57 = vcombine.low %v6626_v23, %v6602_v53 }
 0x2a5   : > { %v6591_v43 = vpop.permute.xlu0 %3068  ;;  %v6613_v55 = vpop.permute.xlu1 %2594  ;;  %v3655_v56 = vcombine.high %v6554_v15, %v6569_v31  ;;  %v6665_v22 = vrot.slane %v2732_v18, %v5684_v51  ;;  %v3707_v15 = vrot.slane %v3693_v54, %v5672_v38  ;;  %v6685_v18 = vrot.slane %v1948_v41, %v5684_v51 }
 0x2a6   : > { %v6668_v17 = vrot.slane %v1980_v12, %v5684_v51  ;;  %v3636_v45 = vcombine.low %v3571_v9, %v3587_v1  ;;  %v6682_v26 = vrot.slane %v2700_v57, %v5684_v51  ;;  %v3637_v54 = vcombine.high %v3571_v9, %v3587_v1  ;;  %v8409_v1 = vld [vmem:[#allocation51_spill] sm:$0xff] }
 0x2a7   : > { %4452 = vrot.lane.b32.xlu0 %v8355_v39, %s5490_s18  ;;  %4454 = vrot.lane.b32.xlu1 %v8356_v33, %s5490_s18  ;;  %v3661_v39 = vcombine.high %v8404_v60, %v5995_v48  ;;  %v3791_v48 = vcombine.high %v6572_v7, %v6575_v32  ;;  %v3555_v60 = vrot.slane %v3541_v0, %v5672_v38 }
 0x2a8   : > { %8405 = vst [vmem:[#allocation33_spill] sm:$0xff] %v6665_v22  ;;  %8406 = vst [vmem:[#allocation36_spill] sm:$0xff] %v6668_v17  ;;  %v6677_v7 = vrot.slane %v2377_v5, %v5684_v51  ;;  %v3539_v32 = vrot.slane %v3525_v63, %v5672_v38  ;;  %v2428_v5 = vcombine.low %v6549_v44, %v6640_v28  ;;  %v8425_v17 = vld [vmem:[#allocation19_spill] sm:$0xff] }
 0x2a9   : > { %v6637_v35 = vpop.permute.xlu0 %3072  ;;  %v6651_v33 = vpop.permute.xlu1 %2598  ;;  %v3675_v0 = vrot.slane %v3661_v39, %v5672_v38  ;;  %8407 = vst [vmem:[#allocation30_spill] sm:$0xff] %v6682_v26  ;;  %8408 = vst [vmem:[#allocation34_spill] sm:$0xff] %v6685_v18  ;;  %v2423_v63 = vrot.slane %v2409_v59, %v5684_v51  ;;  %v3773_v39 = vcombine.high %v3707_v15, %v3723_v52  ;;  %v8420_v26 = vld [vmem:[#allocation46_spill] sm:$0xff] }
 0x2aa   : > { %v3604_v12 = vcombine.low %v3539_v32, %v3555_v60  ;;  %v3605_v41 = vcombine.high %v3539_v32, %v3555_v60  ;;  %v6704_v36 = vpack.i.bf16 %v3790_v14, %v3654_v4  ;;  %v3644_v59 = vrot.slane %v3636_v45, %v5684_v51  ;;  %v8416_v45 = vld [vmem:[#allocation52_spill] sm:$0xff] }
 0x2ab   : > { %4456 = vrot.lane.b32.xlu0 %v8359_v58, %s5490_s18  ;;  %4458 = vrot.lane.b32.xlu1 %v8360_v19, %s5490_s18  ;;  %v3691_v58 = vrot.slane %v3677_v49, %v5672_v38  ;;  %v3772_v49 = vcombine.low %v3707_v15, %v3723_v52  ;;  %v6711_v60 = vpack.i.bf16 %v3791_v48, %v3655_v56  ;;  %v8418_v56 = vld [vmem:[#allocation7_spill] sm:$0xff]  ;;  %s5007_s18 = sshll.u32 %s5554_s28, 7 }
 0x2ac   : > { %v3651_v9 = vrot.slane %v3637_v54, %v5684_v51  ;;  %v2430_v4 = vcombine.low %v6677_v7, %v2423_v63  ;;  %v3612_v14 = vrot.slane %v3604_v12, %v5684_v51 }
 0x2ad   : > { %v6674_v31 = vpop.permute.xlu0 %3076  ;;  %v6687_v19 = vpop.permute.xlu1 %2602  ;;  %v3740_v57 = vcombine.low %v3675_v0, %v3691_v58  ;;  %v3741_v52 = vcombine.high %v3675_v0, %v3691_v58  ;;  %8413 = vst [vmem:[#allocation26_spill] sm:$0xff] %v6711_v60  ;;  %v3780_v32 = vrot.slane %v3772_v49, %v5684_v51  ;;  %v3787_v58 = vrot.slane %v3773_v39, %v5684_v51 }
 0x2ae   : > { %v2431_v0 = vcombine.high %v6677_v7, %v2423_v63  ;;  %v3656_v54 = vcombine.low %v3612_v14, %v3644_v59  ;;  %v3657_v12 = vcombine.high %v3612_v14, %v3644_v59  ;;  %v8421_v14 = vld [vmem:[#allocation59_spill] sm:$0xff] }
 0x2af   : > { %5063 = vrot.lane.b32.xlu0 %v6463_v47, %s5483_s14  ;;  %5068 = vrot.lane.b32.xlu1 %v6454_v50, %s5485_s16  ;;  %v8410_v47 = vld [vmem:[#allocation47_spill] sm:$0xff]  ;;  %v2429_v50 = vcombine.high %v6549_v44, %v6640_v28  ;;  %v8417_v44 = vld [vmem:[#allocation48_spill] sm:$0xff]  ;;  %v3748_v48 = vrot.slane %v3740_v57, %v5684_v51  ;;  %v3755_v39 = vrot.slane %v3741_v52, %v5684_v51 }
 0x2b0   : > { %v1765_v23 = vcombine.high %v8410_v47, %v8409_v1  ;;  %v8415_v1 = vld [vmem:[#allocation45_spill] sm:$0xff]  ;;  %v1239_v28 = vcombine.high %v8417_v44, %v8416_v45  ;;  %v8422_v52 = vld [vmem:[#allocation55_spill] sm:$0xff] }
 0x2b1   : > { %v6702_v53 = vpop.permute.xlu0 %3080  ;;  %v6707_v15 = vpop.permute.xlu1 %2606  ;;  %v1749_v47 = vcombine.high %v8415_v1, %v8414_v3  ;;  %v3619_v3 = vrot.slane %v3605_v41, %v5684_v51  ;;  %v8419_v1 = vld [vmem:[#allocation50_spill] sm:$0xff]  ;;  %v3794_v63 = vcombine.low %v3755_v39, %v3787_v58  ;;  %v3795_v41 = vcombine.high %v3755_v39, %v3787_v58 }
 0x2b2   : > { %8411 = vst [vmem:[#allocation16_spill] sm:$0xff] %v6702_v53  ;;  %8412 = vst [vmem:[#allocation17_spill] sm:$0xff] %v6707_v15  ;;  %v1223_v45 = vcombine.high %v8420_v26, %v8419_v1  ;;  %v1253_v59 = vrot.slane %v1239_v28, %v5672_v38  ;;  %v1797_v18 = vcombine.high %v8422_v52, %v8421_v14  ;;  %v8423_v26 = vld [vmem:[#allocation10_spill] sm:$0xff]  ;;  %v8431_v14 = vld [vmem:[#allocation23_spill] sm:$0xff] }
 0x2b3   : > { %5073 = vrot.lane.b32.xlu0 %v6468_v11, %s5481_s9  ;;  %5078 = vrot.lane.b32.xlu1 %v8418_v56, %s5484_s15  ;;  %v1779_v11 = vrot.slane %v1765_v23, %v5672_v38  ;;  %v3792_v56 = vcombine.low %v3748_v48, %v3780_v32  ;;  %v3658_v22 = vcombine.low %v3619_v3, %v3651_v9  ;;  %v8424_v1 = vld [vmem:[#allocation18_spill] sm:$0xff]  ;;  %v8432_v52 = vld [vmem:[#allocation27_spill] sm:$0xff] }
 0x2b4   : > { %v3659_v57 = vcombine.high %v3619_v3, %v3651_v9  ;;  %v1763_v7 = vrot.slane %v1749_v47, %v5672_v38  ;;  %v3793_v23 = vcombine.high %v3748_v48, %v3780_v32  ;;  %v8426_v20 = vcombine.low %v8424_v1, %v8425_v17  ;;  %v8429_v32 = vld [vmem:[#allocation65_spill] sm:$0xff] }
 0x2b5   : > { %v6730_v49 = vpop.permute.xlu0 %3084  ;;  %v6735_v44 = vpop.permute.xlu1 %2610  ;;  %v8427_v47 = vcombine.high %v8424_v1, %v8425_v17  ;;  %v8433_v60 = vcombine.low %v8431_v14, %v8432_v52  ;;  %v1237_v27 = vrot.slane %v1223_v45, %v5672_v38  ;;  %v8437_v17 = vld [vmem:[#allocation60_spill] sm:$0xff]  ;;  %v6780_v45 = vpack.i.bf16 %v3794_v63, %v3658_v22 }
 0x2b6   : > { %v5112_v9 = vpack.i.bf16 %v2428_v5, %v8426_v20  ;;  %v1828_v48 = vcombine.low %v1763_v7, %v1779_v11  ;;  %v1829_v28 = vcombine.high %v1763_v7, %v1779_v11  ;;  %v8435_v20 = vld [vmem:[#allocation57_spill] sm:$0xff]  ;;  %v8440_v11 = vcombine.high %v8431_v14, %v8432_v52  ;;  %v8447_v52 = vld [vmem:[#allocation63_spill] sm:$0xff] }
 0x2b7   : > { %5083 = vrot.lane.b32.xlu0 %v6500_v13, %s5479_s29  ;;  %5088 = vrot.lane.b32.xlu1 %v8423_v26, %s5482_s13  ;;  %v6751_v3 = vpack.i.bf16 %v2429_v50, %v8427_v47  ;;  %v8428_v13 = vld [vmem:[#allocation61_spill] sm:$0xff]  ;;  %v6760_v26 = vpack.i.bf16 %v2430_v4, %v8433_v60  ;;  %v8438_v50 = vld [vmem:[#allocation56_spill] sm:$0xff]  ;;  %v6776_v60 = vpack.i.bf16 %v3792_v56, %v3656_v54 }
 0x2b8   : > { %v1813_v58 = vcombine.high %v8429_v32, %v8428_v13  ;;  %v8436_v5 = vld [vmem:[#allocation53_spill] sm:$0xff]  ;;  %v1271_v1 = vcombine.high %v8438_v50, %v8437_v17  ;;  %v6772_v7 = vpack.i.bf16 %v2431_v0, %v8440_v11  ;;  %v6778_v4 = vpack.i.bf16 %v3793_v23, %v3657_v12  ;;  %v8441_v32 = vld [vmem:[#allocation62_spill] sm:$0xff] }
 0x2b9   : > { %v6755_v39 = vpop.permute.xlu0 %3088  ;;  %8434 = vst [vmem:[#allocation47_spill] sm:$0xff] %v6760_v26  ;;  %v1781_v61 = vcombine.high %v8436_v5, %v8435_v20  ;;  %v6767_v47 = vpop.permute.xlu1 %2614  ;;  %v6782_v13 = vpack.i.bf16 %v3795_v41, %v3659_v57  ;;  %v8442_v20 = vld [vmem:[#allocation66_spill] sm:$0xff]  ;;  %v1302_v17 = vcombine.low %v1237_v27, %v1253_v59  ;;  %v1811_v0 = vrot.slane %v1797_v18, %v5672_v38 }
 0x2ba   : > { %8430 = vst [vmem:[#allocation51_spill] sm:$0xff] %v6755_v39  ;;  %8439 = vst [vmem:[#allocation49_spill] sm:$0xff] %v6767_v47  ;;  %v1287_v5 = vcombine.high %v8442_v20, %v8441_v32  ;;  %v8443_v50 = vld [vmem:[#allocation58_spill] sm:$0xff]  ;;  %v6795_v22 = vrot.slane %v1828_v48, %v5684_v51  ;;  %v6798_v54 = vrot.slane %v1829_v28, %v5684_v51  ;;  %v8446_v28 = vld [vmem:[#allocation64_spill] sm:$0xff] }
 0x2bb   : > { %5093 = vrot.lane.b32.xlu0 %v6510_v42, %s5480_s8  ;;  %v8444_v26 = vld [vmem:[#allocation54_spill] sm:$0xff]  ;;  %5098 = vrot.lane.b32.xlu1 %v6515_v8, %s5483_s14  ;;  %v6792_v42 = vrot.slane %v1813_v58, %v5684_v51  ;;  %v1303_v12 = vcombine.high %v1237_v27, %v1253_v59  ;;  %v1795_v57 = vrot.slane %v1781_v61, %v5672_v38 }
 0x2bc   : > { %v1255_v14 = vcombine.high %v8444_v26, %v8443_v50  ;;  %v1285_v23 = vrot.slane %v1271_v1, %v5672_v38  ;;  %v3128_v18 = vcombine.low %v6591_v43, %v6674_v31  ;;  %v2788_v41 = vcombine.low %v6613_v55, %v6687_v19 }
 0x2bd   : > { %v6800_v56 = vpop.permute.xlu0 %3092  ;;  %v6808_v63 = vpop.permute.xlu1 %2618  ;;  %v3144_v27 = vcombine.low %v6702_v53, %v6755_v39  ;;  %v2804_v59 = vcombine.low %v6707_v15, %v6767_v47  ;;  %v6821_v58 = vrot.slane %v1287_v5, %v5684_v51  ;;  %v1845_v26 = vcombine.high %v8447_v52, %v8446_v28  ;;  %v8451_v28 = vld [vmem:[#allocation67_spill] sm:$0xff] }
 0x2be   : > { %v3160_v8 = vcombine.low %v6730_v49, %v6800_v56  ;;  %v2820_v61 = vcombine.low %v6735_v44, %v6808_v63  ;;  %v1269_v48 = vrot.slane %v1255_v14, %v5672_v38  ;;  %v1860_v1 = vcombine.low %v1795_v57, %v1811_v0  ;;  %v8450_v14 = vld [vmem:[#allocation68_spill] sm:$0xff] }
 0x2bf   : > { %5103 = vrot.lane.b32.xlu0 %v6537_v16, %s5485_s16  ;;  %8445 = vst [vmem:[#allocation45_spill] sm:$0xff] %v6821_v58  ;;  %5108 = vrot.lane.b32.xlu1 %v6542_v24, %s5481_s9  ;;  %v3112_v11 = vcombine.low %v6544_v30, %v6637_v35  ;;  %v2772_v32 = vcombine.low %v6564_v29, %v6651_v33 }
 0x2c0   : > { %v6833_v16 = vrot.slane %v3160_v8, %v5672_v38  ;;  %v6836_v20 = vrot.slane %v2820_v61, %v5672_v38  ;;  %v1861_v50 = vcombine.high %v1795_v57, %v1811_v0  ;;  %v1319_v52 = vcombine.high %v8451_v28, %v8450_v14  ;;  %v8460_v14 = vld [vmem:[#allocation24_spill] sm:$0xff] }
 0x2c1   : > { %v6838_v5 = vpop.permute.xlu0 %1176  ;;  %v1334_v15 = vcombine.low %v1269_v48, %v1285_v23  ;;  %v1335_v24 = vcombine.high %v1269_v48, %v1285_v23  ;;  %v6842_v47 = vpop.permute.xlu1 %3066  ;;  %v6845_v53 = vrot.slane %v3128_v18, %v5672_v38  ;;  %v6848_v39 = vrot.slane %v2788_v41, %v5672_v38 }
 0x2c2   : > { %8448 = vst [vmem:[#allocation52_spill] sm:$0xff] %v6833_v16  ;;  %8449 = vst [vmem:[#allocation48_spill] sm:$0xff] %v6836_v20  ;;  %v6851_v8 = vrot.slane %v3144_v27, %v5672_v38  ;;  %v6854_v61 = vrot.slane %v2804_v59, %v5672_v38  ;;  %v6859_v0 = vrot.slane %v1302_v17, %v5684_v51 }
 0x2c3   : > { %8452 = vst [vmem:[#allocation7_spill] sm:$0xff] %v6845_v53  ;;  %8453 = vst [vmem:[#allocation50_spill] sm:$0xff] %v6848_v39  ;;  %5133 = vrot.lane.b32.xlu0 %v6546_v10, %s5483_s14  ;;  %v6862_v57 = vrot.slane %v1303_v12, %v5684_v51  ;;  %v6865_v23 = vrot.slane %v1845_v26, %v5684_v51  ;;  %v6868_v18 = vrot.slane %v1860_v1, %v5684_v51 }
 0x2c4   : > { %8454 = vst [vmem:[#allocation46_spill] sm:$0xff] %v6851_v8  ;;  %8455 = vst [vmem:[#allocation59_spill] sm:$0xff] %v6854_v61  ;;  %5113 = vrot.lane.b32.xlu1 %v5112_v9, %s5484_s15  ;;  %v6872_v41 = vrot.slane %v3112_v11, %v5672_v38  ;;  %v6875_v27 = vrot.slane %v2772_v32, %v5672_v38  ;;  %v3208_v10 = vcombine.low %v6851_v8, %v6833_v16 }
 0x2c5   : > { %v2868_v17 = vcombine.low %v6854_v61, %v6836_v20  ;;  %v6881_v12 = vpop.permute.xlu0 %1180  ;;  %v6884_v59 = vrot.slane %v1861_v50, %v5684_v51  ;;  %v6887_v48 = vrot.slane %v1319_v52, %v5684_v51  ;;  %v6890_v9 = vrot.slane %v1334_v15, %v5684_v51  ;;  %v6894_v1 = vpop.permute.xlu1 %3070  ;;  %v8461_v15 = vld [vmem:[#allocation72_spill] sm:$0xff]  ;;  %v8462_v52 = vld [vmem:[#allocation21_spill] sm:$0xff] }
 0x2c6   : > { %8456 = vst [vmem:[#allocation55_spill] sm:$0xff] %v6872_v41  ;;  %8457 = vst [vmem:[#allocation10_spill] sm:$0xff] %v6875_v27  ;;  %v2685_v26 = vcombine.high %v6421_v25, %v6484_v6  ;;  %v6897_v11 = vrot.slane %v1335_v24, %v5684_v51  ;;  %v3176_v32 = vcombine.low %v6872_v41, %v6845_v53  ;;  %v8477_v53 = vld [vmem:[#allocation11_spill] sm:$0xff] }
 0x2c7   : > { %8458 = vst [vmem:[#allocation18_spill] sm:$0xff] %v6887_v48  ;;  %8459 = vst [vmem:[#allocation19_spill] sm:$0xff] %v6890_v9  ;;  %v2836_v50 = vcombine.low %v6875_v27, %v6848_v39  ;;  %5138 = vrot.lane.b32.xlu0 %v6704_v36, %s5485_s16  ;;  %v2653_v25 = vcombine.high %v6358_v37, %v6393_v34  ;;  %v2669_v6 = vcombine.high %v6408_v40, %v6441_v62  ;;  %v8465_v62 = vld [vmem:[#allocation22_spill] sm:$0xff]  ;;  %v8468_v39 = vld [vmem:[#allocation20_spill] sm:$0xff] }
 0x2c8   : > { %v1933_v24 = vcombine.high %v8462_v52, %v6495_v2  ;;  %5118 = vrot.lane.b32.xlu1 %v6751_v3, %s5479_s29  ;;  %v1901_v36 = vcombine.high %v6360_v46, %v6399_v21  ;;  %v6920_v28 = vrot.slane %v3208_v10, %v5684_v51  ;;  %v6923_v37 = vrot.slane %v2868_v17, %v5684_v51  ;;  %v8466_v2 = vld [vmem:[#allocation69_spill] sm:$0xff]  ;;  %v8470_v17 = vld [vmem:[#allocation70_spill] sm:$0xff] }
 0x2c9   : > { %v6925_v34 = vpop.permute.xlu0 %1184  ;;  %v2637_v3 = vcombine.high %v8466_v2, %v8465_v62  ;;  %v8467_v52 = vld [vmem:[#allocation29_spill] sm:$0xff]  ;;  %v2699_v61 = vrot.slane %v2685_v26, %v5672_v38  ;;  %v6934_v21 = vpop.permute.xlu1 %3074  ;;  %v6941_v8 = vrot.slane %v3176_v32, %v5684_v51  ;;  %v6944_v40 = vrot.slane %v2836_v50, %v5684_v51  ;;  %v8473_v62 = vld [vmem:[#allocation26_spill] sm:$0xff] }
 0x2ca   : > { %8463 = vst [vmem:[#allocation61_spill] sm:$0xff] %v6920_v28  ;;  %8464 = vst [vmem:[#allocation65_spill] sm:$0xff] %v6923_v37  ;;  %v1917_v27 = vcombine.high %v8468_v39, %v8467_v52  ;;  %v8469_v10 = vld [vmem:[#allocation25_spill] sm:$0xff]  ;;  %v2667_v26 = vrot.slane %v2653_v25, %v5672_v38  ;;  %v2683_v2 = vrot.slane %v2669_v6, %v5672_v38  ;;  %v8480_v25 = vld [vmem:[#allocation28_spill] sm:$0xff] }
 0x2cb   : > { %v1885_v20 = vcombine.high %v8470_v17, %v8469_v10  ;;  %8471 = vst [vmem:[#allocation23_spill] sm:$0xff] %v6941_v8  ;;  %8472 = vst [vmem:[#allocation27_spill] sm:$0xff] %v6944_v40  ;;  %5143 = vrot.lane.b32.xlu0 %v8473_v62, %s5481_s9  ;;  %v1947_v52 = vrot.slane %v1933_v24, %v5672_v38  ;;  %v8474_v10 = vld [vmem:[#allocation47_spill] sm:$0xff]  ;;  %v1915_v50 = vrot.slane %v1901_v36, %v5672_v38  ;;  %v8478_v62 = vld [vmem:[#allocation12_spill] sm:$0xff] }
 0x2cc   : > { %5123 = vrot.lane.b32.xlu1 %v8474_v10, %s5482_s13  ;;  %v2651_v24 = vrot.slane %v2637_v3, %v5672_v38  ;;  %v1931_v10 = vrot.slane %v1917_v27, %v5672_v38  ;;  %v2749_v39 = vcombine.high %v2683_v2, %v2699_v61  ;;  %v1981_v32 = vcombine.high %v8478_v62, %v8477_v53  ;;  %v8479_v3 = vld [vmem:[#allocation31_spill] sm:$0xff]  ;;  %v8481_v8 = vld [vmem:[#allocation8_spill] sm:$0xff]  ;;  %v8482_v36 = vld [vmem:[#allocation13_spill] sm:$0xff] }
 0x2cd   : > { %v6958_v16 = vpop.permute.xlu0 %1188  ;;  %v6968_v41 = vpop.permute.xlu1 %3078  ;;  %v1899_v46 = vrot.slane %v1885_v20, %v5672_v38  ;;  %v2701_v40 = vcombine.high %v8480_v25, %v8479_v3  ;;  %v2733_v28 = vcombine.high %v8482_v36, %v8481_v8  ;;  %v8483_v62 = vld [vmem:[#allocation35_spill] sm:$0xff]  ;;  %v2748_v9 = vcombine.low %v2683_v2, %v2699_v61 }
 0x2ce   : > { %v2717_v37 = vcombine.high %v2651_v24, %v2667_v26  ;;  %v1996_v20 = vcombine.low %v1931_v10, %v1947_v52  ;;  %v2716_v53 = vcombine.low %v2651_v24, %v2667_v26  ;;  %v1997_v6 = vcombine.high %v1931_v10, %v1947_v52 }
 0x2cf   : > { %5148 = vrot.lane.b32.xlu0 %v6776_v60, %s5484_s15  ;;  %v8484_v60 = vld [vmem:[#allocation32_spill] sm:$0xff]  ;;  %v1964_v48 = vcombine.low %v1899_v46, %v1915_v50  ;;  %v1965_v27 = vcombine.high %v1899_v46, %v1915_v50  ;;  %v6992_v25 = vrot.slane %v2749_v39, %v5684_v51  ;;  %v7008_v39 = vrot.slane %v2701_v40, %v5684_v51 }
 0x2d0   : > { %5128 = vrot.lane.b32.xlu1 %v6772_v7, %s5480_s8  ;;  %v1949_v17 = vcombine.high %v8484_v60, %v8483_v62  ;;  %v1995_v7 = vrot.slane %v1981_v32, %v5684_v51  ;;  %v7011_v2 = vrot.slane %v2717_v37, %v5684_v51  ;;  %v7014_v52 = vrot.slane %v2733_v28, %v5684_v51  ;;  %v8515_v62 = vld [vmem:[#allocation73_spill] sm:$0xff]  ;;  %v8516_v60 = vld [vmem:[#allocation71_spill] sm:$0xff] }
 0x2d1   : > { %v6989_v58 = vpop.permute.xlu0 %1192  ;;  %v6994_v3 = vpop.permute.xlu1 %3082  ;;  %8486 = vst [vmem:[#allocation53_spill] sm:$0xff] %v7008_v39  ;;  %v7022_v32 = vrot.slane %v2716_v53, %v5684_v51  ;;  %v7026_v40 = vrot.slane %v1964_v48, %v5684_v51  ;;  %v7029_v37 = vrot.slane %v1997_v6, %v5684_v51  ;;  %v7032_v28 = vrot.slane %v1965_v27, %v5684_v51 }
 0x2d2   : > { %8485 = vst [vmem:[#allocation57_spill] sm:$0xff] %v6994_v3  ;;  %8487 = vst [vmem:[#allocation60_spill] sm:$0xff] %v7014_v52  ;;  %v1963_v50 = vrot.slane %v1949_v17, %v5684_v51  ;;  %v7035_v10 = vrot.slane %v2748_v9, %v5684_v51  ;;  %v1374_v48 = vcombine.low %v6881_v12, %v6958_v16 }
 0x2d3   : > { %5153 = vrot.lane.b32.xlu0 %v6778_v4, %s5479_s29  ;;  %v7017_v4 = vrot.slane %v1996_v20, %v5684_v51  ;;  %v8489_v20 = vld [vmem:[#allocation34_spill] sm:$0xff]  ;;  %v1359_v61 = vcombine.high %v6838_v5, %v6925_v34  ;;  %v1375_v17 = vcombine.high %v6881_v12, %v6958_v16  ;;  %v3248_v9 = vcombine.low %v6842_v47, %v6934_v21 }
 0x2d4   : > { %5158 = vrot.lane.b32.xlu1 %v6780_v45, %s5482_s13  ;;  %v8488_v45 = vld [vmem:[#allocation36_spill] sm:$0xff]  ;;  %v2014_v6 = vcombine.low %v1963_v50, %v1995_v7  ;;  %v2015_v27 = vcombine.high %v1963_v50, %v1995_v7  ;;  %v3264_v7 = vcombine.low %v6894_v1, %v6968_v41  ;;  %v1382_v26 = vrot.slane %v1374_v48, %v5672_v38 }
 0x2d5   : > { %v1197_v24 = vpop.permute.xlu0 %1196  ;;  %v7037_v36 = vpop.permute.xlu1 %3086  ;;  %v2013_v53 = vcombine.high %v8489_v20, %v8488_v45  ;;  %v2016_v8 = vcombine.low %v7026_v40, %v7017_v4  ;;  %v8492_v45 = vcombine.high %v8461_v15, %v8460_v14  ;;  %v8495_v16 = vcombine.high %v6792_v42, %v6865_v23 }
 0x2d6   : > { %v8497_v48 = vcombine.low %v6795_v22, %v6868_v18 }
 0x2d7   : > { %5163 = vrot.lane.b32.xlu0 %v6782_v13, %s5480_s8  ;;  %v1358_v13 = vcombine.low %v6838_v5, %v6925_v34  ;;  %v7074_v20 = vpack.i.bf16 %v2013_v53, %v8492_v45  ;;  %v8493_v5 = vcombine.low %v6792_v42, %v6865_v23  ;;  %v7089_v12 = vpack.i.bf16 %v2015_v27, %v8495_v16 }
 0x2d8   : > { %v7098_v14 = vpack.i.bf16 %v2016_v8, %v8497_v48  ;;  %v7104_v42 = vrot.slane %v3264_v7, %v5672_v38  ;;  %v1373_v16 = vrot.slane %v1359_v61, %v5672_v38  ;;  %v7113_v48 = vrot.slane %v3248_v9, %v5672_v38 }
 0x2d9   : > { %v1201_v50 = vpop.permute.xlu0 %1200  ;;  %v7069_v46 = vpop.permute.xlu1 %3090  ;;  %v7084_v34 = vpack.i.bf16 %v2014_v6, %v8493_v5  ;;  %8496 = vst [vmem:[#allocation62_spill] sm:$0xff] %v7089_v12  ;;  %v1366_v5 = vrot.slane %v1358_v13, %v5672_v38  ;;  %v8517_v12 = vcombine.high %v8515_v62, %v8516_v60 }
 0x2da   : > { %v1390_v53 = vcombine.low %v6989_v58, %v1201_v50  ;;  %v1391_v52 = vcombine.high %v6989_v58, %v1201_v50  ;;  %8498 = vst [vmem:[#allocation66_spill] sm:$0xff] %v7098_v14  ;;  %8499 = vst [vmem:[#allocation58_spill] sm:$0xff] %v7104_v42  ;;  %v3280_v23 = vcombine.low %v6994_v3, %v7069_v46 }
 0x2db   : > { %8494 = vst [vmem:[#allocation56_spill] sm:$0xff] %v7084_v34  ;;  %v1389_v58 = vrot.slane %v1375_v17, %v5672_v38  ;;  %8500 = vst [vmem:[#allocation54_spill] sm:$0xff] %v7113_v48  ;;  %v1422_v6 = vcombine.low %v1366_v5, %v1382_v26  ;;  %v1423_v13 = vcombine.high %v1366_v5, %v1382_v26 }
 0x2dc   : > { %v1398_v15 = vrot.slane %v1390_v53, %v5672_v38  ;;  %v1405_v14 = vrot.slane %v1391_v52, %v5672_v38  ;;  %v3312_v9 = vcombine.low %v7113_v48, %v7104_v42  ;;  %v3161_v42 = vcombine.high %v6730_v49, %v6800_v56  ;;  %v8508_v56 = vld [vmem:[#allocation51_spill] sm:$0xff] }
 0x2dd   : > { %v1205_v27 = vpop.permute.xlu0 %1204  ;;  %v7110_v8 = vpop.permute.xlu1 %3094  ;;  %v1438_v53 = vcombine.low %v1373_v16, %v1389_v58 }
 0x2de   : > { %v1406_v50 = vcombine.low %v1197_v24, %v1205_v27  ;;  %v1407_v45 = vcombine.high %v1197_v24, %v1205_v27  ;;  %v3296_v7 = vcombine.low %v7037_v36, %v7110_v8  ;;  %v3129_v24 = vcombine.high %v6591_v43, %v6674_v31 }
 0x2df   : > { %v7126_v27 = vrot.slane %v3280_v23, %v5672_v38  ;;  %v2789_v43 = vcombine.high %v6613_v55, %v6687_v19  ;;  %v7138_v31 = vrot.slane %v1422_v6, %v5684_v51  ;;  %v2821_v55 = vcombine.high %v6735_v44, %v6808_v63  ;;  %v8510_v63 = vld [vmem:[#allocation49_spill] sm:$0xff] }
 0x2e0   : > { %v1414_v61 = vrot.slane %v1406_v50, %v5672_v38  ;;  %v1421_v17 = vrot.slane %v1407_v45, %v5672_v38  ;;  %v7129_v26 = vrot.slane %v3296_v7, %v5672_v38  ;;  %v1437_v7 = vrot.slane %v1423_v13, %v5684_v51 }
 0x2e1   : > { %8501 = vst [vmem:[#allocation64_spill] sm:$0xff] %v7126_v27  ;;  %v7131_v5 = vpop.permute.xlu0 %3952  ;;  %v7133_v39 = vpop.permute.xlu1 %3954  ;;  %v7153_v19 = vrot.slane %v3312_v9, %v5684_v51  ;;  %v1439_v13 = vcombine.high %v1373_v16, %v1389_v58  ;;  %v8511_v9 = vld [vmem:[#allocation17_spill] sm:$0xff] }
 0x2e2   : > { %8502 = vst [vmem:[#allocation63_spill] sm:$0xff] %v7129_v26  ;;  %8503 = vst [vmem:[#allocation68_spill] sm:$0xff] %v7131_v5  ;;  %v1454_v52 = vcombine.low %v1398_v15, %v1414_v61  ;;  %v1455_v34 = vcombine.high %v1398_v15, %v1414_v61  ;;  %v1470_v50 = vcombine.low %v1405_v14, %v1421_v17  ;;  %v8512_v58 = vld [vmem:[#allocation45_spill] sm:$0xff] }
 0x2e3   : > { %8504 = vst [vmem:[#allocation67_spill] sm:$0xff] %v7133_v39  ;;  %v1471_v45 = vcombine.high %v1405_v14, %v1421_v17  ;;  %v3344_v23 = vcombine.low %v7126_v27, %v7129_v26  ;;  %v1446_v17 = vrot.slane %v1438_v53, %v5684_v51  ;;  %v2805_v27 = vcombine.high %v8511_v9, %v8510_v63  ;;  %v8513_v53 = vld [vmem:[#allocation18_spill] sm:$0xff] }
 0x2e4   : > { %v7144_v48 = vrot.slane %v1454_v52, %v5684_v51  ;;  %v1469_v15 = vrot.slane %v1455_v34, %v5684_v51  ;;  %v1478_v61 = vrot.slane %v1470_v50, %v5684_v51  ;;  %v8509_v50 = vld [vmem:[#allocation16_spill] sm:$0xff]  ;;  %v8514_v26 = vcombine.low %v8512_v58, %v8513_v53 }
 0x2e5   : > { %v7156_v14 = vrot.slane %v3344_v23, %v5684_v51  ;;  %v7158_v6 = vpop.permute.xlu0 %3956  ;;  %v7161_v34 = vpop.permute.xlu1 %3958  ;;  %v3145_v44 = vcombine.high %v8509_v50, %v8508_v56  ;;  %v7170_v23 = vrot.slane %v1471_v45, %v5684_v51  ;;  %v2835_v56 = vrot.slane %v2821_v55, %v5672_v38 }
 0x2e6   : > { %8505 = vst [vmem:[#allocation21_spill] sm:$0xff] %v7144_v48  ;;  %8507 = vst [vmem:[#allocation69_spill] sm:$0xff] %v7161_v34  ;;  %v1488_v52 = vcombine.low %v1437_v7, %v1469_v15  ;;  %v1487_v49 = vcombine.high %v7138_v31, %v7144_v48  ;;  %v1490_v34 = vcombine.low %v1446_v17, %v1478_v61 }
 0x2e7   : > { %8506 = vst [vmem:[#allocation22_spill] sm:$0xff] %v7156_v14  ;;  %v1489_v3 = vcombine.high %v1437_v7, %v1469_v15  ;;  %v8518_v45 = vcombine.high %v6795_v22, %v6868_v18  ;;  %v8519_v63 = vcombine.high %v7026_v40, %v7017_v4  ;;  %v8522_v7 = vcombine.high %v6798_v54, %v6884_v59 }
 0x2e8   : > { %v5172_v39 = vpack.i.bf16 %v1488_v52, %v8514_v26  ;;  %v5167_v5 = vpack.i.bf16 %v1487_v49, %v8517_v12  ;;  %v8520_v26 = vcombine.low %v6798_v54, %v6884_v59  ;;  %v8521_v12 = vcombine.low %v7032_v28, %v7029_v37 }
 0x2e9   : > { %v7181_v50 = vpop.permute.xlu0 %3960  ;;  %v7189_v9 = vpack.i.bf16 %v8519_v63, %v8518_v45  ;;  %v8523_v15 = vcombine.high %v7032_v28, %v7029_v37  ;;  %v3143_v18 = vrot.slane %v3129_v24, %v5672_v38  ;;  %v3175_v4 = vrot.slane %v3161_v42, %v5672_v38  ;;  %v7210_v55 = vpop.permute.xlu1 %3962  ;;  %v8529_v63 = vld [vmem:[#allocation7_spill] sm:$0xff] }
 0x2ea   : > { %v7197_v52 = vpack.i.bf16 %v8521_v12, %v8520_v26  ;;  %v1453_v40 = vrot.slane %v1439_v13, %v5684_v51  ;;  %5173 = vrot.lane.b32.xlu0 %v5172_v39, %s5485_s16  ;;  %5168 = vrot.lane.b32.xlu1 %v5167_v5, %s5483_s14  ;;  %v8524_v54 = vcombine.high %v6544_v30, %v6637_v35  ;;  %v8526_v39 = vld [vmem:[#allocation19_spill] sm:$0xff]  ;;  %v8532_v12 = vld [vmem:[#allocation46_spill] sm:$0xff] }
 0x2eb   : > { %v7205_v22 = vpack.i.bf16 %v8523_v15, %v8522_v7  ;;  %v8525_v37 = vcombine.high %v6564_v29, %v6651_v33  ;;  %v2803_v42 = vrot.slane %v2789_v43, %v5672_v38  ;;  %v2819_v24 = vrot.slane %v2805_v27, %v5672_v38  ;;  %v8530_v26 = vld [vmem:[#allocation55_spill] sm:$0xff]  ;;  %v8531_v33 = vld [vmem:[#allocation52_spill] sm:$0xff] }
 0x2ec   : > { %v3127_v59 = vrot.slane %v8524_v54, %v5672_v38  ;;  %v3159_v13 = vrot.slane %v3145_v44, %v5672_v38  ;;  %v8527_v49 = vcombine.low %v6859_v0, %v8526_v39  ;;  %v8528_v45 = vcombine.high %v8512_v58, %v8513_v53  ;;  %v8535_v58 = vld [vmem:[#allocation50_spill] sm:$0xff] }
 0x2ed   : > { %v2787_v28 = vrot.slane %v8525_v37, %v5672_v38  ;;  %v1492_v35 = vcombine.low %v1453_v40, %v7170_v23  ;;  %v3177_v29 = vcombine.high %v8530_v26, %v8529_v63  ;;  %v3209_v43 = vcombine.high %v8532_v12, %v8531_v33  ;;  %v7236_v27 = vpop.permute.xlu0 %3964  ;;  %v8533_v37 = vld [vmem:[#allocation48_spill] sm:$0xff]  ;;  %v7240_v16 = vpop.permute.xlu1 %3966  ;;  %v8536_v53 = vld [vmem:[#allocation10_spill] sm:$0xff] }
 0x2ee   : > { %v5182_v5 = vpack.i.bf16 %v1490_v34, %v8527_v49  ;;  %v5177_v30 = vpack.i.bf16 %v1489_v3, %v8528_v45  ;;  %v2885_v7 = vcombine.high %v2819_v24, %v2835_v56  ;;  %v1491_v44 = vcombine.high %v1446_v17, %v1478_v61  ;;  %v8534_v34 = vld [vmem:[#allocation59_spill] sm:$0xff] }
 0x2ef   : > { %v3192_v15 = vcombine.low %v3127_v59, %v3143_v18  ;;  %v3224_v54 = vcombine.low %v3159_v13, %v3175_v4  ;;  %v2869_v49 = vcombine.high %v8534_v34, %v8533_v37  ;;  %v3193_v3 = vcombine.high %v3127_v59, %v3143_v18  ;;  %v8544_v37 = vld [vmem:[#allocation57_spill] sm:$0xff] }
 0x2f0   : > { %5183 = vrot.lane.b32.xlu0 %v5182_v5, %s5484_s15  ;;  %5178 = vrot.lane.b32.xlu1 %v5177_v30, %s5481_s9  ;;  %v2837_v45 = vcombine.high %v8536_v53, %v8535_v58  ;;  %v2853_v63 = vcombine.high %v2787_v28, %v2803_v42  ;;  %v2884_v26 = vcombine.low %v2819_v24, %v2835_v56  ;;  %v8540_v58 = vld [vmem:[#allocation61_spill] sm:$0xff]  ;;  %v8541_v53 = vld [vmem:[#allocation23_spill] sm:$0xff] }
 0x2f1   : > { %v2852_v33 = vcombine.low %v2787_v28, %v2803_v42  ;;  %v3225_v12 = vcombine.high %v3159_v13, %v3175_v4  ;;  %v8537_v61 = vcombine.low %v6862_v57, %v6897_v11  ;;  %v7252_v34 = vrot.slane %v3209_v43, %v5684_v51  ;;  %v7257_v18 = vpop.permute.xlu0 %3968  ;;  %v7267_v24 = vpop.permute.xlu1 %3970 }
 0x2f2   : > { %v7255_v5 = vrot.slane %v2885_v7, %v5684_v51  ;;  %v8538_v56 = vcombine.high %v6859_v0, %v8526_v39  ;;  %v1493_v4 = vcombine.high %v1453_v40, %v7170_v23  ;;  %v7264_v28 = vrot.slane %v3224_v54, %v5684_v51 }
 0x2f3   : > { %v5192_v17 = vpack.i.bf16 %v1492_v35, %v8537_v61  ;;  %v2883_v42 = vrot.slane %v2869_v49, %v5684_v51  ;;  %v2769_v13 = vcombine.high %v7022_v32, %v7035_v10  ;;  %v7275_v0 = vrot.slane %v3177_v29, %v5684_v51 }
 0x2f4   : > { %v5187_v59 = vpack.i.bf16 %v1491_v44, %v8538_v56  ;;  %v7278_v23 = vrot.slane %v3192_v15, %v5684_v51  ;;  %v7281_v40 = vrot.slane %v2853_v63, %v5684_v51  ;;  %v2892_v39 = vrot.slane %v2884_v26, %v5684_v51 }
 0x2f5   : > { %5193 = vrot.lane.b32.xlu0 %v5192_v17, %s5482_s13  ;;  %v7286_v35 = vrot.slane %v3193_v3, %v5684_v51  ;;  %v2851_v43 = vrot.slane %v2837_v45, %v5684_v51  ;;  %v2860_v7 = vrot.slane %v2852_v33, %v5684_v51  ;;  %v7291_v29 = vrot.slane %v3225_v12, %v5684_v51  ;;  %v7293_v44 = vpop.permute.xlu0 %3972  ;;  %v7306_v26 = vpop.permute.xlu1 %3974  ;;  %v8542_v33 = vld [vmem:[#allocation65_spill] sm:$0xff] }
 0x2f6   : > { %5188 = vrot.lane.b32.xlu1 %v5187_v59, %s5479_s29  ;;  %v8539_v15 = vcombine.high %v6862_v57, %v6897_v11  ;;  %v2906_v49 = vcombine.low %v7281_v40, %v7255_v5  ;;  %v3265_v63 = vcombine.high %v6894_v1, %v6968_v41  ;;  %v8543_v57 = vld [vmem:[#allocation27_spill] sm:$0xff]  ;;  %v3297_v17 = vcombine.high %v7037_v36, %v7110_v8  ;;  %v8545_v8 = vld [vmem:[#allocation69_spill] sm:$0xff] }
 0x2f7   : > { %v2901_v11 = vcombine.high %v8543_v57, %v8542_v33  ;;  %v2902_v12 = vcombine.low %v2851_v43, %v2883_v42  ;;  %v2903_v56 = vcombine.high %v2851_v43, %v2883_v42  ;;  %v2904_v59 = vcombine.low %v2860_v7, %v2892_v39  ;;  %v8556_v57 = vld [vmem:[#allocation56_spill] sm:$0xff] }
 0x2f8   : > { %v5197_v54 = vpack.i.bf16 %v1493_v4, %v8539_v15  ;;  %v3249_v1 = vcombine.high %v6842_v47, %v6934_v21  ;;  %v2905_v4 = vcombine.high %v2860_v7, %v2892_v39  ;;  %v2907_v15 = vcombine.high %v7281_v40, %v7255_v5  ;;  %v8547_v5 = vld [vmem:[#allocation68_spill] sm:$0xff]  ;;  %v8549_v39 = vld [vmem:[#allocation30_spill] sm:$0xff]  ;;  %v8550_v7 = vld [vmem:[#allocation33_spill] sm:$0xff] }
 0x2f9   : > { %5203 = vrot.lane.b32.xlu0 %v7074_v20, %s5483_s14  ;;  %v4016_v20 = vcombine.low %v7158_v6, %v7236_v27  ;;  %v3281_v36 = vcombine.high %v8544_v37, %v7069_v46  ;;  %v4152_v42 = vcombine.low %v8545_v8, %v7240_v16  ;;  %v7329_v43 = vpop.permute.xlu0 %3976  ;;  %v7339_v21 = vrot.slane %v3265_v63, %v5672_v38  ;;  %v7343_v46 = vpop.permute.xlu1 %3978  ;;  %v8548_v37 = vld [vmem:[#allocation62_spill] sm:$0xff]  ;;  %v8555_v47 = vld [vmem:[#allocation67_spill] sm:$0xff] }
 0x2fa   : > { %5198 = vrot.lane.b32.xlu1 %v5197_v54, %s5480_s8  ;;  %v8546_v54 = vcombine.low %v7011_v2, %v6992_v25  ;;  %v4000_v40 = vcombine.low %v8547_v5, %v7181_v50  ;;  %v8551_v61 = vcombine.high %v8549_v39, %v8550_v7  ;;  %v7356_v63 = vrot.slane %v3297_v17, %v5672_v38  ;;  %v8560_v39 = vld [vmem:[#allocation54_spill] sm:$0xff] }
 0x2fb   : > { %v4136_v33 = vcombine.low %v8555_v47, %v7210_v55  ;;  %v4032_v17 = vcombine.low %v7257_v18, %v7329_v43  ;;  %v7378_v7 = vpack.i.bf16 %v2905_v4, %v2769_v13 }
 0x2fc   : > { %v7334_v41 = vpack.i.bf16 %v2906_v49, %v8546_v54  ;;  %v5237_v45 = vpack.i.bf16 %v2901_v11, %v8551_v61  ;;  %v8552_v49 = vld [vmem:[#allocation53_spill] sm:$0xff]  ;;  %v8553_v54 = vld [vmem:[#allocation60_spill] sm:$0xff]  ;;  %v8558_v11 = vcombine.low %v7022_v32, %v7035_v10  ;;  %v4168_v32 = vcombine.low %v7267_v24, %v7343_v46 }
 0x2fd   : > { %5213 = vrot.lane.b32.xlu0 %v8548_v37, %s5481_s9  ;;  %v8554_v3 = vcombine.low %v8552_v49, %v8553_v54  ;;  %v8557_v37 = vcombine.high %v8552_v49, %v8553_v54  ;;  %v7384_v54 = vrot.slane %v4152_v42, %v5672_v38  ;;  %v3981_v10 = vpop.permute.xlu0 %3980  ;;  %v7392_v13 = vrot.slane %v4000_v40, %v5672_v38 }
 0x2fe   : > { %5208 = vrot.lane.b32.xlu1 %v8556_v57, %s5485_s16  ;;  %v7370_v61 = vpack.i.bf16 %v2904_v59, %v8558_v11  ;;  %v8559_v57 = vld [vmem:[#allocation58_spill] sm:$0xff]  ;;  %v4048_v4 = vcombine.low %v7293_v44, %v3981_v10  ;;  %v7399_v42 = vrot.slane %v4136_v33, %v5672_v38  ;;  %v8564_v40 = vcombine.high %v7011_v2, %v6992_v25 }
 0x2ff   : > { %v7353_v30 = vpack.i.bf16 %v2902_v12, %v8554_v3  ;;  %v7365_v60 = vpack.i.bf16 %v2903_v56, %v8557_v37  ;;  %v3263_v3 = vrot.slane %v3249_v1, %v5672_v38  ;;  %v7374_v12 = vrot.slane %v4016_v20, %v5672_v38  ;;  %v8561_v1 = vld [vmem:[#allocation63_spill] sm:$0xff]  ;;  %v8562_v20 = vld [vmem:[#allocation64_spill] sm:$0xff] }
 0x300   : > { %v3313_v49 = vcombine.high %v8560_v39, %v8559_v57  ;;  %v3295_v56 = vrot.slane %v3281_v36, %v5672_v38  ;;  %v3345_v37 = vcombine.high %v8562_v20, %v8561_v1  ;;  %v3983_v39 = vpop.permute.xlu1 %3982  ;;  %v8563_v57 = vld [vmem:[#allocation66_spill] sm:$0xff]  ;;  %v7407_v1 = vpack.i.bf16 %v2907_v15, %v8564_v40 }
 0x301   : > { %v3328_v59 = vcombine.low %v3263_v3, %v7339_v21  ;;  %5223 = vrot.lane.b32.xlu0 %v7189_v9, %s5479_s29  ;;  %v4184_v11 = vcombine.low %v7306_v26, %v3983_v39  ;;  %v4064_v20 = vcombine.low %v7392_v13, %v7374_v12  ;;  %v7412_v9 = vrot.slane %v4032_v17, %v5672_v38  ;;  %v7428_v15 = vpop.permute.xlu0 %4428 }
 0x302   : > { %v3360_v36 = vcombine.low %v3295_v56, %v7356_v63  ;;  %5218 = vrot.lane.b32.xlu1 %v8563_v57, %s5484_s15  ;;  %v7415_v62 = vrot.slane %v4048_v4, %v5672_v38  ;;  %v3329_v48 = vcombine.high %v3263_v3, %v7339_v21  ;;  %v4200_v57 = vcombine.low %v7399_v42, %v7384_v54 }
 0x303   : > { %v7423_v25 = vrot.slane %v4168_v32, %v5672_v38  ;;  %v7426_v2 = vrot.slane %v4184_v11, %v5672_v38  ;;  %v7431_v17 = vrot.slane %v3313_v49, %v5684_v51  ;;  %v7434_v4 = vrot.slane %v3328_v59, %v5684_v51 }
 0x304   : > { %v7437_v40 = vrot.slane %v3345_v37, %v5684_v51  ;;  %v4096_v21 = vcombine.low %v7412_v9, %v7415_v62  ;;  %v7441_v3 = vpop.permute.xlu1 %4430  ;;  %v3361_v32 = vcombine.high %v3295_v56, %v7356_v63  ;;  %v7447_v11 = vrot.slane %v3360_v36, %v5684_v51 }
 0x305   : > { %5233 = vrot.lane.b32.xlu0 %v7205_v22, %s5480_s8  ;;  %v4232_v49 = vcombine.low %v7423_v25, %v7426_v2  ;;  %v3377_v59 = vcombine.high %v7153_v19, %v7156_v14  ;;  %v4001_v37 = vcombine.high %v8547_v5, %v7181_v50  ;;  %v4017_v22 = vcombine.high %v7158_v6, %v7236_v27  ;;  %v7473_v50 = vpop.permute.xlu0 %4432 }
 0x306   : > { %5228 = vrot.lane.b32.xlu1 %v7197_v52, %s5482_s13  ;;  %v7460_v63 = vrot.slane %v4064_v20, %v5684_v51  ;;  %v7463_v56 = vrot.slane %v4096_v21, %v5684_v51  ;;  %v7466_v36 = vrot.slane %v4200_v57, %v5684_v51  ;;  %v4049_v52 = vcombine.high %v7293_v44, %v3981_v10 }
 0x307   : > { %v4185_v33 = vcombine.high %v7306_v26, %v3983_v39  ;;  %v7471_v14 = vrot.slane %v4232_v49, %v5684_v51  ;;  %v4137_v6 = vcombine.high %v8555_v47, %v7210_v55  ;;  %v4153_v27 = vcombine.high %v8545_v8, %v7240_v16 }
 0x308   : > { %v4128_v5 = vcombine.low %v7460_v63, %v7463_v56  ;;  %v7481_v20 = vpop.permute.xlu1 %4434  ;;  %v3379_v44 = vcombine.high %v7431_v17, %v7437_v40  ;;  %v4033_v26 = vcombine.high %v7257_v18, %v7329_v43  ;;  %v4169_v10 = vcombine.high %v7267_v24, %v7343_v46 }
 0x309   : > { %5238 = vrot.lane.b32.xlu0 %v5237_v45, %s5483_s14  ;;  %v4264_v55 = vcombine.low %v7466_v36, %v7471_v14  ;;  %v3247_v16 = vcombine.high %v7286_v35, %v7291_v29  ;;  %v3343_v45 = vrot.slane %v3329_v48, %v5684_v51  ;;  %v3375_v8 = vrot.slane %v3361_v32, %v5684_v51  ;;  %v7507_v57 = vpop.permute.xlu0 %4436 }
 0x30a   : > { %5263 = vrot.lane.b32.xlu1 %v7334_v41, %s5482_s13  ;;  %v8565_v47 = vcombine.high %v8541_v53, %v8540_v58  ;;  %v3380_v24 = vcombine.low %v7434_v4, %v7447_v11  ;;  %v4015_v43 = vrot.slane %v4001_v37, %v5672_v38  ;;  %v4031_v46 = vrot.slane %v4017_v22, %v5672_v38 }
 0x30b   : > { %v4063_v41 = vrot.slane %v4049_v52, %v5672_v38  ;;  %v4199_v39 = vrot.slane %v4185_v33, %v5672_v38  ;;  %v4151_v48 = vrot.slane %v4137_v6, %v5672_v38  ;;  %v4167_v21 = vrot.slane %v4153_v27, %v5672_v38 }
 0x30c   : > { %v5272_v18 = vpack.i.bf16 %v3377_v59, %v8565_v47  ;;  %v7511_v32 = vpop.permute.xlu1 %4438  ;;  %v8566_v49 = vcombine.high %v7275_v0, %v7252_v34  ;;  %v3381_v37 = vcombine.high %v7434_v4, %v7447_v11  ;;  %v4047_v33 = vrot.slane %v4033_v26, %v5672_v38 }
 0x30d   : > { %5243 = vrot.lane.b32.xlu0 %v7353_v30, %s5485_s16  ;;  %v4183_v22 = vrot.slane %v4169_v10, %v5672_v38  ;;  %v4097_v52 = vcombine.high %v7412_v9, %v7415_v62  ;;  %v4233_v6 = vcombine.high %v7423_v25, %v7426_v2  ;;  %v4065_v30 = vcombine.high %v7392_v13, %v7374_v12  ;;  %v4441_v25 = vpop.permute.xlu0 %4440 }
 0x30e   : > { %v5282_v59 = vpack.i.bf16 %v3379_v44, %v8566_v49  ;;  %5273 = vrot.lane.b32.xlu1 %v5272_v18, %s5483_s14  ;;  %v8567_v27 = vcombine.low %v7278_v23, %v7264_v28  ;;  %v3382_v4 = vcombine.low %v3343_v45, %v3375_v8  ;;  %v3378_v11 = vcombine.low %v7431_v17, %v7437_v40 }
 0x30f   : > { %v4080_v26 = vcombine.low %v4015_v43, %v4031_v46  ;;  %v4201_v62 = vcombine.high %v7399_v42, %v7384_v54  ;;  %v4112_v9 = vcombine.low %v4047_v33, %v4063_v41  ;;  %v4248_v10 = vcombine.low %v4183_v22, %v4199_v39 }
 0x310   : > { %v5287_v44 = vpack.i.bf16 %v3380_v24, %v8567_v27  ;;  %v4081_v2 = vcombine.high %v4015_v43, %v4031_v46  ;;  %v4216_v47 = vcombine.low %v4151_v48, %v4167_v21  ;;  %v4217_v18 = vcombine.high %v4151_v48, %v4167_v21  ;;  %v7536_v49 = vpop.permute.xlu1 %4442 }
 0x311   : > { %5248 = vrot.lane.b32.xlu0 %v7365_v60, %s5481_s9  ;;  %v3383_v12 = vcombine.high %v3343_v45, %v3375_v8  ;;  %v4111_v13 = vrot.slane %v4097_v52, %v5684_v51  ;;  %v4113_v24 = vcombine.high %v4047_v33, %v4063_v41  ;;  %v4247_v17 = vrot.slane %v4233_v6, %v5684_v51 }
 0x312   : > { %v4249_v40 = vcombine.high %v4183_v22, %v4199_v39  ;;  %5283 = vrot.lane.b32.xlu1 %v5282_v59, %s5481_s9  ;;  %v4079_v54 = vrot.slane %v4065_v30, %v5684_v51  ;;  %v8568_v42 = vcombine.high %v7278_v23, %v7264_v28  ;;  %v8569_v46 = vcombine.low %v7286_v35, %v7291_v29  ;;  %v7559_v59 = vpop.permute.xlu0 %4444 }
 0x313   : > { %v8570_v60 = vcombine.low %v7275_v0, %v7252_v34  ;;  %v4088_v8 = vrot.slane %v4080_v26, %v5684_v51  ;;  %v4215_v41 = vrot.slane %v4201_v62, %v5684_v51  ;;  %v4120_v39 = vrot.slane %v4112_v9, %v5684_v51 }
 0x314   : > { %v5292_v43 = vpack.i.bf16 %v3381_v37, %v8568_v42  ;;  %v5297_v48 = vpack.i.bf16 %v3382_v4, %v8569_v46  ;;  %v4256_v21 = vrot.slane %v4248_v10, %v5684_v51  ;;  %v7562_v28 = vrot.slane %v4081_v2, %v5684_v51  ;;  %v7568_v34 = vpop.permute.xlu1 %4446 }
 0x315   : > { %v7553_v45 = vpack.i.bf16 %v3378_v11, %v8570_v60  ;;  %v4224_v23 = vrot.slane %v4216_v47, %v5684_v51  ;;  %v7566_v35 = vrot.slane %v4217_v18, %v5684_v51  ;;  %5253 = vrot.lane.b32.xlu0 %v7370_v61, %s5484_s15  ;;  %v7572_v0 = vpack.i.bf16 %v3383_v12, %v3247_v16 }
 0x316   : > { %v7575_v29 = vrot.slane %v4113_v24, %v5684_v51  ;;  %v7578_v37 = vrot.slane %v4249_v40, %v5684_v51  ;;  %5288 = vrot.lane.b32.xlu1 %v5287_v44, %s5484_s15  ;;  %v4130_v33 = vcombine.low %v4079_v54, %v4111_v13  ;;  %v4266_v22 = vcombine.low %v4215_v41, %v4247_v17  ;;  %v4449_v27 = vpop.permute.xlu0 %4448 }
 0x317   : > { %v4492_v52 = vcombine.low %v7473_v50, %v4441_v25  ;;  %v4129_v6 = vcombine.high %v7460_v63, %v7463_v56  ;;  %v4265_v61 = vcombine.high %v7466_v36, %v7471_v14  ;;  %v4131_v16 = vcombine.high %v4079_v54, %v4111_v13 }
 0x318   : > { %v4493_v30 = vcombine.high %v7473_v50, %v4441_v25  ;;  %v4267_v4 = vcombine.high %v4215_v41, %v4247_v17  ;;  %v4132_v11 = vcombine.low %v4088_v8, %v4120_v39  ;;  %v4268_v26 = vcombine.low %v4224_v23, %v4256_v21  ;;  %v4451_v9 = vpop.permute.xlu1 %4450 }
 0x319   : > { %v4476_v44 = vcombine.low %v7428_v15, %v7507_v57  ;;  %v4628_v62 = vcombine.low %v7481_v20, %v7536_v49  ;;  %5258 = vrot.lane.b32.xlu0 %v7378_v7, %s5479_s29  ;;  %v4133_v10 = vcombine.high %v4088_v8, %v4120_v39  ;;  %v4269_v2 = vcombine.high %v4224_v23, %v4256_v21 }
 0x31a   : > { %v4477_v47 = vcombine.high %v7428_v15, %v7507_v57  ;;  %v4612_v50 = vcombine.low %v7441_v3, %v7511_v32  ;;  %v4613_v25 = vcombine.high %v7441_v3, %v7511_v32  ;;  %5293 = vrot.lane.b32.xlu1 %v5292_v43, %s5479_s29  ;;  %v5312_v18 = vpack.i.bf16 %v4266_v22, %v4130_v33  ;;  %v4453_v24 = vpop.permute.xlu0 %4452 }
 0x31b   : > { %v4500_v12 = vrot.slane %v4492_v52, %v5672_v38  ;;  %v4629_v13 = vcombine.high %v7481_v20, %v7536_v49  ;;  %v4134_v7 = vcombine.low %v7562_v28, %v7575_v29  ;;  %v4270_v15 = vcombine.low %v7566_v35, %v7578_v37 }
 0x31c   : > { %v7608_v57 = vrot.slane %v4493_v30, %v5672_v38  ;;  %v5307_v17 = vpack.i.bf16 %v4265_v61, %v4129_v6  ;;  %v7610_v3 = vpack.i.bf16 %v4267_v4, %v4131_v16  ;;  %v7612_v32 = vpack.i.bf16 %v4268_v26, %v4132_v11  ;;  %v4455_v20 = vpop.permute.xlu1 %4454 }
 0x31d   : > { %v4484_v40 = vrot.slane %v4476_v44, %v5672_v38  ;;  %v4636_v54 = vrot.slane %v4628_v62, %v5672_v38  ;;  %5268 = vrot.lane.b32.xlu0 %v7407_v1, %s5480_s8  ;;  %v7618_v49 = vpack.i.bf16 %v4269_v2, %v4133_v10  ;;  %v4135_v42 = vcombine.high %v7562_v28, %v7575_v29  ;;  %v8577_v28 = vld [vmem:[#allocation44_spill] sm:$0xff] }
 0x31e   : > { %v7623_v43 = vrot.slane %v4477_v47, %v5672_v38  ;;  %v4620_v46 = vrot.slane %v4612_v50, %v5672_v38  ;;  %v7627_v60 = vrot.slane %v4613_v25, %v5672_v38  ;;  %5298 = vrot.lane.b32.xlu1 %v5297_v48, %s5482_s13  ;;  %v4271_v8 = vcombine.high %v7566_v35, %v7578_v37  ;;  %v4457_v52 = vpop.permute.xlu0 %4456  ;;  %v8578_v35 = vld [vmem:[#allocation41_spill] sm:$0xff] }
 0x31f   : > { %v4540_v41 = vcombine.low %v4484_v40, %v4500_v12  ;;  %v7633_v1 = vrot.slane %v4629_v13, %v5672_v38  ;;  %v4508_v39 = vcombine.low %v7559_v59, %v4453_v24  ;;  %v7636_v21 = vpack.i.bf16 %v4270_v15, %v4134_v7 }
 0x320   : > { %v4541_v23 = vcombine.high %v4484_v40, %v4500_v12  ;;  %v4556_v33 = vcombine.low %v7623_v43, %v7608_v57  ;;  %v4557_v22 = vcombine.high %v7623_v43, %v7608_v57  ;;  %v4644_v48 = vcombine.low %v7568_v34, %v4455_v20  ;;  %v4459_v4 = vpop.permute.xlu1 %4458 }
 0x321   : > { %v4676_v6 = vcombine.low %v4620_v46, %v4636_v54  ;;  %v4509_v61 = vcombine.high %v7559_v59, %v4453_v24  ;;  %v4524_v16 = vcombine.low %v4449_v27, %v4457_v52  ;;  %v4525_v30 = vcombine.high %v4449_v27, %v4457_v52  ;;  %5278 = vrot.lane.b32.xlu0 %v7553_v45, %s5485_s16 }
 0x322   : > { %v4677_v11 = vcombine.high %v4620_v46, %v4636_v54  ;;  %v4645_v26 = vcombine.high %v7568_v34, %v4455_v20  ;;  %v4660_v44 = vcombine.low %v4451_v9, %v4459_v4  ;;  %v4661_v62 = vcombine.high %v4451_v9, %v4459_v4  ;;  %5303 = vrot.lane.b32.xlu1 %v7572_v0, %s5480_s8  ;;  %v5064_v47 = vpop.permute.xlu0 %5063 }
 0x323   : > { %v4692_v10 = vcombine.low %v7627_v60, %v7633_v1  ;;  %v4516_v59 = vrot.slane %v4508_v39, %v5672_v38  ;;  %v4532_v27 = vrot.slane %v4524_v16, %v5672_v38  ;;  %v7654_v2 = vrot.slane %v4525_v30, %v5672_v38 }
 0x324   : > { %v4693_v45 = vcombine.high %v7627_v60, %v7633_v1  ;;  %v4652_v34 = vrot.slane %v4644_v48, %v5672_v38  ;;  %v4668_v9 = vrot.slane %v4660_v44, %v5672_v38  ;;  %v7661_v0 = vrot.slane %v4661_v62, %v5672_v38  ;;  %v5069_v7 = vpop.permute.xlu1 %5068  ;;  %v8571_v62 = vld [vmem:[#allocation6_spill] sm:$0xff] }
 0x325   : > { %v7664_v50 = vrot.slane %v4540_v41, %v5684_v51  ;;  %v7667_v25 = vrot.slane %v4509_v61, %v5672_v38  ;;  %v4572_v12 = vcombine.low %v4516_v59, %v4532_v27  ;;  %v4573_v13 = vcombine.high %v4516_v59, %v4532_v27  ;;  %5313 = vrot.lane.b32.xlu0 %v5312_v18, %s5485_s16  ;;  %v8572_v59 = vld [vmem:[#allocation9_spill] sm:$0xff] }
 0x326   : > { %v7671_v15 = vrot.slane %v4541_v23, %v5684_v51  ;;  %v7674_v24 = vrot.slane %v4645_v26, %v5672_v38  ;;  %v4708_v40 = vcombine.low %v4652_v34, %v4668_v9  ;;  %v4709_v54 = vcombine.high %v4652_v34, %v4668_v9  ;;  %5308 = vrot.lane.b32.xlu1 %v5307_v17, %s5483_s14  ;;  %v5074_v48 = vpop.permute.xlu0 %5073  ;;  %v8574_v9 = vld [vmem:[#allocation40_spill] sm:$0xff] }
 0x327   : > { %v7678_v20 = vrot.slane %v4676_v6, %v5684_v51  ;;  %v7681_v46 = vrot.slane %v4677_v11, %v5684_v51  ;;  %v7684_v41 = vrot.slane %v4572_v12, %v5684_v51  ;;  %v4588_v18 = vcombine.low %v7667_v25, %v7654_v2  ;;  %v8575_v12 = vld [vmem:[#allocation37_spill] sm:$0xff] }
 0x328   : > { %v7689_v38 = vrot.slane %v4573_v13, %v5684_v51  ;;  %v7692_v39 = vrot.slane %v4708_v40, %v5684_v51  ;;  %v7695_v17 = vrot.slane %v4709_v54, %v5684_v51  ;;  %v4724_v23 = vcombine.low %v7674_v24, %v7661_v0  ;;  %v5079_v30 = vpop.permute.xlu1 %5078 }
 0x329   : > { %v4604_v52 = vcombine.low %v7664_v50, %v7684_v41  ;;  %v5066_v6 = vunpack.i.h.bf16 %v5064_v47  ;;  %v5065_v61 = vunpack.i.l.bf16 %v5064_v47  ;;  %v5071_v16 = vunpack.i.h.bf16 %v5069_v7 }
 0x32a   : > { %v5070_v11 = vunpack.i.l.bf16 %v5069_v7  ;;  %v5076_v26 = vunpack.i.h.bf16 %v5074_v48  ;;  %v5075_v44 = vunpack.i.l.bf16 %v5074_v48  ;;  %5318 = vrot.lane.b32.xlu1 %v7610_v3, %s5481_s9  ;;  %v8573_v27 = vcombine.low %v8571_v62, %v8572_v59  ;;  %v5084_v4 = vpop.permute.xlu0 %5083 }
 0x32b   : > { %v8576_v13 = vcombine.low %v8574_v9, %v8575_v12  ;;  %v5081_v40 = vunpack.i.h.bf16 %v5079_v30  ;;  %v5080_v54 = vunpack.i.l.bf16 %v5079_v30  ;;  %v4605_v3 = vcombine.high %v7664_v50, %v7684_v41  ;;  %v789_v50 = vld [vmem:[%s8121_s4 + $0xe] sm:$0x3] }
 0x32c   : > { %v1136_v34 = vsel %vm1135_vm7, %v8573_v27, %v5065_v61  ;;  %v4741_v62 = vcombine.high %v7678_v20, %v7692_v39  ;;  %v5086_v27 = vunpack.i.h.bf16 %v5084_v4  ;;  %v5089_v9 = vpop.permute.xlu1 %5088  ;;  %v5357_v60 = vpack.i.bf16 %v4271_v8, %v4135_v42  ;;  %v8580_v42 = vld [vmem:[#allocation43_spill] sm:$0xff] }
 0x32d   : > { %v1149_v47 = vsel %vm1135_vm7, %v8576_v13, %v5066_v6  ;;  %v1138_v48 = vsel %vm1137_vm8, %v1136_v34, %v5070_v11  ;;  %v5085_v6 = vunpack.i.l.bf16 %v5084_v4  ;;  %v5091_v12 = vunpack.i.h.bf16 %v5089_v9  ;;  %v8581_v8 = vld [vmem:[#allocation39_spill] sm:$0xff] }
 0x32e   : > { %v1150_v7 = vsel %vm1137_vm8, %v1149_v47, %v5071_v16  ;;  %v1140_v61 = vsel %vm1139_vm9, %v1138_v48, %v5075_v44  ;;  %v5090_v11 = vunpack.i.l.bf16 %v5089_v9  ;;  %5328 = vrot.lane.b32.xlu1 %v7612_v32, %s5484_s15  ;;  %v5322_v47 = vpack.i.bf16 %v4741_v62, %v4605_v3 }
 0x32f   : > { %v1151_v59 = vsel %vm1139_vm9, %v1150_v7, %v5076_v26  ;;  %v1142_v30 = vsel %vm1141_vm10, %v1140_v61, %v5080_v54  ;;  %v4606_v26 = vcombine.low %v7671_v15, %v7689_v38  ;;  %v7733_v4 = vrot.slane %v4556_v33, %v5684_v51 }
 0x330   : > { %v1152_v16 = vsel %vm1141_vm10, %v1151_v59, %v5081_v40  ;;  %v1144_v34 = vsel %vm1143_vm11, %v1142_v30, %v5085_v6  ;;  %v4589_v44 = vcombine.high %v7667_v25, %v7654_v2  ;;  %v4725_v32 = vcombine.high %v7674_v24, %v7661_v0  ;;  %v5094_v40 = vpop.permute.xlu0 %5093  ;;  %5323 = vrot.lane.b32.xlu0 %v5322_v47, %s5483_s14  ;;  %v7751_v25 = vpop.permute.xlu1 %5098  ;;  %v782_v30 = vld [vmem:[%s8121_s4] sm:$0x3] }
 0x331   : > { %v1153_v13 = vsel %vm1143_vm11, %v1152_v16, %v5086_v27  ;;  %v4742_v54 = vcombine.low %v7681_v46, %v7695_v17  ;;  %v7745_v7 = vrot.slane %v4692_v10, %v5684_v51  ;;  %v7748_v48 = vrot.slane %v4588_v18, %v5684_v51 }
 0x332   : > { %v5096_v33 = vunpack.i.h.bf16 %v5094_v40  ;;  %v5095_v2 = vunpack.i.l.bf16 %v5094_v40  ;;  %v4732_v0 = vrot.slane %v4724_v23, %v5684_v51  ;;  %v1146_v24 = vsel %vm1145_vm12, %v1144_v34, %v5090_v11  ;;  %5338 = vrot.lane.b32.xlu1 %v7618_v49, %s5479_s29 }
 0x333   : > { %v1154_v3 = vsel %vm1145_vm12, %v1153_v13, %v5091_v12  ;;  %v4607_v10 = vcombine.high %v7671_v15, %v7689_v38  ;;  %v5332_v62 = vpack.i.bf16 %v4742_v54, %v4606_v26  ;;  %v4743_v61 = vcombine.high %v7681_v46, %v7695_v17 }
 0x334   : > { %v1155_v18 = vsel %vm1147_vm13, %v1154_v3, %v5096_v33  ;;  %v1148_v59 = vsel %vm1147_vm13, %v1146_v24, %v5095_v2  ;;  %v7765_v23 = vrot.slane %v4589_v44, %v5684_v51  ;;  %v7768_v27 = vrot.slane %v4725_v32, %v5684_v51  ;;  %v5104_v9 = vpop.permute.xlu0 %5103  ;;  %v7777_v46 = vpop.permute.xlu1 %5108 }
 0x335   : > { %v1157_v6 = vpack.c.bf16 %v1155_v18, %v1155_v18  ;;  %v1156_v49 = vpack.c.bf16 %v1148_v59, %v1148_v59  ;;  %v7774_v15 = vrot.slane %v4557_v22, %v5684_v51  ;;  %5333 = vrot.lane.b32.xlu0 %v5332_v62, %s5485_s16  ;;  %v4707_v38 = vrot.slane %v4693_v45, %v5684_v51  ;;  %v8584_v62 = vld [vmem:[#allocation14_spill] sm:$0xff]  ;;  %s269_s16 = sand.u32 1, %s5468_s25  }
 0x336   : > { %5348 = vrot.lane.b32.xlu1 %v7636_v21, %s5482_s13  ;;  %v4608_v57 = vcombine.low %v7733_v4, %v7748_v48  ;;  %v4744_v43 = vcombine.low %v7745_v7, %v4732_v0  ;;  %v5342_v22 = vpack.i.bf16 %v4743_v61, %v4607_v10  ;;  %v5100_v11 = vunpack.i.l.bf16 %v7751_v25  ;;  %v8585_v61 = vld [vmem:[#allocation15_spill] sm:$0xff]  ;;  %s4978_s17 = sshll.u32 %s269_s16, 3 }
 0x337   : > { %4985 = vmatprep.subr.msk.bf16.mxu0 %vm1570_vm14, %v1157_v6  ;;  %v1622_v17 = vsel %vm1570_vm14, %v1156_v49, 0  ;;  %v4610_v1 = vcombine.low %v7774_v15, %v7765_v23  ;;  %v4746_v21 = vcombine.low %v4707_v38, %v7768_v27  ;;  %v8579_v29 = vcombine.low %v8577_v28, %v8578_v35  ;;  %v8588_v49 = vld [vmem:[#allocation38_spill] sm:$0xff]  ;;  %s271_s19 = scalar_lea.vmem [#allocation3], %s4978_s17 }
 0x338   : > { %1642 = vmatpush1.bf16.msra.mxu0 %v1622_v17  ;;  %v5134_v51 = vpop.permute.xlu0 %5133  ;;  %v5114_v12 = vpop.permute.xlu1 %5113  ;;  %v5352_v34 = vpack.i.bf16 %v4744_v43, %v4608_v57  ;;  %v8582_v13 = vcombine.low %v8580_v42, %v8581_v8  ;;  %v4609_v26 = vcombine.high %v7733_v4, %v7748_v48  ;;  %v4745_v44 = vcombine.high %v7745_v7, %v4732_v0  ;;  %s4915_s20 = sshll.u32 %s271_s19, 4  ;;  %s4916_s20 = int_to_ptr.vmem [resolvable:$true] %s4915_s20 }
 0x339   : > { %5343 = vrot.lane.b32.xlu0 %v5342_v22, %s5481_s9  ;;  %v5136_v45 = vunpack.i.h.bf16 %v5134_v51  ;;  %v5135_v16 = vunpack.i.l.bf16 %v5134_v51  ;;  %v8583_v32 = vmov 0   ;;  %v5101_v40 = vunpack.i.h.bf16 %v7751_v25  ;;  %s4913_s9 = scalar_lea.hbm %s8124_s7, %s5007_s18 }
 0x33a   : > { %5358 = vrot.lane.b32.xlu1 %v5357_v60, %s5480_s8  ;;  %v5105_v54 = vunpack.i.l.bf16 %v5104_v9  ;;  %v5367_v2 = vpack.i.bf16 %v4746_v21, %v4610_v1  ;;  %v5106_v24 = vunpack.i.h.bf16 %v5104_v9  ;;  %v8586_v59 = vcombine.low %v8584_v62, %v8585_v61  ;;  %v8587_v9 = vld [vmem:[#allocation42_spill] sm:$0xff] }
 0x33b   : > { %4986 = vmatmul.mubr.msk.bf16.vlgmr.msra.gmra.mxu0 %vm1566_vm15, %v782_v30  ;;  %v3859_v37 = vsel %vm1135_vm7, %v8579_v29, %v5136_v45  ;;  %v3852_v47 = vsel %vm1135_vm7, %v8582_v13, %v5135_v16  ;;  %v4611_v7 = vcombine.high %v7774_v15, %v7765_v23  ;;  %v5362_v0 = vpack.i.bf16 %v4745_v44, %v4609_v26  ;;  %v4880_v26 = vld [vmem:[%s8123_s6] sm:$0xf] }
 0x33c   : > { %2545 = vmatprep.mubr.bf16.mxu0 %v8583_v32  ;;  %v5139_v33 = vpop.permute.xlu0 %5138  ;;  %v5119_v18 = vpop.permute.xlu1 %5118  ;;  %v2488_v4 = vsel %vm1135_vm7, %v8586_v59, %v5100_v11  ;;  %v4747_v6 = vcombine.high %v4707_v38, %v7768_v27  ;;  %v8589_v17 = vcombine.low %v8587_v9, %v8588_v49  ;;  %v5111_v22 = vunpack.i.h.bf16 %v7777_v46  ;;  %v8590_v49 = vld [vmem:[#allocation21_spill] sm:$0xff] }
 0x33d   : > { %5353 = vrot.lane.b32.xlu0 %v5352_v34, %s5484_s15  ;;  %v5141_v3 = vunpack.i.h.bf16 %v5139_v33  ;;  %v5140_v10 = vunpack.i.l.bf16 %v5139_v33  ;;  %v2489_v43 = vsel %vm1137_vm8, %v2488_v4, %v5105_v54  ;;  %v5110_v30 = vunpack.i.l.bf16 %v7777_v46 }
 0x33e   : > { %5368 = vrot.lane.b32.xlu1 %v5367_v2, %s5482_s13  ;;  %v2495_v57 = vsel %vm1135_vm7, %v8589_v17, %v5101_v40  ;;  %v5116_v51 = vunpack.i.h.bf16 %v5114_v12  ;;  %v5115_v60 = vunpack.i.l.bf16 %v5114_v12  ;;  %v5121_v1 = vunpack.i.h.bf16 %v5119_v18  ;;  %v4872_v12 = vld [vmem:[%s8122_s5] sm:$0xf]  ;;  %s5416_s13 = scalar_lea.vmem %s4916_s20, 128 }
 0x33f   : > { %v3853_v48 = vsel %vm1137_vm8, %v3852_v47, %v5140_v10  ;;  %v7829_v25 = vsel %vm1137_vm8, %v3859_v37, %v5141_v3  ;;  %v2496_v15 = vsel %vm1137_vm8, %v2495_v57, %v5106_v24  ;;  %v5120_v21 = vunpack.i.l.bf16 %v5119_v18  ;;  %v785_v10 = vld [vmem:[%s8121_s4 + $0x6] sm:$0x3]  ;;  %p5417_p11 = scmp.ne.s32.totalorder %s4916_s20, %s5416_s13 }
 0x340   : > { %v7839_v23 = vpop.permute.xlu0 %5143  ;;  %v5124_v38 = vpop.permute.xlu1 %5123  ;;  %v5372_v34 = vpack.i.bf16 %v4747_v6, %v4611_v7  ;;  %v2490_v46 = vsel %vm1139_vm9, %v2489_v43, %v5110_v30  ;;  %v2497_v28 = vsel %vm1139_vm9, %v2496_v15, %v5111_v22  ;;  %v8591_v17 = vcombine.low %v7138_v31, %v8590_v49  ;;  %v8592_v43 = vld [vmem:[#allocation73_spill] sm:$0xff]  ;;  %v8593_v22 = vld [vmem:[#allocation71_spill] sm:$0xff]  ;;  %v8596_v49 = vld [vmem:[#allocation24_spill] sm:$0xff] }
 0x341   : > { %5363 = vrot.lane.b32.xlu0 %v5362_v0, %s5479_s29  ;;  %v5145_v27 = vunpack.i.l.bf16 %v7839_v23  ;;  %v5126_v16 = vunpack.i.h.bf16 %v5124_v38  ;;  %v5125_v11 = vunpack.i.l.bf16 %v5124_v38  ;;  %v2491_v35 = vsel %vm1141_vm10, %v2490_v46, %v5115_v60  ;;  %s4901_s29 = scalar_lea.sflag [#allocation4], %s269_s16  ;;  %p5418_p12 = pnand %p5417_p11, %p5571_p5 }
 0x342   : > { %v2498_v29 = vsel %vm1141_vm10, %v2497_v28, %v5116_v51  ;;  %4875 = vperm.xlu1 %5377, %v4872_v12   ;;  %v2492_v42 = vsel %vm1143_vm11, %v2491_v35, %v5120_v21  ;;  %v8594_v30 = vcombine.low %v8592_v43, %v8593_v22 }
 0x343   : > { %v7845_v45 = vsel %vm1139_vm9, %v3853_v48, %v5145_v27  ;;  %v2499_v8 = vsel %vm1143_vm11, %v2498_v29, %v5121_v1  ;;  %v2493_v44 = vsel %vm1145_vm12, %v2492_v42, %v5125_v11  ;;  %p5419_p13 = pneg %p5418_p12 }
 0x344   : > { %v5129_v37 = vpop.permute.xlu1 %5128  ;;  %v2500_v40 = vsel %vm1145_vm12, %v2499_v8, %v5126_v16  ;;  %v7869_v18 = vpop.permute.xlu0 %5148 }
 0x345   : > { %5373 = vrot.lane.b32.xlu0 %v5372_v34, %s5480_s8  ;;  %v5131_v13 = vunpack.i.h.bf16 %v5129_v37  ;;  %v5130_v47 = vunpack.i.l.bf16 %v5129_v37  ;;  %s5492_s8 = smov [#allocation3]  }
 0x346   : > { %s5420_s14 = sshll.u32 %s5492_s8, 4  ;;  %s5421_s14 = int_to_ptr.vmem [resolvable:$false] %s5420_s14 }
 0x347   : > { %v2501_v54 = vsel %vm1147_vm13, %v2500_v40, %v5131_v13  ;;  %v2494_v33 = vsel %vm1147_vm13, %v2493_v44, %v5130_v47  ;;  %s5422_s28 = scalar_lea.vmem %s5421_s14, 256  ;;  %p5423_p0 = scmp.lt.s32.totalorder %s4916_s20, %s5421_s14 }
 0x348   : > { %v2503_v2 = vpack.c.bf16 %v2501_v54, %v2501_v54  ;;  %v2502_v24 = vpack.c.bf16 %v2494_v33, %v2494_v33  ;;  %v7873_v62 = vpop.permute.xlu0 %5153  ;;  %v7875_v61 = vpop.permute.xlu1 %5158  ;;  %p5424_p1 = scmp.lt.s32.totalorder %s5422_s28, %s5416_s13 }
 0x349   : > { %4883 = vperm.xlu0 %5061, %v4880_v26  }
 0x34a   : > { %4989 = vmatprep.subr.msk.bf16.mxu0 %vm1570_vm14, %v2503_v2  ;;  %v2508_v3 = vsel %vm1570_vm14, %v2502_v24, 0  ;;  %p5425_p2 = por %p5424_p1, %p5423_p0 }
 0x34b   : > { %2528 = vmatpush1.bf16.msra.mxu0 %v2508_v3 }
 0x34c   : > { %v7877_v59 = vpop.permute.xlu0 %5163  ;;  %p5426_p3 = pnand %p5425_p2, %p5419_p13 }
 0x34e   : > { %4990 = vmatmul.mubr.msk.bf16.vlgmr.msra.gmra.mxu0 %vm1566_vm15, %v785_v10 }
 0x34f   : > { %3497 = vmatprep.mubr.bf16.mxu0 %v8583_v32 }
 0x35c   : > { %v5174_v4 = vpop.permute.xlu0 %5173  ;;  %v5169_v7 = vpop.permute.xlu1 %5168 }
 0x35d   : > { %v5171_v48 = vunpack.i.h.bf16 %v5169_v7  ;;  %v5170_v0 = vunpack.i.l.bf16 %v5169_v7  ;;  %v5176_v6 = vunpack.i.h.bf16 %v5174_v4  ;;  %v5175_v9 = vunpack.i.l.bf16 %v5174_v4 }
 0x35f   : > { %v1557_v57 = vsel %vm1135_vm7, %v8591_v17, %v5171_v48  ;;  %v1550_v15 = vsel %vm1135_vm7, %v8594_v30, %v5170_v0  ;;  %v8598_v30 = vld [vmem:[#allocation34_spill] sm:$0xff] }
 0x360   : > { %v1551_v16 = vsel %vm1137_vm8, %v1550_v15, %v5175_v9  ;;  %v1558_v11 = vsel %vm1137_vm8, %v1557_v57, %v5176_v6  ;;  %v8595_v9 = vld [vmem:[#allocation72_spill] sm:$0xff] }
 0x361   : > { %v8597_v17 = vcombine.low %v8595_v9, %v8596_v49  ;;  %v8599_v15 = vld [vmem:[#allocation36_spill] sm:$0xff] }
 0x362   : > { %v5184_v51 = vpop.permute.xlu0 %5183  ;;  %v5179_v60 = vpop.permute.xlu1 %5178 }
 0x363   : > { %v5181_v27 = vunpack.i.h.bf16 %v5179_v60  ;;  %v5180_v38 = vunpack.i.l.bf16 %v5179_v60  ;;  %v5186_v1 = vunpack.i.h.bf16 %v5184_v51  ;;  %v5185_v21 = vunpack.i.l.bf16 %v5184_v51 }
 0x364   : > { %v8600_v51 = vcombine.low %v8598_v30, %v8599_v15  ;;  %v5146_v30 = vunpack.i.h.bf16 %v7839_v23  ;;  %v5155_v15 = vunpack.i.l.bf16 %v7873_v62 }
 0x365   : > { %v1552_v34 = vsel %vm1139_vm9, %v1551_v16, %v5180_v38  ;;  %v1559_v31 = vsel %vm1139_vm9, %v1558_v11, %v5181_v27 }
 0x366   : > { %v1553_v42 = vsel %vm1141_vm10, %v1552_v34, %v5185_v21  ;;  %v1560_v8 = vsel %vm1141_vm10, %v1559_v31, %v5186_v1  ;;  %v783_v34 = vld [vmem:[%s8121_s4 + $0x2] sm:$0x3] }
 0x367   : > { %v5194_v46 = vpop.permute.xlu0 %5193 }
 0x368   : > { %v5189_v28 = vpop.permute.xlu1 %5188  ;;  %v5196_v29 = vunpack.i.h.bf16 %v5194_v46  ;;  %v5195_v37 = vunpack.i.l.bf16 %v5194_v46 }
 0x369   : > { %v5191_v12 = vunpack.i.h.bf16 %v5189_v28  ;;  %v5190_v35 = vunpack.i.l.bf16 %v5189_v28 }
 0x36b   : > { %v1554_v13 = vsel %vm1143_vm11, %v1553_v42, %v5190_v35  ;;  %v5204_v47 = vpop.permute.xlu0 %5203  ;;  %v1561_v26 = vsel %vm1143_vm11, %v1560_v8, %v5191_v12 }
 0x36c   : > { %v5199_v44 = vpop.permute.xlu1 %5198  ;;  %v5205_v40 = vunpack.i.l.bf16 %v5204_v47  ;;  %v5206_v2 = vunpack.i.h.bf16 %v5204_v47  ;;  %v1562_v24 = vsel %vm1145_vm12, %v1561_v26, %v5196_v29  ;;  %v1555_v3 = vsel %vm1145_vm12, %v1554_v13, %v5195_v37 }
 0x36d   : > { %v5201_v54 = vunpack.i.h.bf16 %v5199_v44  ;;  %v5200_v33 = vunpack.i.l.bf16 %v5199_v44 }
 0x36e   : > { %v2076_v57 = vsel %vm1135_vm7, %v8597_v17, %v5205_v40  ;;  %v2083_v60 = vsel %vm1135_vm7, %v8600_v51, %v5206_v2 }
 0x36f   : > { %v5214_v10 = vpop.permute.xlu0 %5213  ;;  %v1563_v4 = vsel %vm1147_vm13, %v1562_v24, %v5201_v54  ;;  %v1556_v7 = vsel %vm1147_vm13, %v1555_v3, %v5200_v33 }
 0x370   : > { %v5209_v48 = vpop.permute.xlu1 %5208  ;;  %v1565_v0 = vpack.c.bf16 %v1563_v4, %v1563_v4  ;;  %v1564_v6 = vpack.c.bf16 %v1556_v7, %v1556_v7  ;;  %v5216_v27 = vunpack.i.h.bf16 %v5214_v10  ;;  %v5215_v38 = vunpack.i.l.bf16 %v5214_v10 }
 0x371   : > { %v5211_v43 = vunpack.i.h.bf16 %v5209_v48  ;;  %v5210_v22 = vunpack.i.l.bf16 %v5209_v48 }
 0x372   : > { %4983 = vmatprep.subr.msk.bf16.mxu1 %vm1570_vm14, %v1565_v0  ;;  %v1572_v1 = vsel %vm1570_vm14, %v1564_v6, 0 }
 0x373   : > { %v2084_v21 = vsel %vm1137_vm8, %v2083_v60, %v5211_v43  ;;  %v2077_v16 = vsel %vm1137_vm8, %v2076_v57, %v5210_v22  ;;  %1592 = vmatpush1.bf16.msra.mxu1 %v1572_v1  ;;  %v5224_v11 = vpop.permute.xlu0 %5223  ;;  %v784_v57 = vld [vmem:[%s8121_s4 + $0x4] sm:$0x3]  ;;  %v5150_v43 = vunpack.i.l.bf16 %v7869_v18  ;;  %v5151_v60 = vunpack.i.h.bf16 %v7869_v18 }
 0x374   : > { %v5219_v31 = vpop.permute.xlu1 %5218  ;;  %v5226_v12 = vunpack.i.h.bf16 %v5224_v11  ;;  %v5225_v35 = vunpack.i.l.bf16 %v5224_v11  ;;  %v2078_v29 = vsel %vm1139_vm9, %v2077_v16, %v5215_v38  ;;  %v2085_v37 = vsel %vm1139_vm9, %v2084_v21, %v5216_v27 }
 0x375   : > { %v5221_v46 = vunpack.i.h.bf16 %v5219_v31  ;;  %v5220_v28 = vunpack.i.l.bf16 %v5219_v31  ;;  %v5156_v27 = vunpack.i.h.bf16 %v7873_v62  ;;  %v3855_v21 = vsel %vm1141_vm10, %v7845_v45, %v5150_v43 }
 0x376   : > { %4984 = vmatmul.mubr.msk.bf16.vlgmr.msra.gmra.mxu1 %vm1566_vm15, %v783_v34  ;;  %v5160_v16 = vunpack.i.l.bf16 %v7875_v61  ;;  %v3861_v31 = vsel %vm1139_vm9, %v7829_v25, %v5146_v30 }
 0x377   : > { %v2079_v42 = vsel %vm1141_vm10, %v2078_v29, %v5220_v28  ;;  %v2086_v8 = vsel %vm1141_vm10, %v2085_v37, %v5221_v46  ;;  %v5234_v13 = vpop.permute.xlu0 %5233  ;;  %2133 = vmatprep.mubr.bf16.mxu1 %v8583_v32  ;;  %v3856_v46 = vsel %vm1143_vm11, %v3855_v21, %v5155_v15  ;;  %v3862_v62 = vsel %vm1141_vm10, %v3861_v31, %v5151_v60 }
 0x378   : > { %v5236_v47 = vunpack.i.h.bf16 %v5234_v13  ;;  %v5235_v26 = vunpack.i.l.bf16 %v5234_v13  ;;  %v5229_v44 = vpop.permute.xlu1 %5228  ;;  %v2080_v33 = vsel %vm1143_vm11, %v2079_v42, %v5225_v35  ;;  %v2087_v2 = vsel %vm1143_vm11, %v2086_v8, %v5226_v12  ;;  %v8601_v8 = vld [vmem:[#allocation30_spill] sm:$0xff]  ;;  %v8602_v13 = vld [vmem:[#allocation33_spill] sm:$0xff] }
 0x379   : > { %v5231_v40 = vunpack.i.h.bf16 %v5229_v44  ;;  %v5230_v54 = vunpack.i.l.bf16 %v5229_v44  ;;  %v5165_v35 = vunpack.i.l.bf16 %v7877_v59  ;;  %v3863_v37 = vsel %vm1143_vm11, %v3862_v62, %v5156_v27  ;;  %v8605_v44 = vld [vmem:[#allocation65_spill] sm:$0xff] }
 0x37a   : > { %v5161_v42 = vunpack.i.h.bf16 %v7875_v61 }
 0x37b   : > { %v2081_v24 = vsel %vm1145_vm12, %v2080_v33, %v5230_v54  ;;  %v2088_v3 = vsel %vm1145_vm12, %v2087_v2, %v5231_v40  ;;  %v5239_v10 = vpop.permute.xlu0 %5238  ;;  %v3857_v33 = vsel %vm1145_vm12, %v3856_v46, %v5160_v16  ;;  %v5166_v2 = vunpack.i.h.bf16 %v7877_v59 }
 0x37c   : > { %v7924_v4 = vpop.permute.xlu1 %5263  ;;  %v2089_v7 = vsel %vm1147_vm13, %v2088_v3, %v5236_v47  ;;  %v2082_v48 = vsel %vm1147_vm13, %v2081_v24, %v5235_v26  ;;  %v5241_v38 = vunpack.i.h.bf16 %v5239_v10  ;;  %v5240_v1 = vunpack.i.l.bf16 %v5239_v10  ;;  %v8604_v26 = vld [vmem:[#allocation27_spill] sm:$0xff] }
 0x37d   : > { %v2091_v0 = vpack.c.bf16 %v2089_v7, %v2089_v7  ;;  %v2090_v6 = vpack.c.bf16 %v2082_v48, %v2082_v48  ;;  %v8603_v47 = vcombine.low %v8601_v8, %v8602_v13  ;;  %v8606_v40 = vcombine.low %v8604_v26, %v8605_v44 }
 0x37e   : > { %v3864_v59 = vsel %vm1145_vm12, %v3863_v37, %v5161_v42  ;;  %v5266_v15 = vunpack.i.h.bf16 %v7924_v4  ;;  %v5265_v60 = vunpack.i.l.bf16 %v7924_v4 }
 0x37f   : > { %4987 = vmatprep.subr.msk.bf16.mxu1 %vm1570_vm14, %v2091_v0  ;;  %v5244_v9 = vpop.permute.xlu0 %5243  ;;  %v2096_v49 = vsel %vm1570_vm14, %v2090_v6, 0  ;;  %v2964_v25 = vsel %vm1135_vm7, %v8603_v47, %v5240_v1  ;;  %v2971_v54 = vsel %vm1135_vm7, %v8606_v40, %v5241_v38  ;;  %v3865_v30 = vsel %vm1147_vm13, %v3864_v59, %v5166_v2 }
 0x380   : > { %v7930_v17 = vpop.permute.xlu1 %5273  ;;  %2116 = vmatpush1.bf16.msra.mxu1 %v2096_v49  ;;  %v5246_v11 = vunpack.i.h.bf16 %v5244_v9  ;;  %v5245_v34 = vunpack.i.l.bf16 %v5244_v9  ;;  %v8609_v47 = vcombine.low %v8541_v53, %v8540_v58  ;;  %v786_v58 = vld [vmem:[%s8121_s4 + $0x8] sm:$0x3] }
 0x381   : > { %v5276_v38 = vunpack.i.h.bf16 %v7930_v17 }
 0x382   : > { %v2965_v24 = vsel %vm1137_vm8, %v2964_v25, %v5245_v34  ;;  %v2972_v3 = vsel %vm1137_vm8, %v2971_v54, %v5246_v11  ;;  %v5275_v34 = vunpack.i.l.bf16 %v7930_v17 }
 0x383   : > { %v5249_v22 = vpop.permute.xlu0 %5248  ;;  %4988 = vmatmul.mubr.msk.bf16.vlgmr.msra.gmra.mxu1 %vm1566_vm15, %v784_v57  ;;  %v3858_v57 = vsel %vm1147_vm13, %v3857_v33, %v5165_v35 }
 0x384   : > { %v7939_v51 = vpop.permute.xlu1 %5283  ;;  %3021 = vmatprep.mubr.bf16.mxu1 %v8583_v32  ;;  %v5251_v28 = vunpack.i.h.bf16 %v5249_v22  ;;  %v5250_v12 = vunpack.i.l.bf16 %v5249_v22  ;;  %v3866_v11 = vpack.c.bf16 %v3858_v57, %v3858_v57  ;;  %v3440_v25 = vsel %vm1135_vm7, %v8609_v47, %v5275_v34 }
 0x385   : > { %v5286_v26 = vunpack.i.h.bf16 %v7939_v51  ;;  %v5285_v44 = vunpack.i.l.bf16 %v7939_v51 }
 0x386   : > { %v2966_v61 = vsel %vm1139_vm9, %v2965_v24, %v5250_v12  ;;  %v2973_v7 = vsel %vm1139_vm9, %v2972_v3, %v5251_v28  ;;  %v3867_v12 = vpack.c.bf16 %v3865_v30, %v3865_v30  ;;  %v3872_v13 = vsel %vm1570_vm14, %v3866_v11, 0 }
 0x387   : > { %v5254_v23 = vpop.permute.xlu0 %5253 }
 0x388   : > { %v7950_v18 = vpop.permute.xlu1 %5288  ;;  %v5256_v29 = vunpack.i.h.bf16 %v5254_v23  ;;  %v5255_v45 = vunpack.i.l.bf16 %v5254_v23 }
 0x389   : > { %v5291_v40 = vunpack.i.h.bf16 %v7950_v18  ;;  %v5290_v54 = vunpack.i.l.bf16 %v7950_v18 }
 0x38a   : > { %v2967_v9 = vsel %vm1141_vm10, %v2966_v61, %v5255_v45  ;;  %v2974_v49 = vsel %vm1141_vm10, %v2973_v7, %v5256_v29  ;;  %v8607_v29 = vld [vmem:[#allocation22_spill] sm:$0xff] }
 0x38b   : > { %v5259_v10 = vpop.permute.xlu0 %5258  ;;  %v8608_v45 = vcombine.low %v7153_v19, %v8607_v29 }
 0x38c   : > { %v5261_v48 = vunpack.i.h.bf16 %v5259_v10  ;;  %v5260_v0 = vunpack.i.l.bf16 %v5259_v10  ;;  %v5294_v6 = vpop.permute.xlu1 %5293 }
 0x38d   : > { %v3447_v37 = vsel %vm1135_vm7, %v8608_v45, %v5276_v38  ;;  %v5296_v53 = vunpack.i.h.bf16 %v5294_v6  ;;  %v5295_v24 = vunpack.i.l.bf16 %v5294_v6  ;;  %v788_v38 = vld [vmem:[%s8121_s4 + $0xc] sm:$0x3] }
 0x38e   : > { %v2968_v43 = vsel %vm1143_vm11, %v2967_v9, %v5260_v0  ;;  %v2975_v22 = vsel %vm1143_vm11, %v2974_v49, %v5261_v48 }
 0x38f   : > { %v5269_v27 = vpop.permute.xlu0 %5268  ;;  %v2976_v23 = vsel %vm1145_vm12, %v2975_v22, %v5266_v15  ;;  %v2969_v31 = vsel %vm1145_vm12, %v2968_v43, %v5265_v60 }
 0x390   : > { %v5271_v1 = vunpack.i.h.bf16 %v5269_v27  ;;  %v5270_v21 = vunpack.i.l.bf16 %v5269_v27  ;;  %v5299_v16 = vpop.permute.xlu1 %5298 }
 0x391   : > { %v5301_v10 = vunpack.i.h.bf16 %v5299_v16  ;;  %v5300_v61 = vunpack.i.l.bf16 %v5299_v16 }
 0x392   : > { %v2977_v46 = vsel %vm1147_vm13, %v2976_v23, %v5271_v1  ;;  %v2970_v28 = vsel %vm1147_vm13, %v2969_v31, %v5270_v21  ;;  %v787_v21 = vld [vmem:[%s8121_s4 + $0xa] sm:$0x3] }
 0x393   : > { %v2979_v62 = vpack.c.bf16 %v2977_v46, %v2977_v46  ;;  %v5279_v4 = vpop.permute.xlu0 %5278  ;;  %v2978_v35 = vpack.c.bf16 %v2970_v28, %v2970_v28 }
 0x394   : > { %v5281_v42 = vunpack.i.h.bf16 %v5279_v4  ;;  %v5280_v8 = vunpack.i.l.bf16 %v5279_v4  ;;  %v5304_v17 = vpop.permute.xlu1 %5303 }
 0x395   : > { %4991 = vmatprep.subr.msk.bf16.mxu1 %vm1570_vm14, %v2979_v62  ;;  %v2984_v19 = vsel %vm1570_vm14, %v2978_v35, 0  ;;  %v5306_v0 = vunpack.i.h.bf16 %v5304_v17  ;;  %v5305_v9 = vunpack.i.l.bf16 %v5304_v17 }
 0x396   : > { %v3441_v33 = vsel %vm1137_vm8, %v3440_v25, %v5280_v8  ;;  %v3448_v2 = vsel %vm1137_vm8, %v3447_v37, %v5281_v42  ;;  %3004 = vmatpush1.bf16.msra.mxu1 %v2984_v19 }
 0x397   : > { %v3442_v51 = vsel %vm1139_vm9, %v3441_v33, %v5285_v44  ;;  %v3449_v3 = vsel %vm1139_vm9, %v3448_v2, %v5286_v26  ;;  %4995 = vmatprep.subr.msk.bf16.mxu1 %vm1570_vm14, %v3867_v12  ;;  %v5314_v1 = vpop.permute.xlu0 %5313 }
 0x398   : > { %v3443_v18 = vsel %vm1141_vm10, %v3442_v51, %v5290_v54  ;;  %v3450_v7 = vsel %vm1141_vm10, %v3449_v3, %v5291_v40  ;;  %v5309_v48 = vpop.permute.xlu1 %5308  ;;  %v5316_v46 = vunpack.i.h.bf16 %v5314_v1  ;;  %v5315_v28 = vunpack.i.l.bf16 %v5314_v1 }
 0x399   : > { %v3451_v49 = vsel %vm1143_vm11, %v3450_v7, %v5296_v53  ;;  %4992 = vmatmul.mubr.msk.bf16.vlgmr.msra.gmra.mxu1 %vm1566_vm15, %v786_v58  ;;  %v3444_v6 = vsel %vm1143_vm11, %v3443_v18, %v5295_v24  ;;  %v5311_v11 = vunpack.i.h.bf16 %v5309_v48  ;;  %v5310_v34 = vunpack.i.l.bf16 %v5309_v48 }
 0x39a   : > { %v3452_v57 = vsel %vm1145_vm12, %v3451_v49, %v5301_v10  ;;  %3892 = vmatpush1.bf16.msra.mxu1 %v3872_v13  ;;  %v3445_v59 = vsel %vm1145_vm12, %v3444_v6, %v5300_v61  ;;  %3909 = vmatprep.mubr.bf16.mxu1 %v8583_v32  ;;  %v8610_v6 = vcombine.low %v7678_v20, %v7692_v39 }
 0x39b   : > { %v3453_v43 = vsel %vm1147_vm13, %v3452_v57, %v5306_v0  ;;  %v3446_v22 = vsel %vm1147_vm13, %v3445_v59, %v5305_v9  ;;  %v4335_v12 = vsel %vm1135_vm7, %v4264_v55, %v5311_v11  ;;  %v4328_v62 = vsel %vm1135_vm7, %v4128_v5, %v5310_v34 }
 0x39c   : > { %v3455_v30 = vpack.c.bf16 %v3453_v43, %v3453_v43  ;;  %v5319_v15 = vpop.permute.xlu1 %5318  ;;  %v3454_v60 = vpack.c.bf16 %v3446_v22, %v3446_v22  ;;  %v4329_v17 = vsel %vm1137_vm8, %v4328_v62, %v5315_v28  ;;  %v4336_v13 = vsel %vm1137_vm8, %v4335_v12, %v5316_v46 }
 0x39d   : > { %v5321_v4 = vunpack.i.h.bf16 %v5319_v15  ;;  %v5320_v35 = vunpack.i.l.bf16 %v5319_v15 }
 0x39e   : > { %4993 = vmatprep.subr.msk.bf16.mxu0 %vm1570_vm14, %v3455_v30  ;;  %v3460_v27 = vsel %vm1570_vm14, %v3454_v60, 0 }
 0x39f   : > { %3480 = vmatpush1.bf16.msra.mxu0 %v3460_v27  ;;  %v4330_v55 = vsel %vm1139_vm9, %v4329_v17, %v5320_v35  ;;  %v4337_v63 = vsel %vm1139_vm9, %v4336_v13, %v5321_v4 }
 0x3a0   : > { %v5329_v16 = vpop.permute.xlu1 %5328 }
 0x3a1   : > { %4996 = vmatmul.mubr.msk.bf16.vlgmr.msra.gmra.mxu1 %vm1566_vm15, %v788_v38  ;;  %v5331_v45 = vunpack.i.h.bf16 %v5329_v16  ;;  %v5330_v37 = vunpack.i.l.bf16 %v5329_v16 }
 0x3a2   : > { %4994 = vmatmul.mubr.msk.bf16.vlgmr.msra.gmra.mxu0 %vm1566_vm15, %v787_v21  ;;  %4861 = vmatprep.mubr.bf16.mxu1 %v8583_v32  ;;  %v5324_v23 = vpop.permute.xlu0 %5323 }
 0x3a3   : > { %4385 = vmatprep.mubr.bf16.mxu0 %v8583_v32  ;;  %v4331_v5 = vsel %vm1141_vm10, %v4330_v55, %v5330_v37  ;;  %v4338_v47 = vsel %vm1141_vm10, %v4337_v63, %v5331_v45  ;;  %v5326_v54 = vunpack.i.h.bf16 %v5324_v23  ;;  %v5325_v33 = vunpack.i.l.bf16 %v5324_v23 }
 0x3a4   : > { %v5339_v31 = vpop.permute.xlu1 %5338 }
 0x3a5   : > { %v5341_v32 = vunpack.i.h.bf16 %v5339_v31  ;;  %v5340_v8 = vunpack.i.l.bf16 %v5339_v31  ;;  %v4804_v49 = vsel %vm1135_vm7, %v4604_v52, %v5325_v33  ;;  %v4811_v57 = vsel %vm1135_vm7, %v8610_v6, %v5326_v54 }
 0x3a7   : > { %v5334_v29 = vpop.permute.xlu0 %5333  ;;  %v4332_v26 = vsel %vm1143_vm11, %v4331_v5, %v5340_v8  ;;  %v4339_v44 = vsel %vm1143_vm11, %v4338_v47, %v5341_v32 }
 0x3a8   : > { %v5349_v42 = vpop.permute.xlu1 %5348  ;;  %v5336_v53 = vunpack.i.h.bf16 %v5334_v29  ;;  %v5335_v24 = vunpack.i.l.bf16 %v5334_v29  ;;  %v790_v29 = vld [vmem:[%s8121_s4 + $0x10] sm:$0x3] }
 0x3a9   : > { %v5351_v14 = vunpack.i.h.bf16 %v5349_v42  ;;  %v5350_v36 = vunpack.i.l.bf16 %v5349_v42 }
 0x3aa   : > { %v4805_v22 = vsel %vm1137_vm8, %v4804_v49, %v5335_v24  ;;  %v4812_v30 = vsel %vm1137_vm8, %v4811_v57, %v5336_v53 }
 0x3ab   : > { %v5344_v56 = vpop.permute.xlu0 %5343  ;;  %v4333_v2 = vsel %vm1145_vm12, %v4332_v26, %v5350_v36  ;;  %v4340_v58 = vsel %vm1145_vm12, %v4339_v44, %v5351_v14 }
 0x3ac   : > { %v5359_v25 = vpop.permute.xlu1 %5358  ;;  %v5346_v61 = vunpack.i.h.bf16 %v5344_v56  ;;  %v5345_v18 = vunpack.i.l.bf16 %v5344_v56 }
 0x3ad   : > { %v5361_v19 = vunpack.i.h.bf16 %v5359_v25  ;;  %v5360_v40 = vunpack.i.l.bf16 %v5359_v25 }
 0x3ae   : > { %v4806_v41 = vsel %vm1139_vm9, %v4805_v22, %v5345_v18  ;;  %v4813_v20 = vsel %vm1139_vm9, %v4812_v30, %v5346_v61 }
 0x3af   : > { %v5354_v51 = vpop.permute.xlu0 %5353  ;;  %v4341_v3 = vsel %vm1147_vm13, %v4340_v58, %v5361_v19  ;;  %v4334_v10 = vsel %vm1147_vm13, %v4333_v2, %v5360_v40 }
 0x3b0   : > { %v4343_v7 = vpack.c.bf16 %v4341_v3, %v4341_v3  ;;  %v4342_v48 = vpack.c.bf16 %v4334_v10, %v4334_v10  ;;  %v5356_v0 = vunpack.i.h.bf16 %v5354_v51  ;;  %v5355_v9 = vunpack.i.l.bf16 %v5354_v51  ;;  %v5369_v59 = vpop.permute.xlu1 %5368 }
 0x3b1   : > { %v5371_v38 = vunpack.i.h.bf16 %v5369_v59  ;;  %v5370_v1 = vunpack.i.l.bf16 %v5369_v59 }
 0x3b2   : > { %4997 = vmatprep.subr.msk.bf16.mxu0 %vm1570_vm14, %v4343_v7  ;;  %v4348_v43 = vsel %vm1570_vm14, %v4342_v48, 0  ;;  %v4807_v60 = vsel %vm1141_vm10, %v4806_v41, %v5355_v9  ;;  %v4814_v27 = vsel %vm1141_vm10, %v4813_v20, %v5356_v0 }
 0x3b3   : > { %v5364_v15 = vpop.permute.xlu0 %5363  ;;  %4368 = vmatpush1.bf16.msra.mxu0 %v4348_v43 }
 0x3b4   : > { %v5366_v39 = vunpack.i.h.bf16 %v5364_v15  ;;  %v5365_v52 = vunpack.i.l.bf16 %v5364_v15 }
 0x3b6   : > { %v4808_v21 = vsel %vm1143_vm11, %v4807_v60, %v5365_v52  ;;  %v4815_v16 = vsel %vm1143_vm11, %v4814_v27, %v5366_v39  ;;  %4998 = vmatmul.mubr.msk.bf16.vlgmr.msra.gmra.mxu0 %vm1566_vm15, %v789_v50 }
 0x3b7   : > { %v5374_v11 = vpop.permute.xlu0 %5373  ;;  %v4816_v31 = vsel %vm1145_vm12, %v4815_v16, %v5371_v38  ;;  %v4809_v46 = vsel %vm1145_vm12, %v4808_v21, %v5370_v1 }
 0x3b8   : > { %v5376_v34 = vunpack.i.h.bf16 %v5374_v11  ;;  %v5375_v23 = vunpack.i.l.bf16 %v5374_v11 }
 0x3ba   : > { %v4817_v28 = vsel %vm1147_vm13, %v4816_v31, %v5376_v34  ;;  %v4810_v12 = vsel %vm1147_vm13, %v4809_v46, %v5375_v23 }
 0x3bb   : > { %v4819_v62 = vpack.c.bf16 %v4817_v28, %v4817_v28  ;;  %v4818_v4 = vpack.c.bf16 %v4810_v12, %v4810_v12 }
 0x3bd   : > { %4999 = vmatprep.subr.msk.bf16.mxu1 %vm1570_vm14, %v4819_v62  ;;  %v4824_v35 = vsel %vm1570_vm14, %v4818_v4, 0  ;;  %v4876_v52 = vpop.permute.xlu1 %4875 }
 0x3be   : > { %4844 = vmatpush1.bf16.msra.mxu1 %v4824_v35 }
 0x3c1   : > { %5000 = vmatmul.mubr.msk.bf16.vlgmr.msra.gmra.mxu1 %vm1566_vm15, %v790_v29  ;;  %v5415_v29 = vld [vmem:[%s5596_s21] sm:$0xff] }
 0x3c4   : > { %v4884_v16 = vpop.permute.xlu0 %4883 }
 0x3fb   : > { %v1661_v45 = vpop.f32.mrf.mxu0 }
 0x3fd   : > { %v1663_v37 = vpop.f32.mrf.mxu0 }
 0x3ff   : > { %v1665_v42 = vpop.f32.mrf.mxu0 }
 0x401   : > { %v1666_v32 = vpop.f32.mrf.mxu0 }
 0x40e   : > { %v2547_v8 = vpop.f32.mrf.mxu0 }
 0x410   : > { %v2549_v17 = vpop.f32.mrf.mxu0 }
 0x412   : > { %v2551_v13 = vpop.f32.mrf.mxu0 }
 0x414   : > { %v2552_v14 = vpop.f32.mrf.mxu0 }
 0x436   : > { %v1611_v36 = vpop.f32.mrf.mxu1 }
 0x437   : > { %v1662_v5 = vadd.f32 %v1661_v45, %v1611_v36 }
 0x438   : > { %v1613_v55 = vpop.f32.mrf.mxu1 }
 0x439   : > { %v1664_v47 = vadd.f32 %v1663_v37, %v1613_v55 }
 0x43a   : > { %v1615_v63 = vpop.f32.mrf.mxu1 }
 0x43c   : > { %v1616_v56 = vpop.f32.mrf.mxu1 }
 0x443   : > { %v2135_v25 = vpop.f32.mrf.mxu1 }
 0x444   : > { %v2142_v26 = vadd.f32 %v2135_v25, %v1662_v5 }
 0x445   : > { %v2137_v44 = vpop.f32.mrf.mxu1 }
 0x446   : > { %v2143_v19 = vadd.f32 %v2137_v44, %v1664_v47  ;;  %v2554_v40 = vadd.f32 %v2547_v8, %v2142_v26 }
 0x447   : > { %v2139_v54 = vpop.f32.mrf.mxu1 }
 0x448   : > { %v2555_v33 = vadd.f32 %v2549_v17, %v2143_v19 }
 0x449   : > { %v2140_v2 = vpop.f32.mrf.mxu1 }
 0x459   : > { %v3023_v58 = vpop.f32.mrf.mxu1 }
 0x45a   : > { %v3030_v49 = vadd.f32 %v3023_v58, %v2554_v40 }
 0x45b   : > { %v3025_v53 = vpop.f32.mrf.mxu1 }
 0x45c   : > { %v3031_v57 = vadd.f32 %v3025_v53, %v2555_v33 }
 0x45d   : > { %v3027_v24 = vpop.f32.mrf.mxu1 }
 0x45f   : > { %v3028_v51 = vpop.f32.mrf.mxu1 }
 0x461   : > { %v3911_v3 = vpop.f32.mrf.mxu1 }
 0x462   : > { %v3499_v10 = vpop.f32.mrf.mxu0 }
 0x463   : > { %v3913_v61 = vpop.f32.mrf.mxu1  ;;  %v3506_v43 = vadd.f32 %v3499_v10, %v3030_v49 }
 0x464   : > { %v3501_v18 = vpop.f32.mrf.mxu0 }
 0x465   : > { %v3915_v7 = vpop.f32.mrf.mxu1  ;;  %v3507_v30 = vadd.f32 %v3501_v18, %v3031_v57  ;;  %v3918_v50 = vadd.f32 %v3911_v3, %v3506_v43 }
 0x466   : > { %v3503_v48 = vpop.f32.mrf.mxu0 }
 0x467   : > { %v3916_v0 = vpop.f32.mrf.mxu1  ;;  %v3919_v41 = vadd.f32 %v3913_v61, %v3507_v30 }
 0x468   : > { %v3504_v9 = vpop.f32.mrf.mxu0 }
 0x476   : > { %v4387_v6 = vpop.f32.mrf.mxu0 }
 0x477   : > { %v4394_v20 = vadd.f32 %v4387_v6, %v3918_v50 }
 0x478   : > { %v4389_v59 = vpop.f32.mrf.mxu0 }
 0x479   : > { %v4395_v60 = vadd.f32 %v4389_v59, %v3919_v41 }
 0x47a   : > { %v4391_v22 = vpop.f32.mrf.mxu0 }
 0x47c   : > { %v4392_v15 = vpop.f32.mrf.mxu0 }
 0x481   : > { %v4863_v39 = vpop.f32.mrf.mxu1 }
 0x482   : > { %v4870_v27 = vadd.f32 %v4863_v39, %v4394_v20 }
 0x483   : > { %v4865_v38 = vpop.f32.mrf.mxu1 }
 0x484   : > { %v4878_v1 = vmul.f32 %v4876_v52, %v4870_v27  ;;  %v4871_v21 = vadd.f32 %v4865_v38, %v4395_v60 }
 0x485   : > { %v4867_v11 = vpop.f32.mrf.mxu1 }
 0x486   : > { %v4886_v34 = vadd.f32 %v4884_v16, %v4878_v1  ;;  %v4879_v23 = vmul.f32 %v4876_v52, %v4871_v21 }
 0x487   : > { %v4868_v31 = vpop.f32.mrf.mxu1 }
 0x488   : > { %v4890_v46 = vmul.f32 0.01, %v4886_v34  ;;  %v4887_v28 = vadd.f32 %v4884_v16, %v4879_v23  ;;  %vm4888_vm0 = vcmp.ge.f32.partialorder %v4886_v34, 0.0 }
 0x48a   : > { %vm4889_vm1 = vcmp.ge.f32.partialorder %v4887_v28, 0.0  ;;  %v4891_v12 = vmul.f32 0.01, %v4887_v28  ;;  %v4892_v62 = vsel %vm4888_vm0, %v4886_v34, %v4890_v46 }
 0x48c   : > { %v4893_v4 = vsel %vm4889_vm1, %v4887_v28, %v4891_v12 }
 0x48d   : > { %v4896_v35 = vcombine.low %v4892_v62, %v4893_v4 }
 0x48f   : > { %v4898_v45 = vadd.f32 %v5415_v29, %v4896_v35 }
 0x491   : > { %4899 = vst [vmem:[%s271_s19] sm:$0xff] %v4898_v45 }
 0x492   : > { %5429 = shalt.err (!%p5426_p3)
}
 0x493   : > { %s5430_s21 = scalar_lea.hbm %s4913_s9, 128  ;;  %s5434_s17 = scalar_lea.hbm %s8124_s7, 256 }
 0x494   : > { %p5431_p4 = scmp.ne.s32.totalorder %s4913_s9, %s5430_s21  ;;  %p5435_p9 = scmp.lt.s32.totalorder %s4913_s9, %s8124_s7 }
 0x495   : > { %p5436_p10 = scmp.lt.s32.totalorder %s5434_s17, %s5430_s21 }
 0x496   : > { %p5432_p7 = pnand %p5431_p4, %p5571_p5 }
 0x497   : > { %p5437_p11 = por %p5436_p10, %p5435_p9 }
 0x498   : > { %p5433_p8 = pneg %p5432_p7 }
 0x49a   : > { %p5438_p12 = pnand %p5437_p11, %p5433_p8 }
 0x49c   : > { %5441 = shalt.err (!%p5438_p12)
}
 0x49d   : > { %5008 = dma.vmem_to_hbm [thread:$0]  (%p5571_p5), %s4916_s20, 128, %s4913_s9, %s4901_s29  }
 0x49e PF: > { %p5014_p13 = scmp.ge.s32.totalorder %s5476_s27, 2  ;;  %s4927_s22 = sand.u32 1, %s5464_s24  }
 0x49f   : > { %s4928_s23 = scalar_lea.sflag [#allocation4], %s4927_s22 }
 0x4a0   : > { %p5011_p0 = pnand %p5014_p13, %p5575_p6 }
 0x4a2   : > { %p5012_p1 = pneg %p5011_p0 }
 0x4a4   : > { %5459 = dma.done.wait (%p5012_p1), %s4928_s23, 128  }
 0x4a5   : > { %5461 = vsyncadd (%p5012_p1), %s4928_s23, 4294967168  ;;  %p17_p2 = scmp.ge.s32.totalorder %s5558_s30, 4   ;;  %s8611_s24 = smov %s5468_s25 }
 0x4a6   : > { %s8612_s25 = smov %s5472_s26  ;;  %s8613_s26 = smov %s5569_s10 }
 0x4a7   : > { %s8614_s27 = smov %s5558_s30  ;;  %19 = sbr.rel (!%p17_p2) target bundleno = 3 (0x3), region = 83 }
 0x4ac   :  { %4933 = vsyncpa [#allocation4], 1 }
 0x4ad   :  { %4935 = vsyncpa [#allocation4 + $0x1], 1 }

</bundles_post_ra>
